<compile_context>
chip_gen: v5e
topology: v5e:2x2
jax: 0.10.0
libtpu: 0.0.40
codegen_flags: <defaults>
</compile_context>

<pallas_src>
import functools
import math

import jax
import jax.numpy as jnp
from jax.experimental import pallas as pl
from jax.experimental.pallas import tpu as pltpu

NEG_INF = -1e9  # additive mask value; exp underflows to exactly 0 in f32


# --------------------------------------------------------------------------------------
# Kernel
# --------------------------------------------------------------------------------------
def graph_mha_kernel(nb_ref,                     # SMEM [num_dst, num_src] int32 (scalar prefetch)
                     q_ref, k_ref, v_ref,        # VMEM [H,Td,D] bf16, [H,Ts,D] bf16, [H,Ts,D] bf16
                     cnt_ref,                    # VMEM [Td, Ts] int8 edge multiplicity
                     x_ref,                      # VMEM [Td, dm] bf16 (dst rows, skip path)
                     wxo_ref, bxo_ref, wo_ref,   # VMEM [dm,dm] bf16, [1,dm] f32, [H,D,dm] bf16
                     out_ref,                    # VMEM [Td, dm] f32
                     m_sc, l_sc, acc_sc,         # scratch [H,Td,1] f32, [H,Td,1] f32, [H,Td,D] f32
                     *, n_heads):
    f32 = jnp.float32
    bf16 = jnp.bfloat16
    i = pl.program_id(0)                 # destination-node tile (parallel)
    j = pl.program_id(1)                 # source-node tile (online-softmax reduction axis)

    @pl.when(j == 0)
    def _init():
        m_sc[...] = jnp.full_like(m_sc, NEG_INF)
        l_sc[...] = jnp.zeros_like(l_sc)
        acc_sc[...] = jnp.zeros_like(acc_sc)

    # Skip (dst, src) blocks with no edges entirely: no exp, no MXU work.
    @pl.when(nb_ref[i, j] > 0)
    def _update():
        cnt = cnt_ref[...].astype(f32)                                   # [Td, Ts]
        mask = jnp.where(cnt > 0.0, 0.0, NEG_INF)                        # additive non-edge mask
        # Per-head scores: contract over D, heads batched (no transposes, no lane slicing).
        s = jnp.einsum('htd,hsd->hts', q_ref[...], k_ref[...],
                       preferred_element_type=f32)                       # [H, Td, Ts]
        s = s + mask[None, :, :]
        m_new = jnp.maximum(m_sc[...], jnp.max(s, axis=-1, keepdims=True))
        alpha = jnp.exp(m_sc[...] - m_new)                               # rescale old statistics
        # Multiply by edge multiplicity (PyG scatter-softmax counts duplicate edges).
        p = cnt[None, :, :] * jnp.exp(s - m_new)                         # [H, Td, Ts]
        l_sc[...] = alpha * l_sc[...] + jnp.sum(p, axis=-1, keepdims=True)
        acc_sc[...] = alpha * acc_sc[...] + jnp.einsum(
            'hts,hsd->htd', p.astype(bf16), v_ref[...], preferred_element_type=f32)
        m_sc[...] = m_new

    @pl.when(j == pl.num_programs(1) - 1)
    def _finalize():
        # Skip connection + output bias, folded through the output projection:
        #   x_tile @ (Wskip @ Wout) + (bskip @ Wout + bout)
        out = jnp.dot(x_ref[...], wxo_ref[...], preferred_element_type=f32) + bxo_ref[...]
        for h in range(n_heads):            # once per dst tile; H*D < 128 -> keep per-head
            l_h = l_sc[h]                                                # [Td, 1]
            # Rows with no incoming edges have l == 0 and acc == 0 -> message stays exactly 0.
            inv_l = pl.reciprocal(l_h + (l_h == 0.0).astype(f32), approx=True)
            msg = (acc_sc[h] * inv_l).astype(bf16)                       # [Td, D]
            out = out + jnp.dot(msg, wo_ref[h], preferred_element_type=f32)
        out_ref[...] = out


# --------------------------------------------------------------------------------------
# Tile / VMEM-budget selection
# --------------------------------------------------------------------------------------
def _tile_candidates_dst(n, cap=512):
    # Multiples of 32 keep blocks aligned to the native tiling of every operand dtype used
    # (int8 counts pack 32 sublanes); the full extent is always layout-legal.
    cands = [t for t in range(32, min(n, cap) + 1, 32) if n % t == 0]
    cands.append(n)
    return sorted(set(cands), reverse=True)


def _tile_candidates_src(n, cap=2048):
    # ts is the lane (last) dim of the count block -> multiple of 128 or the full extent.
    cands = [t for t in range(128, min(n, cap) + 1, 128) if n % t == 0]
    cands.append(n)
    return sorted(set(cands), reverse=True)


def _padded_bytes(shape, itemsize):
    # Rough (8, 128)-tiling VMEM estimate (lane dim pads to 128, sublane dim to 8).
    s = list(shape)
    s[-1] = -(-s[-1] // 128) * 128
    if len(s) >= 2:
        s[-2] = -(-s[-2] // 8) * 8
    n = 1
    for d in s:
        n *= d
    return n * itemsize


def _estimate_vmem_bytes(td, ts, n_heads, head_dim, dm):
    H, D = n_heads, head_dim
    b = 0
    b += 2 * _padded_bytes((H, td, D), 2)             # Q tile (double buffered)
    b += 2 * 2 * _padded_bytes((H, ts, D), 2)         # K, V tiles
    b += 2 * _padded_bytes((td, ts), 1)               # int8 count tile
    b += 2 * _padded_bytes((td, dm), 2)               # x tile (skip path)
    b += 2 * _padded_bytes((td, dm), 4)               # output tile
    # grid-invariant weights (single buffered via pl.Buffered(1))
    b += _padded_bytes((dm, dm), 2) + _padded_bytes((H, D, dm), 2) + _padded_bytes((1, dm), 4)
    # online-softmax scratch
    b += 2 * _padded_bytes((H, td, 1), 4) + _padded_bytes((H, td, D), 4)
    # in-kernel f32 temporaries (scores, probabilities, counts/mask)
    b += 3 * _padded_bytes((H, td, ts), 4) + 2 * _padded_bytes((td, ts), 4)
    return b


def _vmem_budget_bytes():
    try:
        cap = pltpu.get_tpu_info().vmem_capacity_bytes
    except Exception:
        cap = 64 * 1024 * 1024            # conservative default (v7x per-TensorCore VMEM)
    # ~100 MiB on v5e/v6e (128 MiB VMEM), ~51 MiB on v7x (64 MiB VMEM).
    return min(int(cap * 0.8), 100 * 1024 * 1024)


def _choose_tiles(n, n_heads, head_dim, dm, budget):
    best = None
    for td in _tile_candidates_dst(n):
        for ts in _tile_candidates_src(n):
            if _estimate_vmem_bytes(td, ts, n_heads, head_dim, dm) > budget:
                continue
            # Prefer >= 2 steps on the "parallel" dst axis so both v7x TensorCores stay busy.
            two_dst_steps = (n // td) >= 2
            key = (two_dst_steps, td * ts, ts, td)
            if best is None or key > best[0]:
                best = (key, td, ts)
    if best is None:      # nothing fits the estimate: fall back to the smallest legal tiles
        return _tile_candidates_dst(n)[-1], _tile_candidates_src(n)[-1]
    return best[1], best[2]


# --------------------------------------------------------------------------------------
# Wrapper
# --------------------------------------------------------------------------------------
def graph_multihead_attention(x, edge_index, params, *, n_heads, head_dim,
                              single_buffer_weights=True):
    """Eval-mode forward of Graph_MultiHeadAttention (TransformerConv + out-projection)."""
    N, dm = x.shape
    H, D = n_heads, head_dim
    bf = jnp.bfloat16
    scale = 1.0 / math.sqrt(D)

    # ---- projections hoisted out of the grid: one wide MXU-friendly matmul each ----
    q = (x @ params["wq"] + params["bq"]) * scale          # 1/sqrt(D) folded into the Q path
    k = x @ params["wk"] + params["bk"]
    v = x @ params["wv"] + params["bv"]

    def to_heads(a):                                       # [N, H*D] -> [H, N, D] (head-major cols)
        return a.reshape(N, H, D).transpose(1, 0, 2).astype(bf)

    q3, k3, v3 = to_heads(q), to_heads(k), to_heads(v)
    wo3 = params["wout"].reshape(H, D, dm).astype(bf)      # per-head slice of Wout
    w_xo = (params["wskip"] @ params["wout"]).astype(bf)   # skip path folded through out-proj
    b_xo = (params["bskip"] @ params["wout"] + params["bout"]).astype(jnp.float32)

    # ---- dense int8 edge-multiplicity counts + per-block non-empty table ----
    src, dst = edge_index[0], edge_index[1]
    counts_f = jnp.zeros((N, N), jnp.float32).at[dst, src].add(1.0)  # duplicates counted (PyG)
    # TODO(synk): int8 saturates at 127 duplicates of a single edge (never happens in practice).
    counts = jnp.minimum(counts_f, 127.0).astype(jnp.int8)

    budget = _vmem_budget_bytes()
    td, ts = _choose_tiles(N, H, D, dm, budget)
    num_dst, num_src = N // td, N // ts

    nonempty = (counts_f.reshape(num_dst, td, num_src, ts).sum(axis=(1, 3)) > 0)
    nonempty = nonempty.astype(jnp.int32)                  # [num_dst, num_src] SMEM prefetch table

    x_bf = x.astype(bf)
    kernel = functools.partial(graph_mha_kernel, n_heads=H)

    def run(single_buffer):
        inv_kw = {"pipeline_mode": pl.Buffered(1)} if single_buffer else {}
        grid_spec = pltpu.PrefetchScalarGridSpec(
            num_scalar_prefetch=1,
            grid=(num_dst, num_src),
            in_specs=[
                pl.BlockSpec((H, td, D), lambda i, j, nb: (0, i, 0)),            # Q (dst-tiled)
                pl.BlockSpec((H, ts, D), lambda i, j, nb: (0, j, 0)),            # K (src-tiled)
                pl.BlockSpec((H, ts, D), lambda i, j, nb: (0, j, 0)),            # V (src-tiled)
                pl.BlockSpec((td, ts), lambda i, j, nb: (i, j)),                 # int8 edge counts
                pl.BlockSpec((td, dm), lambda i, j, nb: (i, 0)),                 # x rows (skip)
                pl.BlockSpec((dm, dm), lambda i, j, nb: (0, 0), **inv_kw),       # Wskip @ Wout
                pl.BlockSpec((1, dm), lambda i, j, nb: (0, 0), **inv_kw),        # bskip@Wout + bout
                pl.BlockSpec((H, D, dm), lambda i, j, nb: (0, 0, 0), **inv_kw),  # Wout per head
            ],
            out_specs=pl.BlockSpec((td, dm), lambda i, j, nb: (i, 0)),
            scratch_shapes=[
                pltpu.VMEM((H, td, 1), jnp.float32),     # running max
                pltpu.VMEM((H, td, 1), jnp.float32),     # running denominator
                pltpu.VMEM((H, td, D), jnp.float32),     # running weighted-value accumulator
            ],
        )
        return pl.pallas_call(
            kernel,
            out_shape=jax.ShapeDtypeStruct((N, dm), jnp.float32),
            grid_spec=grid_spec,
            compiler_params=pltpu.CompilerParams(
                dimension_semantics=("parallel", "arbitrary"),
                vmem_limit_bytes=budget),
        )(nonempty, q3, k3, v3, counts, x_bf, w_xo, b_xo, wo3)

    if not single_buffer_weights:
        return run(False)
    try:
        return run(True)
    except Exception:
        # Older JAX without BlockSpec.pipeline_mode: fall back to default double buffering
        # (the invariant weights are only a few KiB here, so the cost is negligible).
        return run(False)


# --------------------------------------------------------------------------------------
# Pure-JAX reference (PyG scatter-softmax semantics, duplicate edges counted)
# --------------------------------------------------------------------------------------
def reference_forward(x, edge_index, params, *, n_heads, head_dim):
    N, _ = x.shape
    src, dst = edge_index[0], edge_index[1]
    counts = jnp.zeros((N, N), jnp.float32).at[dst, src].add(1.0)
    q = x @ params["wq"] + params["bq"]
    k = x @ params["wk"] + params["bk"]
    v = x @ params["wv"] + params["bv"]
    heads = []
    for h in range(n_heads):
        sl = slice(h * head_dim, (h + 1) * head_dim)
        s = (q[:, sl] @ k[:, sl].T) / math.sqrt(head_dim)
        e = counts * jnp.exp(s)                     # scores are small at test scale
        d = e.sum(-1, keepdims=True)
        d = jnp.where(d > 0, d, 1.0)                # no-in-edge rows -> zero message
        heads.append((e / d) @ v[:, sl])
    node = jnp.concatenate(heads, -1) + (x @ params["wskip"] + params["bskip"])
    return node @ params["wout"] + params["bout"]


def init_params(key, d_model, n_heads, head_dim):
    hd = n_heads * head_dim
    ks = jax.random.split(key, 10)
    scale = 0.1
    # Weights stored as [in, out] (already transposed vs. torch's [out, in]).
    return {
        "wq": scale * jax.random.normal(ks[0], (d_model, hd), jnp.float32),
        "bq": scale * jax.random.normal(ks[1], (1, hd), jnp.float32),
        "wk": scale * jax.random.normal(ks[2], (d_model, hd), jnp.float32),
        "bk": scale * jax.random.normal(ks[3], (1, hd), jnp.float32),
        "wv": scale * jax.random.normal(ks[4], (d_model, hd), jnp.float32),
        "bv": scale * jax.random.normal(ks[5], (1, hd), jnp.float32),
        "wskip": scale * jax.random.normal(ks[6], (d_model, hd), jnp.float32),
        "bskip": scale * jax.random.normal(ks[7], (1, hd), jnp.float32),
        "wout": scale * jax.random.normal(ks[8], (hd, d_model), jnp.float32),
        "bout": scale * jax.random.normal(ks[9], (1, d_model), jnp.float32),
    }


if __name__ == "__main__":
    d_model, n_heads = 32, 4
    head_dim = d_model // n_heads
    N, E = 64, 128

    key = jax.random.PRNGKey(0)
    k_x, k_e1, k_e2, k_p = jax.random.split(key, 4)
    x = jax.random.normal(k_x, (N, d_model), jnp.float32)            # node features
    # Destinations restricted to the first half so the second dst tile has no incoming edges:
    # exercises both the empty-block skip and the "no incoming edge -> skip path only" rows.
    src = jax.random.randint(k_e1, (E,), 0, N, jnp.int32)
    dst = jax.random.randint(k_e2, (E,), 0, N // 2, jnp.int32)
    edge_index = jnp.stack([src, dst])                               # [2, E] (src, dst)
    params = init_params(k_p, d_model, n_heads, head_dim)

    out = graph_multihead_attention(x, edge_index, params,
                                    n_heads=n_heads, head_dim=head_dim)
    out = jax.block_until_ready(out)

    ref = reference_forward(x, edge_index, params, n_heads=n_heads, head_dim=head_dim)
    assert out.shape == (N, d_model)
    max_err = float(jnp.max(jnp.abs(out - ref)))
    # bf16 MXU operands (f32 accumulation) + approx reciprocal -> small delta vs f32 reference.
    assert jnp.allclose(out, ref, atol=2e-2, rtol=2e-2), f"max abs err {max_err}"
    print("KERNEL_OK")
</pallas_src>

<mosaic_0001>
module attributes {stable_mosaic.version = 11 : i64} {
  func.func @graph_mha_kernel(%arg0: i32, %arg1: i32, %arg2: memref<2x1xi32, #tpu.memory_space<smem>>, %arg3: memref<4x32x8xbf16, #tpu.memory_space<vmem>>, %arg4: memref<4x64x8xbf16, #tpu.memory_space<vmem>>, %arg5: memref<4x64x8xbf16, #tpu.memory_space<vmem>>, %arg6: memref<32x64xi8, #tpu.memory_space<vmem>>, %arg7: memref<32x32xbf16, #tpu.memory_space<vmem>>, %arg8: memref<32x32xbf16, #tpu.memory_space<vmem>>, %arg9: memref<1x32xf32, #tpu.memory_space<vmem>>, %arg10: memref<4x8x32xbf16, #tpu.memory_space<vmem>>, %arg11: memref<32x32xf32, #tpu.memory_space<vmem>>, %arg12: memref<4x32x1xf32, #tpu.memory_space<vmem>>, %arg13: memref<4x32x1xf32, #tpu.memory_space<vmem>>, %arg14: memref<4x32x8xf32, #tpu.memory_space<vmem>>) attributes {dimension_semantics = [#tpu.dimension_semantics<parallel>, #tpu.dimension_semantics<arbitrary>], iteration_bounds = array<i64: 2, 1>, scalar_prefetch = 1 : i64, scratch_operands = 3 : i64, tpu.core_type = #tpu.core_type<tc>, window_params = [{transform_indices = @transform_0, window_bounds = array<i64: 4, 32, 8>}, {transform_indices = @transform_1, window_bounds = array<i64: 4, 64, 8>}, {transform_indices = @transform_2, window_bounds = array<i64: 4, 64, 8>}, {transform_indices = @transform_3, window_bounds = array<i64: 32, 64>}, {transform_indices = @transform_4, window_bounds = array<i64: 32, 32>}, {pipeline_mode = #tpu.pipeline_mode<synchronous>, transform_indices = @transform_5, window_bounds = array<i64: 32, 32>}, {pipeline_mode = #tpu.pipeline_mode<synchronous>, transform_indices = @transform_6, window_bounds = array<i64: 1, 32>}, {pipeline_mode = #tpu.pipeline_mode<synchronous>, transform_indices = @transform_7, window_bounds = array<i64: 4, 8, 32>}, {transform_indices = @transform_8, window_bounds = array<i64: 32, 32>}]} {
    %c0_i32 = arith.constant 0 : i32
    %0 = arith.cmpi eq, %arg1, %c0_i32 : i32
    %1 = arith.extui %0 : i1 to i32
    %c0_i32_0 = arith.constant 0 : i32
    %2 = arith.cmpi ne, %1, %c0_i32_0 : i32
    scf.if %2 {
      %cst = arith.constant -1.000000e+09 : f32
      %12 = vector.broadcast %cst : f32 to vector<4x32x1xf32>
      %c0 = arith.constant 0 : index
      %c0_5 = arith.constant 0 : index
      %c0_6 = arith.constant 0 : index
      %13 = vector.load %arg12[%c0, %c0_5, %c0_6] : memref<4x32x1xf32, #tpu.memory_space<vmem>>, vector<4x32x1xf32>
      tpu.vector_store %arg12[%c0, %c0_5, %c0_6], %12 {strides = array<i32>} : memref<4x32x1xf32, #tpu.memory_space<vmem>>, vector<4x32x1xf32>,
      %cst_7 = arith.constant 0.000000e+00 : f32
      %14 = vector.broadcast %cst_7 : f32 to vector<4x32x1xf32>
      %c0_8 = arith.constant 0 : index
      %c0_9 = arith.constant 0 : index
      %c0_10 = arith.constant 0 : index
      %15 = vector.load %arg13[%c0_8, %c0_9, %c0_10] : memref<4x32x1xf32, #tpu.memory_space<vmem>>, vector<4x32x1xf32>
      tpu.vector_store %arg13[%c0_8, %c0_9, %c0_10], %14 {strides = array<i32>} : memref<4x32x1xf32, #tpu.memory_space<vmem>>, vector<4x32x1xf32>,
      %cst_11 = arith.constant 0.000000e+00 : f32
      %16 = vector.broadcast %cst_11 : f32 to vector<4x32x8xf32>
      %c0_12 = arith.constant 0 : index
      %c0_13 = arith.constant 0 : index
      %c0_14 = arith.constant 0 : index
      %17 = vector.load %arg14[%c0_12, %c0_13, %c0_14] : memref<4x32x8xf32, #tpu.memory_space<vmem>>, vector<4x32x8xf32>
      tpu.vector_store %arg14[%c0_12, %c0_13, %c0_14], %16 {strides = array<i32>} : memref<4x32x8xf32, #tpu.memory_space<vmem>>, vector<4x32x8xf32>,
    } else {
    }
    %3 = arith.index_cast %arg0 : i32 to index
    %4 = arith.index_cast %arg1 : i32 to index
    %5 = memref.load %arg2[%3, %4] : memref<2x1xi32, #tpu.memory_space<smem>>
    %c0_i32_1 = arith.constant 0 : i32
    %6 = arith.cmpi sgt, %5, %c0_i32_1 : i32
    %7 = arith.extui %6 : i1 to i32
    %c0_i32_2 = arith.constant 0 : i32
    %8 = arith.cmpi ne, %7, %c0_i32_2 : i32
    scf.if %8 {
      %c0 = arith.constant 0 : index
      %c0_5 = arith.constant 0 : index
      %12 = vector.load %arg6[%c0, %c0_5] : memref<32x64xi8, #tpu.memory_space<vmem>>, vector<32x64xi8>
      %13 = arith.sitofp %12 : vector<32x64xi8> to vector<32x64xf32>
      %cst = arith.constant 0.000000e+00 : f32
      %14 = vector.broadcast %cst : f32 to vector<32x64xf32>
      %15 = arith.cmpf ogt, %13, %14 : vector<32x64xf32>
      %cst_6 = arith.constant 0.000000e+00 : f32
      %cst_7 = arith.constant -1.000000e+09 : f32
      %16 = vector.broadcast %cst_6 : f32 to vector<32x64xf32>
      %17 = vector.broadcast %cst_7 : f32 to vector<32x64xf32>
      %18 = arith.select %15, %16, %17 : vector<32x64xi1>, vector<32x64xf32>
      %c0_8 = arith.constant 0 : index
      %c0_9 = arith.constant 0 : index
      %c0_10 = arith.constant 0 : index
      %19 = vector.load %arg3[%c0_8, %c0_9, %c0_10] : memref<4x32x8xbf16, #tpu.memory_space<vmem>>, vector<4x32x8xbf16>
      %c0_11 = arith.constant 0 : index
      %c0_12 = arith.constant 0 : index
      %c0_13 = arith.constant 0 : index
      %20 = vector.load %arg4[%c0_11, %c0_12, %c0_13] : memref<4x64x8xbf16, #tpu.memory_space<vmem>>, vector<4x64x8xbf16>
      "tpu.trace_start"() <{level = 10 : i32, message = "htd,hsd->hts"}> : () -> ()
      %cst_14 = arith.constant dense<0.000000e+00> : vector<4x32x64xf32>
      %21 = tpu.matmul %19, %20, %cst_14 {dimension_numbers = #tpu.dot_dimension_numbers<[2], [2], [1], [1], [0, 0, 0, 1, 1, 1], [0], [0]>} : vector<4x32x8xbf16>, vector<4x64x8xbf16>, vector<4x32x64xf32> -> vector<4x32x64xf32>
      "tpu.trace_stop"() : () -> ()
      %22 = vector.shape_cast %18 : vector<32x64xf32> to vector<1x32x64xf32>
      %23 = vector.broadcast %22 : vector<1x32x64xf32> to vector<4x32x64xf32>
      %24 = arith.addf %21, %23 : vector<4x32x64xf32>
      %c0_15 = arith.constant 0 : index
      %c0_16 = arith.constant 0 : index
      %c0_17 = arith.constant 0 : index
      %25 = vector.load %arg12[%c0_15, %c0_16, %c0_17] : memref<4x32x1xf32, #tpu.memory_space<vmem>>, vector<4x32x1xf32>
      %cst_18 = arith.constant dense<0xFF800000> : vector<4x32xf32>
      %26 = vector.multi_reduction <maximumf>, %24, %cst_18 [2] : vector<4x32x64xf32> to vector<4x32xf32>
      %27 = vector.shape_cast %26 : vector<4x32xf32> to vector<4x32x1xf32>
      %28 = arith.maximumf %25, %27 : vector<4x32x1xf32>
      %c0_19 = arith.constant 0 : index
      %c0_20 = arith.constant 0 : index
      %c0_21 = arith.constant 0 : index
      %29 = vector.load %arg12[%c0_19, %c0_20, %c0_21] : memref<4x32x1xf32, #tpu.memory_space<vmem>>, vector<4x32x1xf32>
      %30 = arith.subf %29, %28 : vector<4x32x1xf32>
      %31 = math.exp %30 : vector<4x32x1xf32>
      %32 = vector.shape_cast %13 : vector<32x64xf32> to vector<1x32x64xf32>
      %33 = vector.broadcast %28 : vector<4x32x1xf32> to vector<4x32x64xf32>
      %34 = arith.subf %24, %33 : vector<4x32x64xf32>
      %35 = math.exp %34 : vector<4x32x64xf32>
      %36 = vector.broadcast %32 : vector<1x32x64xf32> to vector<4x32x64xf32>
      %37 = arith.mulf %36, %35 : vector<4x32x64xf32>
      %c0_22 = arith.constant 0 : index
      %c0_23 = arith.constant 0 : index
      %c0_24 = arith.constant 0 : index
      %38 = vector.load %arg13[%c0_22, %c0_23, %c0_24] : memref<4x32x1xf32, #tpu.memory_space<vmem>>, vector<4x32x1xf32>
      %39 = arith.mulf %31, %38 : vector<4x32x1xf32>
      %cst_25 = arith.constant dense<0.000000e+00> : vector<4x32xf32>
      %40 = vector.multi_reduction <add>, %37, %cst_25 [2] : vector<4x32x64xf32> to vector<4x32xf32>
      %41 = vector.shape_cast %40 : vector<4x32xf32> to vector<4x32x1xf32>
      %42 = arith.addf %39, %41 : vector<4x32x1xf32>
      %c0_26 = arith.constant 0 : index
      %c0_27 = arith.constant 0 : index
      %c0_28 = arith.constant 0 : index
      %43 = vector.load %arg13[%c0_26, %c0_27, %c0_28] : memref<4x32x1xf32, #tpu.memory_space<vmem>>, vector<4x32x1xf32>
      tpu.vector_store %arg13[%c0_26, %c0_27, %c0_28], %42 {strides = array<i32>} : memref<4x32x1xf32, #tpu.memory_space<vmem>>, vector<4x32x1xf32>,
      %c0_29 = arith.constant 0 : index
      %c0_30 = arith.constant 0 : index
      %c0_31 = arith.constant 0 : index
      %44 = vector.load %arg14[%c0_29, %c0_30, %c0_31] : memref<4x32x8xf32, #tpu.memory_space<vmem>>, vector<4x32x8xf32>
      %45 = vector.broadcast %31 : vector<4x32x1xf32> to vector<4x32x8xf32>
      %46 = arith.mulf %45, %44 : vector<4x32x8xf32>
      %47 = arith.truncf %37 : vector<4x32x64xf32> to vector<4x32x64xbf16>
      %c0_32 = arith.constant 0 : index
      %c0_33 = arith.constant 0 : index
      %c0_34 = arith.constant 0 : index
      %48 = vector.load %arg5[%c0_32, %c0_33, %c0_34] : memref<4x64x8xbf16, #tpu.memory_space<vmem>>, vector<4x64x8xbf16>
      "tpu.trace_start"() <{level = 10 : i32, message = "hts,hsd->htd"}> : () -> ()
      %cst_35 = arith.constant dense<0.000000e+00> : vector<4x32x8xf32>
      %49 = tpu.matmul %47, %48, %cst_35 {dimension_numbers = #tpu.dot_dimension_numbers<[2], [1], [1], [2], [0, 0, 0, 1, 1, 2], [0], [0]>} : vector<4x32x64xbf16>, vector<4x64x8xbf16>, vector<4x32x8xf32> -> vector<4x32x8xf32>
      "tpu.trace_stop"() : () -> ()
      %50 = arith.addf %46, %49 : vector<4x32x8xf32>
      %c0_36 = arith.constant 0 : index
      %c0_37 = arith.constant 0 : index
      %c0_38 = arith.constant 0 : index
      %51 = vector.load %arg14[%c0_36, %c0_37, %c0_38] : memref<4x32x8xf32, #tpu.memory_space<vmem>>, vector<4x32x8xf32>
      tpu.vector_store %arg14[%c0_36, %c0_37, %c0_38], %50 {strides = array<i32>} : memref<4x32x8xf32, #tpu.memory_space<vmem>>, vector<4x32x8xf32>,
      %c0_39 = arith.constant 0 : index
      %c0_40 = arith.constant 0 : index
      %c0_41 = arith.constant 0 : index
      %52 = vector.load %arg12[%c0_39, %c0_40, %c0_41] : memref<4x32x1xf32, #tpu.memory_space<vmem>>, vector<4x32x1xf32>
      tpu.vector_store %arg12[%c0_39, %c0_40, %c0_41], %28 {strides = array<i32>} : memref<4x32x1xf32, #tpu.memory_space<vmem>>, vector<4x32x1xf32>,
    } else {
    }
    %c0_i32_3 = arith.constant 0 : i32
    %9 = arith.cmpi eq, %arg1, %c0_i32_3 : i32
    %10 = arith.extui %9 : i1 to i32
    %c0_i32_4 = arith.constant 0 : i32
    %11 = arith.cmpi ne, %10, %c0_i32_4 : i32
    scf.if %11 {
      %c0 = arith.constant 0 : index
      %c0_5 = arith.constant 0 : index
      %12 = vector.load %arg7[%c0, %c0_5] : memref<32x32xbf16, #tpu.memory_space<vmem>>, vector<32x32xbf16>
      %c0_6 = arith.constant 0 : index
      %c0_7 = arith.constant 0 : index
      %13 = vector.load %arg8[%c0_6, %c0_7] : memref<32x32xbf16, #tpu.memory_space<vmem>>, vector<32x32xbf16>
      %cst = arith.constant dense<0.000000e+00> : vector<32x32xf32>
      %14 = tpu.matmul %12, %13, %cst {dimension_numbers = #tpu.dot_dimension_numbers<[1], [0], [0], [1], [0, 0, 1, 1], [], []>} : vector<32x32xbf16>, vector<32x32xbf16>, vector<32x32xf32> -> vector<32x32xf32>
      %c0_8 = arith.constant 0 : index
      %c0_9 = arith.constant 0 : index
      %15 = vector.load %arg9[%c0_8, %c0_9] : memref<1x32xf32, #tpu.memory_space<vmem>>, vector<1x32xf32>
      %16 = vector.broadcast %15 : vector<1x32xf32> to vector<32x32xf32>
      %17 = arith.addf %14, %16 : vector<32x32xf32>
      %c0_10 = arith.constant 0 : index
      %c0_11 = arith.constant 0 : index
      %c0_12 = arith.constant 0 : index
      %18 = vector.load %arg13[%c0_10, %c0_11, %c0_12] : memref<4x32x1xf32, #tpu.memory_space<vmem>>, vector<1x32x1xf32>
      %19 = vector.shape_cast %18 : vector<1x32x1xf32> to vector<32x1xf32>
      %cst_13 = arith.constant 0.000000e+00 : f32
      %20 = vector.broadcast %cst_13 : f32 to vector<32x1xf32>
      %21 = arith.cmpf oeq, %19, %20 : vector<32x1xf32>
      %22 = arith.extui %21 : vector<32x1xi1> to vector<32x1xi32>
      %23 = arith.sitofp %22 : vector<32x1xi32> to vector<32x1xf32>
      %24 = arith.addf %19, %23 : vector<32x1xf32>
      %25 = tpu.reciprocal %24 {approx = true} : vector<32x1xf32> -> vector<32x1xf32>
      %c0_14 = arith.constant 0 : index
      %c0_15 = arith.constant 0 : index
      %c0_16 = arith.constant 0 : index
      %26 = vector.load %arg14[%c0_14, %c0_15, %c0_16] : memref<4x32x8xf32, #tpu.memory_space<vmem>>, vector<1x32x8xf32>
      %27 = vector.shape_cast %26 : vector<1x32x8xf32> to vector<32x8xf32>
      %28 = vector.broadcast %25 : vector<32x1xf32> to vector<32x8xf32>
      %29 = arith.mulf %27, %28 : vector<32x8xf32>
      %30 = arith.truncf %29 : vector<32x8xf32> to vector<32x8xbf16>
      %c0_17 = arith.constant 0 : index
      %c0_18 = arith.constant 0 : index
      %c0_19 = arith.constant 0 : index
      %31 = vector.load %arg10[%c0_17, %c0_18, %c0_19] : memref<4x8x32xbf16, #tpu.memory_space<vmem>>, vector<1x8x32xbf16>
      %32 = vector.shape_cast %31 : vector<1x8x32xbf16> to vector<8x32xbf16>
      %cst_20 = arith.constant dense<0.000000e+00> : vector<32x32xf32>
      %33 = tpu.matmul %30, %32, %cst_20 {dimension_numbers = #tpu.dot_dimension_numbers<[1], [0], [0], [1], [0, 0, 1, 1], [], []>} : vector<32x8xbf16>, vector<8x32xbf16>, vector<32x32xf32> -> vector<32x32xf32>
      %34 = arith.addf %17, %33 : vector<32x32xf32>
      %c1 = arith.constant 1 : index
      %c0_21 = arith.constant 0 : index
      %c0_22 = arith.constant 0 : index
      %35 = vector.load %arg13[%c1, %c0_21, %c0_22] : memref<4x32x1xf32, #tpu.memory_space<vmem>>, vector<1x32x1xf32>
      %36 = vector.shape_cast %35 : vector<1x32x1xf32> to vector<32x1xf32>
      %cst_23 = arith.constant 0.000000e+00 : f32
      %37 = vector.broadcast %cst_23 : f32 to vector<32x1xf32>
      %38 = arith.cmpf oeq, %36, %37 : vector<32x1xf32>
      %39 = arith.extui %38 : vector<32x1xi1> to vector<32x1xi32>
      %40 = arith.sitofp %39 : vector<32x1xi32> to vector<32x1xf32>
      %41 = arith.addf %36, %40 : vector<32x1xf32>
      %42 = tpu.reciprocal %41 {approx = true} : vector<32x1xf32> -> vector<32x1xf32>
      %c1_24 = arith.constant 1 : index
      %c0_25 = arith.constant 0 : index
      %c0_26 = arith.constant 0 : index
      %43 = vector.load %arg14[%c1_24, %c0_25, %c0_26] : memref<4x32x8xf32, #tpu.memory_space<vmem>>, vector<1x32x8xf32>
      %44 = vector.shape_cast %43 : vector<1x32x8xf32> to vector<32x8xf32>
      %45 = vector.broadcast %42 : vector<32x1xf32> to vector<32x8xf32>
      %46 = arith.mulf %44, %45 : vector<32x8xf32>
      %47 = arith.truncf %46 : vector<32x8xf32> to vector<32x8xbf16>
      %c1_27 = arith.constant 1 : index
      %c0_28 = arith.constant 0 : index
      %c0_29 = arith.constant 0 : index
      %48 = vector.load %arg10[%c1_27, %c0_28, %c0_29] : memref<4x8x32xbf16, #tpu.memory_space<vmem>>, vector<1x8x32xbf16>
      %49 = vector.shape_cast %48 : vector<1x8x32xbf16> to vector<8x32xbf16>
      %cst_30 = arith.constant dense<0.000000e+00> : vector<32x32xf32>
      %50 = tpu.matmul %47, %49, %cst_30 {dimension_numbers = #tpu.dot_dimension_numbers<[1], [0], [0], [1], [0, 0, 1, 1], [], []>} : vector<32x8xbf16>, vector<8x32xbf16>, vector<32x32xf32> -> vector<32x32xf32>
      %51 = arith.addf %34, %50 : vector<32x32xf32>
      %c2 = arith.constant 2 : index
      %c0_31 = arith.constant 0 : index
      %c0_32 = arith.constant 0 : index
      %52 = vector.load %arg13[%c2, %c0_31, %c0_32] : memref<4x32x1xf32, #tpu.memory_space<vmem>>, vector<1x32x1xf32>
      %53 = vector.shape_cast %52 : vector<1x32x1xf32> to vector<32x1xf32>
      %cst_33 = arith.constant 0.000000e+00 : f32
      %54 = vector.broadcast %cst_33 : f32 to vector<32x1xf32>
      %55 = arith.cmpf oeq, %53, %54 : vector<32x1xf32>
      %56 = arith.extui %55 : vector<32x1xi1> to vector<32x1xi32>
      %57 = arith.sitofp %56 : vector<32x1xi32> to vector<32x1xf32>
      %58 = arith.addf %53, %57 : vector<32x1xf32>
      %59 = tpu.reciprocal %58 {approx = true} : vector<32x1xf32> -> vector<32x1xf32>
      %c2_34 = arith.constant 2 : index
      %c0_35 = arith.constant 0 : index
      %c0_36 = arith.constant 0 : index
      %60 = vector.load %arg14[%c2_34, %c0_35, %c0_36] : memref<4x32x8xf32, #tpu.memory_space<vmem>>, vector<1x32x8xf32>
      %61 = vector.shape_cast %60 : vector<1x32x8xf32> to vector<32x8xf32>
      %62 = vector.broadcast %59 : vector<32x1xf32> to vector<32x8xf32>
      %63 = arith.mulf %61, %62 : vector<32x8xf32>
      %64 = arith.truncf %63 : vector<32x8xf32> to vector<32x8xbf16>
      %c2_37 = arith.constant 2 : index
      %c0_38 = arith.constant 0 : index
      %c0_39 = arith.constant 0 : index
      %65 = vector.load %arg10[%c2_37, %c0_38, %c0_39] : memref<4x8x32xbf16, #tpu.memory_space<vmem>>, vector<1x8x32xbf16>
      %66 = vector.shape_cast %65 : vector<1x8x32xbf16> to vector<8x32xbf16>
      %cst_40 = arith.constant dense<0.000000e+00> : vector<32x32xf32>
      %67 = tpu.matmul %64, %66, %cst_40 {dimension_numbers = #tpu.dot_dimension_numbers<[1], [0], [0], [1], [0, 0, 1, 1], [], []>} : vector<32x8xbf16>, vector<8x32xbf16>, vector<32x32xf32> -> vector<32x32xf32>
      %68 = arith.addf %51, %67 : vector<32x32xf32>
      %c3 = arith.constant 3 : index
      %c0_41 = arith.constant 0 : index
      %c0_42 = arith.constant 0 : index
      %69 = vector.load %arg13[%c3, %c0_41, %c0_42] : memref<4x32x1xf32, #tpu.memory_space<vmem>>, vector<1x32x1xf32>
      %70 = vector.shape_cast %69 : vector<1x32x1xf32> to vector<32x1xf32>
      %cst_43 = arith.constant 0.000000e+00 : f32
      %71 = vector.broadcast %cst_43 : f32 to vector<32x1xf32>
      %72 = arith.cmpf oeq, %70, %71 : vector<32x1xf32>
      %73 = arith.extui %72 : vector<32x1xi1> to vector<32x1xi32>
      %74 = arith.sitofp %73 : vector<32x1xi32> to vector<32x1xf32>
      %75 = arith.addf %70, %74 : vector<32x1xf32>
      %76 = tpu.reciprocal %75 {approx = true} : vector<32x1xf32> -> vector<32x1xf32>
      %c3_44 = arith.constant 3 : index
      %c0_45 = arith.constant 0 : index
      %c0_46 = arith.constant 0 : index
      %77 = vector.load %arg14[%c3_44, %c0_45, %c0_46] : memref<4x32x8xf32, #tpu.memory_space<vmem>>, vector<1x32x8xf32>
      %78 = vector.shape_cast %77 : vector<1x32x8xf32> to vector<32x8xf32>
      %79 = vector.broadcast %76 : vector<32x1xf32> to vector<32x8xf32>
      %80 = arith.mulf %78, %79 : vector<32x8xf32>
      %81 = arith.truncf %80 : vector<32x8xf32> to vector<32x8xbf16>
      %c3_47 = arith.constant 3 : index
      %c0_48 = arith.constant 0 : index
      %c0_49 = arith.constant 0 : index
      %82 = vector.load %arg10[%c3_47, %c0_48, %c0_49] : memref<4x8x32xbf16, #tpu.memory_space<vmem>>, vector<1x8x32xbf16>
      %83 = vector.shape_cast %82 : vector<1x8x32xbf16> to vector<8x32xbf16>
      %cst_50 = arith.constant dense<0.000000e+00> : vector<32x32xf32>
      %84 = tpu.matmul %81, %83, %cst_50 {dimension_numbers = #tpu.dot_dimension_numbers<[1], [0], [0], [1], [0, 0, 1, 1], [], []>} : vector<32x8xbf16>, vector<8x32xbf16>, vector<32x32xf32> -> vector<32x32xf32>
      %85 = arith.addf %68, %84 : vector<32x32xf32>
      %c0_51 = arith.constant 0 : index
      %c0_52 = arith.constant 0 : index
      %86 = vector.load %arg11[%c0_51, %c0_52] : memref<32x32xf32, #tpu.memory_space<vmem>>, vector<32x32xf32>
      tpu.vector_store %arg11[%c0_51, %c0_52], %85 {strides = array<i32>} : memref<32x32xf32, #tpu.memory_space<vmem>>, vector<32x32xf32>,
    } else {
    }
    return
  }
  func.func @transform_0(%arg0: i32, %arg1: i32, %arg2: memref<2x1xi32, #tpu.memory_space<smem>>) -> (i32, i32, i32) {
    %c0_i32 = arith.constant 0 : i32
    %c0_i32_0 = arith.constant 0 : i32
    %c0_i32_1 = arith.constant 0 : i32
    return %c0_i32, %arg0, %c0_i32_0 : i32, i32, i32
  }
  func.func @transform_1(%arg0: i32, %arg1: i32, %arg2: memref<2x1xi32, #tpu.memory_space<smem>>) -> (i32, i32, i32) {
    %c0_i32 = arith.constant 0 : i32
    %c0_i32_0 = arith.constant 0 : i32
    %c0_i32_1 = arith.constant 0 : i32
    return %c0_i32, %arg1, %c0_i32_0 : i32, i32, i32
  }
  func.func @transform_2(%arg0: i32, %arg1: i32, %arg2: memref<2x1xi32, #tpu.memory_space<smem>>) -> (i32, i32, i32) {
    %c0_i32 = arith.constant 0 : i32
    %c0_i32_0 = arith.constant 0 : i32
    %c0_i32_1 = arith.constant 0 : i32
    return %c0_i32, %arg1, %c0_i32_0 : i32, i32, i32
  }
  func.func @transform_3(%arg0: i32, %arg1: i32, %arg2: memref<2x1xi32, #tpu.memory_space<smem>>) -> (i32, i32) {
    %c0_i32 = arith.constant 0 : i32
    return %arg0, %arg1 : i32, i32
  }
  func.func @transform_4(%arg0: i32, %arg1: i32, %arg2: memref<2x1xi32, #tpu.memory_space<smem>>) -> (i32, i32) {
    %c0_i32 = arith.constant 0 : i32
    %c0_i32_0 = arith.constant 0 : i32
    return %arg0, %c0_i32 : i32, i32
  }
  func.func @transform_5(%arg0: i32, %arg1: i32, %arg2: memref<2x1xi32, #tpu.memory_space<smem>>) -> (i32, i32) {
    %c0_i32 = arith.constant 0 : i32
    %c0_i32_0 = arith.constant 0 : i32
    %c0_i32_1 = arith.constant 0 : i32
    return %c0_i32, %c0_i32_0 : i32, i32
  }
  func.func @transform_6(%arg0: i32, %arg1: i32, %arg2: memref<2x1xi32, #tpu.memory_space<smem>>) -> (i32, i32) {
    %c0_i32 = arith.constant 0 : i32
    %c0_i32_0 = arith.constant 0 : i32
    %c0_i32_1 = arith.constant 0 : i32
    return %c0_i32, %c0_i32_0 : i32, i32
  }
  func.func @transform_7(%arg0: i32, %arg1: i32, %arg2: memref<2x1xi32, #tpu.memory_space<smem>>) -> (i32, i32, i32) {
    %c0_i32 = arith.constant 0 : i32
    %c0_i32_0 = arith.constant 0 : i32
    %c0_i32_1 = arith.constant 0 : i32
    %c0_i32_2 = arith.constant 0 : i32
    return %c0_i32, %c0_i32_0, %c0_i32_1 : i32, i32, i32
  }
  func.func @transform_8(%arg0: i32, %arg1: i32, %arg2: memref<2x1xi32, #tpu.memory_space<smem>>) -> (i32, i32) {
    %c0_i32 = arith.constant 0 : i32
    %c0_i32_0 = arith.constant 0 : i32
    return %arg0, %c0_i32 : i32, i32
  }
}

module attributes {stable_mosaic.version = 11 : i64} {
  func.func @graph_mha_kernel(%arg0: i32, %arg1: i32, %arg2: memref<2x1xi32, #tpu.memory_space<smem>>, %arg3: memref<4x32x8xbf16, #tpu.memory_space<vmem>>, %arg4: memref<4x64x8xbf16, #tpu.memory_space<vmem>>, %arg5: memref<4x64x8xbf16, #tpu.memory_space<vmem>>, %arg6: memref<32x64xi8, #tpu.memory_space<vmem>>, %arg7: memref<32x32xbf16, #tpu.memory_space<vmem>>, %arg8: memref<32x32xbf16, #tpu.memory_space<vmem>>, %arg9: memref<1x32xf32, #tpu.memory_space<vmem>>, %arg10: memref<4x8x32xbf16, #tpu.memory_space<vmem>>, %arg11: memref<32x32xf32, #tpu.memory_space<vmem>>, %arg12: memref<4x32x1xf32, #tpu.memory_space<vmem>>, %arg13: memref<4x32x1xf32, #tpu.memory_space<vmem>>, %arg14: memref<4x32x8xf32, #tpu.memory_space<vmem>>) attributes {dimension_semantics = [#tpu.dimension_semantics<parallel>, #tpu.dimension_semantics<arbitrary>], iteration_bounds = array<i64: 2, 1>, scalar_prefetch = 1 : i64, scratch_operands = 3 : i64, tpu.core_type = #tpu.core_type<tc>, window_params = [{transform_indices = @transform_0, window_bounds = array<i64: 4, 32, 8>}, {transform_indices = @transform_1, window_bounds = array<i64: 4, 64, 8>}, {transform_indices = @transform_2, window_bounds = array<i64: 4, 64, 8>}, {transform_indices = @transform_3, window_bounds = array<i64: 32, 64>}, {transform_indices = @transform_4, window_bounds = array<i64: 32, 32>}, {pipeline_mode = #tpu.pipeline_mode<synchronous>, transform_indices = @transform_5, window_bounds = array<i64: 32, 32>}, {pipeline_mode = #tpu.pipeline_mode<synchronous>, transform_indices = @transform_6, window_bounds = array<i64: 1, 32>}, {pipeline_mode = #tpu.pipeline_mode<synchronous>, transform_indices = @transform_7, window_bounds = array<i64: 4, 8, 32>}, {transform_indices = @transform_8, window_bounds = array<i64: 32, 32>}]} {
    %c0_i32 = arith.constant 0 : i32
    %0 = arith.cmpi eq, %arg1, %c0_i32 : i32
    %1 = arith.extui %0 : i1 to i32
    %c0_i32_0 = arith.constant 0 : i32
    %2 = arith.cmpi ne, %1, %c0_i32_0 : i32
    scf.if %2 {
      %cst = arith.constant -1.000000e+09 : f32
      %12 = vector.broadcast %cst : f32 to vector<4x32x1xf32>
      %c0 = arith.constant 0 : index
      %c0_5 = arith.constant 0 : index
      %c0_6 = arith.constant 0 : index
      %13 = vector.load %arg12[%c0, %c0_5, %c0_6] : memref<4x32x1xf32, #tpu.memory_space<vmem>>, vector<4x32x1xf32>
      tpu.vector_store %arg12[%c0, %c0_5, %c0_6], %12 {strides = array<i32>} : memref<4x32x1xf32, #tpu.memory_space<vmem>>, vector<4x32x1xf32>,
      %cst_7 = arith.constant 0.000000e+00 : f32
      %14 = vector.broadcast %cst_7 : f32 to vector<4x32x1xf32>
      %c0_8 = arith.constant 0 : index
      %c0_9 = arith.constant 0 : index
      %c0_10 = arith.constant 0 : index
      %15 = vector.load %arg13[%c0_8, %c0_9, %c0_10] : memref<4x32x1xf32, #tpu.memory_space<vmem>>, vector<4x32x1xf32>
      tpu.vector_store %arg13[%c0_8, %c0_9, %c0_10], %14 {strides = array<i32>} : memref<4x32x1xf32, #tpu.memory_space<vmem>>, vector<4x32x1xf32>,
      %cst_11 = arith.constant 0.000000e+00 : f32
      %16 = vector.broadcast %cst_11 : f32 to vector<4x32x8xf32>
      %c0_12 = arith.constant 0 : index
      %c0_13 = arith.constant 0 : index
      %c0_14 = arith.constant 0 : index
      %17 = vector.load %arg14[%c0_12, %c0_13, %c0_14] : memref<4x32x8xf32, #tpu.memory_space<vmem>>, vector<4x32x8xf32>
      tpu.vector_store %arg14[%c0_12, %c0_13, %c0_14], %16 {strides = array<i32>} : memref<4x32x8xf32, #tpu.memory_space<vmem>>, vector<4x32x8xf32>,
    } else {
    }
    %3 = arith.index_cast %arg0 : i32 to index
    %4 = arith.index_cast %arg1 : i32 to index
    %5 = memref.load %arg2[%3, %4] : memref<2x1xi32, #tpu.memory_space<smem>>
    %c0_i32_1 = arith.constant 0 : i32
    %6 = arith.cmpi sgt, %5, %c0_i32_1 : i32
    %7 = arith.extui %6 : i1 to i32
    %c0_i32_2 = arith.constant 0 : i32
    %8 = arith.cmpi ne, %7, %c0_i32_2 : i32
    scf.if %8 {
      %c0 = arith.constant 0 : index
      %c0_5 = arith.constant 0 : index
      %12 = vector.load %arg6[%c0, %c0_5] : memref<32x64xi8, #tpu.memory_space<vmem>>, vector<32x64xi8>
      %13 = arith.sitofp %12 : vector<32x64xi8> to vector<32x64xf32>
      %cst = arith.constant 0.000000e+00 : f32
      %14 = vector.broadcast %cst : f32 to vector<32x64xf32>
      %15 = arith.cmpf ogt, %13, %14 : vector<32x64xf32>
      %cst_6 = arith.constant 0.000000e+00 : f32
      %cst_7 = arith.constant -1.000000e+09 : f32
      %16 = vector.broadcast %cst_6 : f32 to vector<32x64xf32>
      %17 = vector.broadcast %cst_7 : f32 to vector<32x64xf32>
      %18 = arith.select %15, %16, %17 : vector<32x64xi1>, vector<32x64xf32>
      %c0_8 = arith.constant 0 : index
      %c0_9 = arith.constant 0 : index
      %c0_10 = arith.constant 0 : index
      %19 = vector.load %arg3[%c0_8, %c0_9, %c0_10] : memref<4x32x8xbf16, #tpu.memory_space<vmem>>, vector<4x32x8xbf16>
      %c0_11 = arith.constant 0 : index
      %c0_12 = arith.constant 0 : index
      %c0_13 = arith.constant 0 : index
      %20 = vector.load %arg4[%c0_11, %c0_12, %c0_13] : memref<4x64x8xbf16, #tpu.memory_space<vmem>>, vector<4x64x8xbf16>
      "tpu.trace_start"() <{level = 10 : i32, message = "htd,hsd->hts"}> : () -> ()
      %cst_14 = arith.constant dense<0.000000e+00> : vector<4x32x64xf32>
      %21 = tpu.matmul %19, %20, %cst_14 {dimension_numbers = #tpu.dot_dimension_numbers<[2], [2], [1], [1], [0, 0, 0, 1, 1, 1], [0], [0]>} : vector<4x32x8xbf16>, vector<4x64x8xbf16>, vector<4x32x64xf32> -> vector<4x32x64xf32>
      "tpu.trace_stop"() : () -> ()
      %22 = vector.shape_cast %18 : vector<32x64xf32> to vector<1x32x64xf32>
      %23 = vector.broadcast %22 : vector<1x32x64xf32> to vector<4x32x64xf32>
      %24 = arith.addf %21, %23 : vector<4x32x64xf32>
      %c0_15 = arith.constant 0 : index
      %c0_16 = arith.constant 0 : index
      %c0_17 = arith.constant 0 : index
      %25 = vector.load %arg12[%c0_15, %c0_16, %c0_17] : memref<4x32x1xf32, #tpu.memory_space<vmem>>, vector<4x32x1xf32>
      %cst_18 = arith.constant dense<0xFF800000> : vector<4x32xf32>
      %26 = vector.multi_reduction <maximumf>, %24, %cst_18 [2] : vector<4x32x64xf32> to vector<4x32xf32>
      %27 = vector.shape_cast %26 : vector<4x32xf32> to vector<4x32x1xf32>
      %28 = arith.maximumf %25, %27 : vector<4x32x1xf32>
      %c0_19 = arith.constant 0 : index
      %c0_20 = arith.constant 0 : index
      %c0_21 = arith.constant 0 : index
      %29 = vector.load %arg12[%c0_19, %c0_20, %c0_21] : memref<4x32x1xf32, #tpu.memory_space<vmem>>, vector<4x32x1xf32>
      %30 = arith.subf %29, %28 : vector<4x32x1xf32>
      %31 = math.exp %30 : vector<4x32x1xf32>
      %32 = vector.shape_cast %13 : vector<32x64xf32> to vector<1x32x64xf32>
      %33 = vector.broadcast %28 : vector<4x32x1xf32> to vector<4x32x64xf32>
      %34 = arith.subf %24, %33 : vector<4x32x64xf32>
      %35 = math.exp %34 : vector<4x32x64xf32>
      %36 = vector.broadcast %32 : vector<1x32x64xf32> to vector<4x32x64xf32>
      %37 = arith.mulf %36, %35 : vector<4x32x64xf32>
      %c0_22 = arith.constant 0 : index
      %c0_23 = arith.constant 0 : index
      %c0_24 = arith.constant 0 : index
      %38 = vector.load %arg13[%c0_22, %c0_23, %c0_24] : memref<4x32x1xf32, #tpu.memory_space<vmem>>, vector<4x32x1xf32>
      %39 = arith.mulf %31, %38 : vector<4x32x1xf32>
      %cst_25 = arith.constant dense<0.000000e+00> : vector<4x32xf32>
      %40 = vector.multi_reduction <add>, %37, %cst_25 [2] : vector<4x32x64xf32> to vector<4x32xf32>
      %41 = vector.shape_cast %40 : vector<4x32xf32> to vector<4x32x1xf32>
      %42 = arith.addf %39, %41 : vector<4x32x1xf32>
      %c0_26 = arith.constant 0 : index
      %c0_27 = arith.constant 0 : index
      %c0_28 = arith.constant 0 : index
      %43 = vector.load %arg13[%c0_26, %c0_27, %c0_28] : memref<4x32x1xf32, #tpu.memory_space<vmem>>, vector<4x32x1xf32>
      tpu.vector_store %arg13[%c0_26, %c0_27, %c0_28], %42 {strides = array<i32>} : memref<4x32x1xf32, #tpu.memory_space<vmem>>, vector<4x32x1xf32>,
      %c0_29 = arith.constant 0 : index
      %c0_30 = arith.constant 0 : index
      %c0_31 = arith.constant 0 : index
      %44 = vector.load %arg14[%c0_29, %c0_30, %c0_31] : memref<4x32x8xf32, #tpu.memory_space<vmem>>, vector<4x32x8xf32>
      %45 = vector.broadcast %31 : vector<4x32x1xf32> to vector<4x32x8xf32>
      %46 = arith.mulf %45, %44 : vector<4x32x8xf32>
      %47 = arith.truncf %37 : vector<4x32x64xf32> to vector<4x32x64xbf16>
      %c0_32 = arith.constant 0 : index
      %c0_33 = arith.constant 0 : index
      %c0_34 = arith.constant 0 : index
      %48 = vector.load %arg5[%c0_32, %c0_33, %c0_34] : memref<4x64x8xbf16, #tpu.memory_space<vmem>>, vector<4x64x8xbf16>
      "tpu.trace_start"() <{level = 10 : i32, message = "hts,hsd->htd"}> : () -> ()
      %cst_35 = arith.constant dense<0.000000e+00> : vector<4x32x8xf32>
      %49 = tpu.matmul %47, %48, %cst_35 {dimension_numbers = #tpu.dot_dimension_numbers<[2], [1], [1], [2], [0, 0, 0, 1, 1, 2], [0], [0]>} : vector<4x32x64xbf16>, vector<4x64x8xbf16>, vector<4x32x8xf32> -> vector<4x32x8xf32>
      "tpu.trace_stop"() : () -> ()
      %50 = arith.addf %46, %49 : vector<4x32x8xf32>
      %c0_36 = arith.constant 0 : index
      %c0_37 = arith.constant 0 : index
      %c0_38 = arith.constant 0 : index
      %51 = vector.load %arg14[%c0_36, %c0_37, %c0_38] : memref<4x32x8xf32, #tpu.memory_space<vmem>>, vector<4x32x8xf32>
      tpu.vector_store %arg14[%c0_36, %c0_37, %c0_38], %50 {strides = array<i32>} : memref<4x32x8xf32, #tpu.memory_space<vmem>>, vector<4x32x8xf32>,
      %c0_39 = arith.constant 0 : index
      %c0_40 = arith.constant 0 : index
      %c0_41 = arith.constant 0 : index
      %52 = vector.load %arg12[%c0_39, %c0_40, %c0_41] : memref<4x32x1xf32, #tpu.memory_space<vmem>>, vector<4x32x1xf32>
      tpu.vector_store %arg12[%c0_39, %c0_40, %c0_41], %28 {strides = array<i32>} : memref<4x32x1xf32, #tpu.memory_space<vmem>>, vector<4x32x1xf32>,
    } else {
    }
    %c0_i32_3 = arith.constant 0 : i32
    %9 = arith.cmpi eq, %arg1, %c0_i32_3 : i32
    %10 = arith.extui %9 : i1 to i32
    %c0_i32_4 = arith.constant 0 : i32
    %11 = arith.cmpi ne, %10, %c0_i32_4 : i32
    scf.if %11 {
      %c0 = arith.constant 0 : index
      %c0_5 = arith.constant 0 : index
      %12 = vector.load %arg7[%c0, %c0_5] : memref<32x32xbf16, #tpu.memory_space<vmem>>, vector<32x32xbf16>
      %c0_6 = arith.constant 0 : index
      %c0_7 = arith.constant 0 : index
      %13 = vector.load %arg8[%c0_6, %c0_7] : memref<32x32xbf16, #tpu.memory_space<vmem>>, vector<32x32xbf16>
      %cst = arith.constant dense<0.000000e+00> : vector<32x32xf32>
      %14 = tpu.matmul %12, %13, %cst {dimension_numbers = #tpu.dot_dimension_numbers<[1], [0], [0], [1], [0, 0, 1, 1], [], []>} : vector<32x32xbf16>, vector<32x32xbf16>, vector<32x32xf32> -> vector<32x32xf32>
      %c0_8 = arith.constant 0 : index
      %c0_9 = arith.constant 0 : index
      %15 = vector.load %arg9[%c0_8, %c0_9] : memref<1x32xf32, #tpu.memory_space<vmem>>, vector<1x32xf32>
      %16 = vector.broadcast %15 : vector<1x32xf32> to vector<32x32xf32>
      %17 = arith.addf %14, %16 : vector<32x32xf32>
      %c0_10 = arith.constant 0 : index
      %c0_11 = arith.constant 0 : index
      %c0_12 = arith.constant 0 : index
      %18 = vector.load %arg13[%c0_10, %c0_11, %c0_12] : memref<4x32x1xf32, #tpu.memory_space<vmem>>, vector<1x32x1xf32>
      %19 = vector.shape_cast %18 : vector<1x32x1xf32> to vector<32x1xf32>
      %cst_13 = arith.constant 0.000000e+00 : f32
      %20 = vector.broadcast %cst_13 : f32 to vector<32x1xf32>
      %21 = arith.cmpf oeq, %19, %20 : vector<32x1xf32>
      %22 = arith.extui %21 : vector<32x1xi1> to vector<32x1xi32>
      %23 = arith.sitofp %22 : vector<32x1xi32> to vector<32x1xf32>
      %24 = arith.addf %19, %23 : vector<32x1xf32>
      %25 = tpu.reciprocal %24 {approx = true} : vector<32x1xf32> -> vector<32x1xf32>
      %c0_14 = arith.constant 0 : index
      %c0_15 = arith.constant 0 : index
      %c0_16 = arith.constant 0 : index
      %26 = vector.load %arg14[%c0_14, %c0_15, %c0_16] : memref<4x32x8xf32, #tpu.memory_space<vmem>>, vector<1x32x8xf32>
      %27 = vector.shape_cast %26 : vector<1x32x8xf32> to vector<32x8xf32>
      %28 = vector.broadcast %25 : vector<32x1xf32> to vector<32x8xf32>
      %29 = arith.mulf %27, %28 : vector<32x8xf32>
      %30 = arith.truncf %29 : vector<32x8xf32> to vector<32x8xbf16>
      %c0_17 = arith.constant 0 : index
      %c0_18 = arith.constant 0 : index
      %c0_19 = arith.constant 0 : index
      %31 = vector.load %arg10[%c0_17, %c0_18, %c0_19] : memref<4x8x32xbf16, #tpu.memory_space<vmem>>, vector<1x8x32xbf16>
      %32 = vector.shape_cast %31 : vector<1x8x32xbf16> to vector<8x32xbf16>
      %cst_20 = arith.constant dense<0.000000e+00> : vector<32x32xf32>
      %33 = tpu.matmul %30, %32, %cst_20 {dimension_numbers = #tpu.dot_dimension_numbers<[1], [0], [0], [1], [0, 0, 1, 1], [], []>} : vector<32x8xbf16>, vector<8x32xbf16>, vector<32x32xf32> -> vector<32x32xf32>
      %34 = arith.addf %17, %33 : vector<32x32xf32>
      %c1 = arith.constant 1 : index
      %c0_21 = arith.constant 0 : index
      %c0_22 = arith.constant 0 : index
      %35 = vector.load %arg13[%c1, %c0_21, %c0_22] : memref<4x32x1xf32, #tpu.memory_space<vmem>>, vector<1x32x1xf32>
      %36 = vector.shape_cast %35 : vector<1x32x1xf32> to vector<32x1xf32>
      %cst_23 = arith.constant 0.000000e+00 : f32
      %37 = vector.broadcast %cst_23 : f32 to vector<32x1xf32>
      %38 = arith.cmpf oeq, %36, %37 : vector<32x1xf32>
      %39 = arith.extui %38 : vector<32x1xi1> to vector<32x1xi32>
      %40 = arith.sitofp %39 : vector<32x1xi32> to vector<32x1xf32>
      %41 = arith.addf %36, %40 : vector<32x1xf32>
      %42 = tpu.reciprocal %41 {approx = true} : vector<32x1xf32> -> vector<32x1xf32>
      %c1_24 = arith.constant 1 : index
      %c0_25 = arith.constant 0 : index
      %c0_26 = arith.constant 0 : index
      %43 = vector.load %arg14[%c1_24, %c0_25, %c0_26] : memref<4x32x8xf32, #tpu.memory_space<vmem>>, vector<1x32x8xf32>
      %44 = vector.shape_cast %43 : vector<1x32x8xf32> to vector<32x8xf32>
      %45 = vector.broadcast %42 : vector<32x1xf32> to vector<32x8xf32>
      %46 = arith.mulf %44, %45 : vector<32x8xf32>
      %47 = arith.truncf %46 : vector<32x8xf32> to vector<32x8xbf16>
      %c1_27 = arith.constant 1 : index
      %c0_28 = arith.constant 0 : index
      %c0_29 = arith.constant 0 : index
      %48 = vector.load %arg10[%c1_27, %c0_28, %c0_29] : memref<4x8x32xbf16, #tpu.memory_space<vmem>>, vector<1x8x32xbf16>
      %49 = vector.shape_cast %48 : vector<1x8x32xbf16> to vector<8x32xbf16>
      %cst_30 = arith.constant dense<0.000000e+00> : vector<32x32xf32>
      %50 = tpu.matmul %47, %49, %cst_30 {dimension_numbers = #tpu.dot_dimension_numbers<[1], [0], [0], [1], [0, 0, 1, 1], [], []>} : vector<32x8xbf16>, vector<8x32xbf16>, vector<32x32xf32> -> vector<32x32xf32>
      %51 = arith.addf %34, %50 : vector<32x32xf32>
      %c2 = arith.constant 2 : index
      %c0_31 = arith.constant 0 : index
      %c0_32 = arith.constant 0 : index
      %52 = vector.load %arg13[%c2, %c0_31, %c0_32] : memref<4x32x1xf32, #tpu.memory_space<vmem>>, vector<1x32x1xf32>
      %53 = vector.shape_cast %52 : vector<1x32x1xf32> to vector<32x1xf32>
      %cst_33 = arith.constant 0.000000e+00 : f32
      %54 = vector.broadcast %cst_33 : f32 to vector<32x1xf32>
      %55 = arith.cmpf oeq, %53, %54 : vector<32x1xf32>
      %56 = arith.extui %55 : vector<32x1xi1> to vector<32x1xi32>
      %57 = arith.sitofp %56 : vector<32x1xi32> to vector<32x1xf32>
      %58 = arith.addf %53, %57 : vector<32x1xf32>
      %59 = tpu.reciprocal %58 {approx = true} : vector<32x1xf32> -> vector<32x1xf32>
      %c2_34 = arith.constant 2 : index
      %c0_35 = arith.constant 0 : index
      %c0_36 = arith.constant 0 : index
      %60 = vector.load %arg14[%c2_34, %c0_35, %c0_36] : memref<4x32x8xf32, #tpu.memory_space<vmem>>, vector<1x32x8xf32>
      %61 = vector.shape_cast %60 : vector<1x32x8xf32> to vector<32x8xf32>
      %62 = vector.broadcast %59 : vector<32x1xf32> to vector<32x8xf32>
      %63 = arith.mulf %61, %62 : vector<32x8xf32>
      %64 = arith.truncf %63 : vector<32x8xf32> to vector<32x8xbf16>
      %c2_37 = arith.constant 2 : index
      %c0_38 = arith.constant 0 : index
      %c0_39 = arith.constant 0 : index
      %65 = vector.load %arg10[%c2_37, %c0_38, %c0_39] : memref<4x8x32xbf16, #tpu.memory_space<vmem>>, vector<1x8x32xbf16>
      %66 = vector.shape_cast %65 : vector<1x8x32xbf16> to vector<8x32xbf16>
      %cst_40 = arith.constant dense<0.000000e+00> : vector<32x32xf32>
      %67 = tpu.matmul %64, %66, %cst_40 {dimension_numbers = #tpu.dot_dimension_numbers<[1], [0], [0], [1], [0, 0, 1, 1], [], []>} : vector<32x8xbf16>, vector<8x32xbf16>, vector<32x32xf32> -> vector<32x32xf32>
      %68 = arith.addf %51, %67 : vector<32x32xf32>
      %c3 = arith.constant 3 : index
      %c0_41 = arith.constant 0 : index
      %c0_42 = arith.constant 0 : index
      %69 = vector.load %arg13[%c3, %c0_41, %c0_42] : memref<4x32x1xf32, #tpu.memory_space<vmem>>, vector<1x32x1xf32>
      %70 = vector.shape_cast %69 : vector<1x32x1xf32> to vector<32x1xf32>
      %cst_43 = arith.constant 0.000000e+00 : f32
      %71 = vector.broadcast %cst_43 : f32 to vector<32x1xf32>
      %72 = arith.cmpf oeq, %70, %71 : vector<32x1xf32>
      %73 = arith.extui %72 : vector<32x1xi1> to vector<32x1xi32>
      %74 = arith.sitofp %73 : vector<32x1xi32> to vector<32x1xf32>
      %75 = arith.addf %70, %74 : vector<32x1xf32>
      %76 = tpu.reciprocal %75 {approx = true} : vector<32x1xf32> -> vector<32x1xf32>
      %c3_44 = arith.constant 3 : index
      %c0_45 = arith.constant 0 : index
      %c0_46 = arith.constant 0 : index
      %77 = vector.load %arg14[%c3_44, %c0_45, %c0_46] : memref<4x32x8xf32, #tpu.memory_space<vmem>>, vector<1x32x8xf32>
      %78 = vector.shape_cast %77 : vector<1x32x8xf32> to vector<32x8xf32>
      %79 = vector.broadcast %76 : vector<32x1xf32> to vector<32x8xf32>
      %80 = arith.mulf %78, %79 : vector<32x8xf32>
      %81 = arith.truncf %80 : vector<32x8xf32> to vector<32x8xbf16>
      %c3_47 = arith.constant 3 : index
      %c0_48 = arith.constant 0 : index
      %c0_49 = arith.constant 0 : index
      %82 = vector.load %arg10[%c3_47, %c0_48, %c0_49] : memref<4x8x32xbf16, #tpu.memory_space<vmem>>, vector<1x8x32xbf16>
      %83 = vector.shape_cast %82 : vector<1x8x32xbf16> to vector<8x32xbf16>
      %cst_50 = arith.constant dense<0.000000e+00> : vector<32x32xf32>
      %84 = tpu.matmul %81, %83, %cst_50 {dimension_numbers = #tpu.dot_dimension_numbers<[1], [0], [0], [1], [0, 0, 1, 1], [], []>} : vector<32x8xbf16>, vector<8x32xbf16>, vector<32x32xf32> -> vector<32x32xf32>
      %85 = arith.addf %68, %84 : vector<32x32xf32>
      %c0_51 = arith.constant 0 : index
      %c0_52 = arith.constant 0 : index
      %86 = vector.load %arg11[%c0_51, %c0_52] : memref<32x32xf32, #tpu.memory_space<vmem>>, vector<32x32xf32>
      tpu.vector_store %arg11[%c0_51, %c0_52], %85 {strides = array<i32>} : memref<32x32xf32, #tpu.memory_space<vmem>>, vector<32x32xf32>,
    } else {
    }
    return
  }
  func.func @transform_0(%arg0: i32, %arg1: i32, %arg2: memref<2x1xi32, #tpu.memory_space<smem>>) -> (i32, i32, i32) {
    %c0_i32 = arith.constant 0 : i32
    %c0_i32_0 = arith.constant 0 : i32
    %c0_i32_1 = arith.constant 0 : i32
    return %c0_i32, %arg0, %c0_i32_0 : i32, i32, i32
  }
  func.func @transform_1(%arg0: i32, %arg1: i32, %arg2: memref<2x1xi32, #tpu.memory_space<smem>>) -> (i32, i32, i32) {
    %c0_i32 = arith.constant 0 : i32
    %c0_i32_0 = arith.constant 0 : i32
    %c0_i32_1 = arith.constant 0 : i32
    return %c0_i32, %arg1, %c0_i32_0 : i32, i32, i32
  }
  func.func @transform_2(%arg0: i32, %arg1: i32, %arg2: memref<2x1xi32, #tpu.memory_space<smem>>) -> (i32, i32, i32) {
    %c0_i32 = arith.constant 0 : i32
    %c0_i32_0 = arith.constant 0 : i32
    %c0_i32_1 = arith.constant 0 : i32
    return %c0_i32, %arg1, %c0_i32_0 : i32, i32, i32
  }
  func.func @transform_3(%arg0: i32, %arg1: i32, %arg2: memref<2x1xi32, #tpu.memory_space<smem>>) -> (i32, i32) {
    %c0_i32 = arith.constant 0 : i32
    return %arg0, %arg1 : i32, i32
  }
  func.func @transform_4(%arg0: i32, %arg1: i32, %arg2: memref<2x1xi32, #tpu.memory_space<smem>>) -> (i32, i32) {
    %c0_i32 = arith.constant 0 : i32
    %c0_i32_0 = arith.constant 0 : i32
    return %arg0, %c0_i32 : i32, i32
  }
  func.func @transform_5(%arg0: i32, %arg1: i32, %arg2: memref<2x1xi32, #tpu.memory_space<smem>>) -> (i32, i32) {
    %c0_i32 = arith.constant 0 : i32
    %c0_i32_0 = arith.constant 0 : i32
    %c0_i32_1 = arith.constant 0 : i32
    return %c0_i32, %c0_i32_0 : i32, i32
  }
  func.func @transform_6(%arg0: i32, %arg1: i32, %arg2: memref<2x1xi32, #tpu.memory_space<smem>>) -> (i32, i32) {
    %c0_i32 = arith.constant 0 : i32
    %c0_i32_0 = arith.constant 0 : i32
    %c0_i32_1 = arith.constant 0 : i32
    return %c0_i32, %c0_i32_0 : i32, i32
  }
  func.func @transform_7(%arg0: i32, %arg1: i32, %arg2: memref<2x1xi32, #tpu.memory_space<smem>>) -> (i32, i32, i32) {
    %c0_i32 = arith.constant 0 : i32
    %c0_i32_0 = arith.constant 0 : i32
    %c0_i32_1 = arith.constant 0 : i32
    %c0_i32_2 = arith.constant 0 : i32
    return %c0_i32, %c0_i32_0, %c0_i32_1 : i32, i32, i32
  }
  func.func @transform_8(%arg0: i32, %arg1: i32, %arg2: memref<2x1xi32, #tpu.memory_space<smem>>) -> (i32, i32) {
    %c0_i32 = arith.constant 0 : i32
    %c0_i32_0 = arith.constant 0 : i32
    return %arg0, %c0_i32 : i32, i32
  }
}

</mosaic_0001>

<bundles_post_ra>
// kernel: tpu_custom_call.1
= control target key start
LH: loop header
LB: loop body
LE: loop exit
PB: predicated region body
PF: predicated region fallthrough
CT: control target
= control target key end

     0   :  { %s2802_s12 = smov [#allocation6]   ;;  %s3593_s0 = inlined_call_operand.vmem [shape: s32[2,1], index: 0, kind: input, shape index: {}]   ;;  %s3594_s1 = inlined_call_operand.vmem [shape: bf16[4,64,8], index: 1, kind: input, shape index: {}]   ;;  %s3595_s2 = inlined_call_operand.vmem [shape: bf16[4,64,8], index: 2, kind: input, shape index: {}]   ;;  %s3596_s3 = inlined_call_operand.vmem [shape: bf16[4,64,8], index: 3, kind: input, shape index: {}]   ;;  %s3597_s4 = inlined_call_operand.vmem [shape: s8[64,64], index: 4, kind: input, shape index: {}]   ;;  %s3598_s5 = inlined_call_operand.vmem [shape: bf16[64,32], index: 5, kind: input, shape index: {}]   ;;  %s3599_s6 = inlined_call_operand.vmem [shape: bf16[32,32], index: 6, kind: input, shape index: {}]   ;;  %s3600_s7 = inlined_call_operand.vmem [shape: f32[1,32], index: 7, kind: input, shape index: {}]   ;;  %s3601_s8 = inlined_call_operand.vmem [shape: bf16[4,8,32], index: 8, kind: input, shape index: {}]   ;;  %s3602_s9 = inlined_call_operand.vmem [shape: f32[64,32], index: 9, kind: output, shape index: {}]  }
   0x1   :  { %s15_s11 = sshll.u32 %s3593_s0, 4  ;;  %s16_s11 = int_to_ptr.vmem [resolvable:$true] %s15_s11 }
   0x2   :  { %18 = dma.vmem_to_smem %s16_s11, 32, %s2802_s12, [#allocation5] }
   0x3   :  { %2780 = dma.done.wait [#allocation5], 32 }
   0x4   :  { %2781 = vsyncadd [#allocation5], 4294967264 }
   0x5   :  { %21 = sfence }
   0x6   :  { %s2861_s13 = smov 0   ;;  %s2863_s14 = smov 0  }
   0x7   :  { %s2865_s15 = smov 0   ;;  %s2867_s16 = smov 0  }
   0x8   :  { %s2869_s17 = smov 0  }
   0x9 LB: > { %s39_s0 = sadd.s32 1, %s2796_s16  ;;  %p53_p1 = scmp.ne.s32.totalorder %s2788_s14, %s2784_s13  ;;  %s2800_s17 = sphi %s2869_s17, %s27_s17   ;;  %s2796_s16 = sphi %s2867_s16, %s3606_s16   ;;  %s2792_s15 = sphi %s2865_s15, %s3605_s15   ;;  %s2788_s14 = sphi %s2863_s14, %s3604_s14   ;;  %s2784_s13 = sphi %s2861_s13, %s3603_s13  }
   0xa   : > { %p41_p0 = scmp.ge.s32.totalorder %s39_s0, 2  ;;  %p54_p2 = scmp.eq.s32.totalorder %s2800_s17, 0 }
   0xb   : > { %s46_s19 = sadd.s32 1, %s2788_s14  ;;  %p2317_p5 = scmp.ge.s32.totalorder %s2800_s17, 2 }
   0xc   : > { %s3608_s0 = smov (%p41_p0, %s39_s0), 0  ;;  %p55_p3 = por %p54_p2, %p53_p1 }
   0xd   : > { %s43_s18 = ssub.s32 %s2796_s16, %s3608_s0  ;;  %301 = sbr.rel (%p2317_p5) target bundleno = 30 (0x1e), region = 36 }
   0xe   : > { %p44_p4 = scmp.eq.s32.totalorder %s43_s18, 0 }
  0x10   : > { %s2896_s20 = scalar_select %p44_p4, %s2788_s14, %s46_s19  }
  0x12   : > { %304 = sbr.rel (!%p55_p3) target bundleno = 30 (0x1e), region = 40  ;;  %s306_s21 = sand.u32 (%p55_p3), 1, %s2788_s14  }
  0x13   : > { %s2553_s22 = sshll.u32 (%p55_p3), %s2796_s16, 4  ;;  %s2318_s23 = sshll.u32 (%p55_p3), %s306_s21, 6 }
  0x14   : > { %s311_s26 = scalar_lea.vmem (%p55_p3), %s3594_s1, %s2553_s22  ;;  %s308_s27 = scalar_lea.vmem (%p55_p3), [#allocation7], %s2318_s23 }
  0x15   : > { %v328_v0 = vld [vmem:[%s311_s26] sm:$0xff] (%p55_p3)   ;;  %v332_v1 = vld [vmem:[%s311_s26 + $0x8] sm:$0xff] (%p55_p3)  }
  0x16   : > { %v336_v2 = vld [vmem:[%s311_s26 + $0x20] sm:$0xff] (%p55_p3)   ;;  %329 = vst [vmem:[%s308_s27] sm:$0xff] (%p55_p3), %v328_v0   ;;  %v340_v3 = vld [vmem:[%s311_s26 + $0x28] sm:$0xff] (%p55_p3)  }
  0x17   : > { %333 = vst [vmem:[%s308_s27 + $0x8] sm:$0xff] %v332_v1   ;;  %v344_v4 = vld [vmem:[%s311_s26 + $0x40] sm:$0xff]   ;;  %v348_v5 = vld [vmem:[%s311_s26 + $0x48] sm:$0xff]  }
  0x18   : > { %337 = vst [vmem:[%s308_s27 + $0x10] sm:$0xff] %v336_v2   ;;  %v352_v6 = vld [vmem:[%s311_s26 + $0x60] sm:$0xff]   ;;  %v356_v7 = vld [vmem:[%s311_s26 + $0x68] sm:$0xff]  }
  0x19   : > { %341 = vst [vmem:[%s308_s27 + $0x18] sm:$0xff] %v340_v3  }
  0x1a   : > { %345 = vst [vmem:[%s308_s27 + $0x20] sm:$0xff] %v344_v4  }
  0x1b   : > { %349 = vst [vmem:[%s308_s27 + $0x28] sm:$0xff] %v348_v5  }
  0x1c   : > { %353 = vst [vmem:[%s308_s27 + $0x30] sm:$0xff] %v352_v6  }
  0x1d   : > { %357 = vst [vmem:[%s308_s27 + $0x38] sm:$0xff] %v356_v7  }
  0x1e PF: > { %p2321_p6 = scmp.ge.s32.totalorder %s2800_s17, 1  ;;  %p433_p7 = scmp.lt.s32.totalorder %s2800_s17, 3 }
  0x20   : > { %p434_p8 = pnand %p2321_p6, %p433_p7 }
  0x21   : > { %s440_s28 = sand.u32 (!%p434_p8), 1, %s2784_s13   ;;  %p508_p9 = scmp.lt.s32.totalorder (!%p434_p8), %s2792_s15, 1 }
  0x22   : > { %437 = sbr.rel (%p434_p8) target bundleno = 1012 (0x3f4), region = 89  ;;  %s2908_s29 = sshll.u32 (!%p434_p8), %s440_s28, 6 }
  0x23   : > { %s2324_s30 = sshll.u32 (!%p434_p8), %s2792_s15, 2  ;;  %s2328_s12 = sshll.u32 (!%p434_p8), %s2792_s15, 7 }
  0x24   : > { %p516_p10 = scmp.lt.s32.totalorder (!%p434_p8), %s2324_s30, 7  ;;  %s2936_s28 = sld [smem:[#allocation6 + %s2328_s12]] (!%p434_p8) }
  0x27   : > { %vm532_vm0 = vcmask 7168   ;;  %v2803_v8 = vmov -1e+09   ;;  %s509_s10 = scalar_select %p508_p9, %s2792_s15, 1  ;;  %v2804_v9 = vmov 0.0   ;;  %vm565_vm1 = vcmask 64512  }
  0x28   : > { %533 = vst.msk [vmem:[#allocation2] sm:$0xff] %vm532_vm0, %v2803_v8  ;;  %s3610_s30 = smov (!%p516_p10, %s2324_s30), 7 }
  0x29   : > { %534 = vst.msk [vmem:[#allocation2 + $0x8] sm:$0xff] %vm532_vm0, %v2803_v8  ;;  %s2323_s11 = sshll.u32 %s509_s10, 3  ;;  %s2325_s21 = sshll.u32 %s3610_s30, 2 }
  0x2a   : > { %535 = vst.msk [vmem:[#allocation2 + $0x10] sm:$0xff] %vm532_vm0, %v2803_v8  ;;  %s2921_s19 = scalar_lea.vmem %s3597_s4, %s2323_s11  ;;  %s2927_s24 = scalar_lea.vmem %s3598_s5, %s2325_s21 }
  0x2b   : > { %536 = vst.msk [vmem:[#allocation2 + $0x18] sm:$0xff] %vm532_vm0, %v2803_v8  ;;  %s2327_s25 = sshll.u32 %s3610_s30, 3  ;;  %s3011_s30 = scalar_lea.vmem [#allocation7], %s2908_s29 }
  0x2c   : > { %537 = vst.msk [vmem:[#allocation2 + $0x20] sm:$0xff] %vm532_vm0, %v2803_v8  ;;  %s2933_s15 = scalar_lea.vmem %s3602_s9, %s2327_s25  ;;  %p2329_p11 = scmp.le.s32.totalorder %s2936_s28, 0 }
  0x2d   : > { %538 = vst.msk [vmem:[#allocation2 + $0x28] sm:$0xff] %vm532_vm0, %v2803_v8 }
  0x2e   : > { %539 = vst.msk [vmem:[#allocation2 + $0x30] sm:$0xff] %vm532_vm0, %v2803_v8 }
  0x2f   : > { %540 = vst.msk [vmem:[#allocation2 + $0x38] sm:$0xff] %vm532_vm0, %v2803_v8 }
  0x30   : > { %541 = vst.msk [vmem:[#allocation2 + $0x40] sm:$0xff] %vm532_vm0, %v2803_v8 }
  0x31   : > { %542 = vst.msk [vmem:[#allocation2 + $0x48] sm:$0xff] %vm532_vm0, %v2803_v8 }
  0x32   : > { %543 = vst.msk [vmem:[#allocation2 + $0x50] sm:$0xff] %vm532_vm0, %v2803_v8 }
  0x33   : > { %544 = vst.msk [vmem:[#allocation2 + $0x58] sm:$0xff] %vm532_vm0, %v2803_v8 }
  0x34   : > { %545 = vst.msk [vmem:[#allocation2 + $0x60] sm:$0xff] %vm532_vm0, %v2803_v8 }
  0x35   : > { %546 = vst.msk [vmem:[#allocation2 + $0x68] sm:$0xff] %vm532_vm0, %v2803_v8 }
  0x36   : > { %547 = vst.msk [vmem:[#allocation2 + $0x70] sm:$0xff] %vm532_vm0, %v2803_v8 }
  0x37   : > { %548 = vst.msk [vmem:[#allocation2 + $0x78] sm:$0xff] %vm532_vm0, %v2803_v8 }
  0x38   : > { %549 = vst.msk [vmem:[#allocation3] sm:$0xff] %vm532_vm0, %v2804_v9 }
  0x39   : > { %550 = vst.msk [vmem:[#allocation3 + $0x8] sm:$0xff] %vm532_vm0, %v2804_v9 }
  0x3a   : > { %551 = vst.msk [vmem:[#allocation3 + $0x10] sm:$0xff] %vm532_vm0, %v2804_v9 }
  0x3b   : > { %552 = vst.msk [vmem:[#allocation3 + $0x18] sm:$0xff] %vm532_vm0, %v2804_v9 }
  0x3c   : > { %553 = vst.msk [vmem:[#allocation3 + $0x20] sm:$0xff] %vm532_vm0, %v2804_v9 }
  0x3d   : > { %554 = vst.msk [vmem:[#allocation3 + $0x28] sm:$0xff] %vm532_vm0, %v2804_v9 }
  0x3e   : > { %555 = vst.msk [vmem:[#allocation3 + $0x30] sm:$0xff] %vm532_vm0, %v2804_v9 }
  0x3f   : > { %556 = vst.msk [vmem:[#allocation3 + $0x38] sm:$0xff] %vm532_vm0, %v2804_v9 }
  0x40   : > { %557 = vst.msk [vmem:[#allocation3 + $0x40] sm:$0xff] %vm532_vm0, %v2804_v9 }
  0x41   : > { %558 = vst.msk [vmem:[#allocation3 + $0x48] sm:$0xff] %vm532_vm0, %v2804_v9 }
  0x42   : > { %559 = vst.msk [vmem:[#allocation3 + $0x50] sm:$0xff] %vm532_vm0, %v2804_v9 }
  0x43   : > { %560 = vst.msk [vmem:[#allocation3 + $0x58] sm:$0xff] %vm532_vm0, %v2804_v9 }
  0x44   : > { %561 = vst.msk [vmem:[#allocation3 + $0x60] sm:$0xff] %vm532_vm0, %v2804_v9 }
  0x45   : > { %562 = vst.msk [vmem:[#allocation3 + $0x68] sm:$0xff] %vm532_vm0, %v2804_v9 }
  0x46   : > { %563 = vst.msk [vmem:[#allocation3 + $0x70] sm:$0xff] %vm532_vm0, %v2804_v9 }
  0x47   : > { %564 = vst.msk [vmem:[#allocation3 + $0x78] sm:$0xff] %vm532_vm0, %v2804_v9 }
  0x48   : > { %566 = vst.msk [vmem:[#allocation4] sm:$0xff] %vm565_vm1, %v2804_v9 }
  0x49   : > { %567 = vst.msk [vmem:[#allocation4 + $0x8] sm:$0xff] %vm565_vm1, %v2804_v9 }
  0x4a   : > { %568 = vst.msk [vmem:[#allocation4 + $0x10] sm:$0xff] %vm565_vm1, %v2804_v9 }
  0x4b   : > { %569 = vst.msk [vmem:[#allocation4 + $0x18] sm:$0xff] %vm565_vm1, %v2804_v9 }
  0x4c   : > { %570 = vst.msk [vmem:[#allocation4 + $0x20] sm:$0xff] %vm565_vm1, %v2804_v9 }
  0x4d   : > { %571 = vst.msk [vmem:[#allocation4 + $0x28] sm:$0xff] %vm565_vm1, %v2804_v9 }
  0x4e   : > { %572 = vst.msk [vmem:[#allocation4 + $0x30] sm:$0xff] %vm565_vm1, %v2804_v9 }
  0x4f   : > { %573 = vst.msk [vmem:[#allocation4 + $0x38] sm:$0xff] %vm565_vm1, %v2804_v9 }
  0x50   : > { %574 = vst.msk [vmem:[#allocation4 + $0x40] sm:$0xff] %vm565_vm1, %v2804_v9 }
  0x51   : > { %575 = vst.msk [vmem:[#allocation4 + $0x48] sm:$0xff] %vm565_vm1, %v2804_v9 }
  0x52   : > { %576 = vst.msk [vmem:[#allocation4 + $0x50] sm:$0xff] %vm565_vm1, %v2804_v9 }
  0x53   : > { %577 = vst.msk [vmem:[#allocation4 + $0x58] sm:$0xff] %vm565_vm1, %v2804_v9  ;;  %593 = sbr.rel (%p2329_p11) target bundleno = 694 (0x2b6), region = 101 }
  0x54   : > { %578 = vst.msk [vmem:[#allocation4 + $0x60] sm:$0xff] %vm565_vm1, %v2804_v9 }
  0x55   : > { %579 = vst.msk [vmem:[#allocation4 + $0x68] sm:$0xff] %vm565_vm1, %v2804_v9 }
  0x56   : > { %580 = vst.msk [vmem:[#allocation4 + $0x70] sm:$0xff] %vm565_vm1, %v2804_v9 }
  0x57   : > { %581 = vst.msk [vmem:[#allocation4 + $0x78] sm:$0xff] %vm565_vm1, %v2804_v9 }
  0x58   : > { %v2565_v10 = vld [vmem:[%s3595_s2 + $0x18] sm:$0xff]  ;;  %v2564_v18 = vld [vmem:[%s3595_s2 + $0x10] sm:$0xff]  ;;  %v2563_v26 = vld [vmem:[%s3595_s2 + $0x8] sm:$0xff]  ;;  %v2805_v53 = vmov -1e+09   ;;  %vm944_vm3 = vcmask 523264  }
  0x59   : > { %v2569_v11 = vld [vmem:[%s3595_s2 + $0x38] sm:$0xff]  ;;  %v706_v14 = vsel %vm565_vm1, %v2565_v10, 0  ;;  %v2568_v19 = vld [vmem:[%s3595_s2 + $0x30] sm:$0xff]  ;;  %v703_v22 = vsel %vm565_vm1, %v2564_v18, 0  ;;  %v2567_v27 = vld [vmem:[%s3595_s2 + $0x28] sm:$0xff]  ;;  %v700_v30 = vsel %vm565_vm1, %v2563_v26, 0 }
  0x5a   : > { %v2577_v12 = vld [vmem:[%s3595_s2 + $0x78] sm:$0xff]  ;;  %v773_v15 = vsel %vm565_vm1, %v2569_v11, 0  ;;  %712 = vmatpush.bf16.xpose.msra.mxu0 %v706_v14  ;;  %v2576_v20 = vld [vmem:[%s3595_s2 + $0x70] sm:$0xff]  ;;  %v770_v23 = vsel %vm565_vm1, %v2568_v19, 0  ;;  %v2575_v28 = vld [vmem:[%s3595_s2 + $0x68] sm:$0xff]  ;;  %v767_v31 = vsel %vm565_vm1, %v2567_v27, 0 }
  0x5b   : > { %v2573_v13 = vld [vmem:[%s3595_s2 + $0x58] sm:$0xff]  ;;  %v907_v16 = vsel %vm565_vm1, %v2577_v12, 0  ;;  %779 = vmatpush.bf16.xpose.msra.mxu1 %v773_v15  ;;  %v2572_v21 = vld [vmem:[%s3595_s2 + $0x50] sm:$0xff]  ;;  %v904_v24 = vsel %vm565_vm1, %v2576_v20, 0  ;;  %v2571_v29 = vld [vmem:[%s3595_s2 + $0x48] sm:$0xff]  ;;  %v901_v32 = vsel %vm565_vm1, %v2575_v28, 0 }
  0x5c   : > { %v840_v17 = vsel %vm565_vm1, %v2573_v13, 0  ;;  %913 = vmatpush.bf16.xpose.msra.mxu3 %v907_v16  ;;  %v837_v25 = vsel %vm565_vm1, %v2572_v21, 0  ;;  %v834_v33 = vsel %vm565_vm1, %v2571_v29, 0  ;;  %v2562_v34 = vld [vmem:[%s3595_s2] sm:$0xff]  ;;  %v2556_v43 = vld [vmem:[%s3011_s30 + $0x10] sm:$0xff]  ;;  %v2555_v46 = vld [vmem:[%s3011_s30 + $0x8] sm:$0xff] }
  0x5d   : > { %846 = vmatpush.bf16.xpose.msra.mxu2 %v840_v17  ;;  %v2566_v35 = vld [vmem:[%s3595_s2 + $0x20] sm:$0xff]  ;;  %v697_v38 = vsel %vm565_vm1, %v2562_v34, 0  ;;  %v2560_v44 = vld [vmem:[%s3011_s30 + $0x30] sm:$0xff]  ;;  %v2557_v47 = vld [vmem:[%s3011_s30 + $0x18] sm:$0xff] }
  0x5e   : > { %v2574_v36 = vld [vmem:[%s3595_s2 + $0x60] sm:$0xff]  ;;  %v764_v39 = vsel %vm565_vm1, %v2566_v35, 0  ;;  %v2559_v48 = vld [vmem:[%s3011_s30 + $0x28] sm:$0xff]  ;;  %v2561_v49 = vld [vmem:[%s3011_s30 + $0x38] sm:$0xff] }
  0x5f   : > { %v2570_v37 = vld [vmem:[%s3595_s2 + $0x40] sm:$0xff]  ;;  %v898_v40 = vsel %vm565_vm1, %v2574_v36, 0 }
  0x60   : > { %v831_v41 = vsel %vm565_vm1, %v2570_v37, 0  ;;  %v2554_v42 = vld [vmem:[%s3011_s30] sm:$0xff] }
  0x61   : > { %v2558_v45 = vld [vmem:[%s3011_s30 + $0x20] sm:$0xff] }
  0x62   : > { %713 = vmatpush.bf16.xpose.msra.mxu0 %v703_v22  ;;  %v594_v50 = vld [vmem:[%s2921_s19] sm:$0xff] }
  0x63   : > { %780 = vmatpush.bf16.xpose.msra.mxu1 %v770_v23  ;;  %v595_v51 = vunpack.c.0.s8 %v594_v50  ;;  %v596_v59 = vunpack.c.1.s8 %v594_v50  ;;  %v597_v63 = vunpack.c.2.s8 %v594_v50  ;;  %v598_v22 = vunpack.c.3.s8 %v594_v50  ;;  %v3171_v50 = vld [vmem:[#allocation2 + $0x20] sm:$0xff] }
  0x64   : > { %914 = vmatpush.bf16.xpose.msra.mxu3 %v904_v24 }
  0x65   : > { %847 = vmatpush.bf16.xpose.msra.mxu2 %v837_v25  ;;  %v3095_v52 = vcvt.s32.f32 %v595_v51  ;;  %v3106_v62 = vcvt.s32.f32 %v596_v59  ;;  %v3117_v8 = vcvt.s32.f32 %v597_v63  ;;  %v3138_v27 = vcvt.s32.f32 %v598_v22  ;;  %v3173_v51 = vld [vmem:[#allocation2] sm:$0xff]  ;;  %v3227_v22 = vld [vmem:[#allocation2 + $0x70] sm:$0xff] }
  0x66   : > { %v3186_v59 = vld [vmem:[#allocation2 + $0x40] sm:$0xff] }
  0x67   : > { %vm603_vm2 = vcmp.gt.f32.partialorder %v3095_v52, 0.0  ;;  %vm604_vm4 = vcmp.gt.f32.partialorder %v3106_v62, 0.0  ;;  %vm605_vm5 = vcmp.gt.f32.partialorder %v3117_v8, 0.0  ;;  %vm606_vm6 = vcmp.gt.f32.partialorder %v3138_v27, 0.0 }
  0x68   : > { %v607_v54 = vsel %vm603_vm2, 0.0, %v2805_v53  ;;  %v608_v10 = vsel %vm604_vm4, 0.0, %v2805_v53  ;;  %v609_v17 = vsel %vm605_vm5, 0.0, %v2805_v53  ;;  %v610_v34 = vsel %vm606_vm6, 0.0, %v2805_v53 }
  0x6a   : > { %714 = vmatpush.bf16.xpose.msra.mxu0 %v700_v30 }
  0x6b   : > { %781 = vmatpush.bf16.xpose.msra.mxu1 %v767_v31 }
  0x6c   : > { %915 = vmatpush.bf16.xpose.msra.mxu3 %v901_v32 }
  0x6d   : > { %848 = vmatpush.bf16.xpose.msra.mxu2 %v834_v33 }
  0x72   : > { %715 = vmatpush.bf16.xpose.msra.mxu0 %v697_v38 }
  0x73   : > { %782 = vmatpush.bf16.xpose.msra.mxu1 %v764_v39 }
  0x74   : > { %916 = vmatpush.bf16.xpose.msra.mxu3 %v898_v40 }
  0x75   : > { %849 = vmatpush.bf16.xpose.msra.mxu2 %v831_v41 }
  0x79   : > { %2354 = vmatmul.msk.bf16.vlgmr.msra.gmra.mxu0 %vm565_vm1, %v2554_v42 }
  0x7a   : > { %2380 = vmatmul.msk.bf16.vlgmr.msra.gmra.mxu1 %vm565_vm1, %v2556_v43 }
  0x7b   : > { %2432 = vmatmul.msk.bf16.vlgmr.msra.gmra.mxu3 %vm565_vm1, %v2560_v44 }
  0x7c   : > { %2406 = vmatmul.msk.bf16.vlgmr.msra.gmra.mxu2 %vm565_vm1, %v2558_v45 }
  0x89   : > { %2355 = vmatmul.msk.bf16.gmra.mxu0 %vm565_vm1, %v2555_v46 }
  0x8a   : > { %2381 = vmatmul.msk.bf16.gmra.mxu1 %vm565_vm1, %v2557_v47 }
  0x8b   : > { %2433 = vmatmul.msk.bf16.gmra.mxu3 %vm565_vm1, %v2561_v49  ;;  %v2806_v49 = vmov 0  }
  0x8c   : > { %2407 = vmatmul.msk.bf16.gmra.mxu2 %vm565_vm1, %v2559_v48  ;;  %2645 = vset.pattern.permute.xlu1 %v2806_v49 }
  0x8d   : > { %2646 = vset.pattern.permute.xlu2 %v2806_v49  ;;  %2647 = vset.pattern.permute.xlu0 %v2806_v49  ;;  %v931_v49 = vld [vmem:[#allocation2 + $0x18] sm:$0xff] }
  0xf6   : > { %v717_v55 = vpop.f32.mrf.mxu0 }
  0xf7   : > { %v784_v56 = vpop.f32.mrf.mxu1  ;;  %v3098_v57 = vadd.f32 %v717_v55, %v607_v54 }
  0xf8   : > { %v3100_v58 = vadd.f32 %v784_v56, %v607_v54 }
  0xf9   : > { %v945_v61 = vsel %vm944_vm3, %v3098_v57, -inf }
  0xfa   : > { %v957_v60 = vsel %vm944_vm3, %v3100_v58, -inf  ;;  %946 = vmax.xlane.f32.xlu0 %v945_v61 }
  0xfb   : > { %958 = vmax.xlane.f32.xlu2 %v957_v60  ;;  %v3188_v60 = vld [vmem:[#allocation2 + $0x60] sm:$0xff] }
  0xfe   : > { %v918_v0 = vpop.f32.mrf.mxu3  ;;  %v719_v4 = vpop.f32.mrf.mxu0 }
  0xff   : > { %v851_v1 = vpop.f32.mrf.mxu2  ;;  %v3108_v2 = vadd.f32 %v918_v0, %v607_v54  ;;  %v786_v7 = vpop.f32.mrf.mxu1  ;;  %v3122_v12 = vadd.f32 %v719_v4, %v608_v10  ;;  %v3202_v4 = vld [vmem:[#allocation2 + $0x68] sm:$0xff] }
 0x100   : > { %v3110_v3 = vadd.f32 %v851_v1, %v607_v54  ;;  %v3119_v11 = vadd.f32 %v786_v7, %v608_v10 }
 0x101   : > { %v981_v6 = vsel %vm944_vm3, %v3108_v2, -inf  ;;  %v948_v20 = vsel %vm944_vm3, %v3122_v12, -inf }
 0x102   : > { %v969_v5 = vsel %vm944_vm3, %v3110_v3, -inf  ;;  %982 = vmax.xlane.f32.xlu0 %v981_v6  ;;  %v960_v16 = vsel %vm944_vm3, %v3119_v11, -inf  ;;  %v3206_v6 = vld [vmem:[#allocation2 + $0x8] sm:$0xff] }
 0x103   : > { %970 = vmax.xlane.f32.xlu2 %v969_v5  ;;  %v3204_v5 = vld [vmem:[#allocation2 + $0x28] sm:$0xff] }
 0x106   : > { %v920_v13 = vpop.f32.mrf.mxu3  ;;  %v722_v18 = vpop.f32.mrf.mxu0 }
 0x107   : > { %v853_v14 = vpop.f32.mrf.mxu2  ;;  %v3124_v15 = vadd.f32 %v920_v13, %v608_v10  ;;  %v3132_v21 = vadd.f32 %v722_v18, %v609_v17  ;;  %v789_v29 = vpop.f32.mrf.mxu1 }
 0x108   : > { %v3134_v23 = vadd.f32 %v853_v14, %v608_v10  ;;  %v3149_v33 = vadd.f32 %v789_v29, %v609_v17 }
 0x109   : > { %v984_v19 = vsel %vm944_vm3, %v3124_v15, -inf  ;;  %v951_v26 = vsel %vm944_vm3, %v3132_v21, -inf }
 0x10a   : > { %985 = vmax.xlane.f32.xlu1 %v984_v19  ;;  %949 = vmax.xlane.f32.xlu0 %v948_v20  ;;  %v972_v31 = vsel %vm944_vm3, %v3134_v23, -inf  ;;  %v963_v38 = vsel %vm944_vm3, %v3149_v33, -inf  ;;  %v930_v19 = vld [vmem:[#allocation2 + $0x10] sm:$0xff]  ;;  %v937_v20 = vld [vmem:[#allocation2 + $0x48] sm:$0xff] }
 0x10b   : > { %961 = vmax.xlane.f32.xlu2 %v960_v16 }
 0x10e   : > { %v923_v25 = vpop.f32.mrf.mxu3  ;;  %v724_v41 = vpop.f32.mrf.mxu0 }
 0x10f   : > { %v856_v24 = vpop.f32.mrf.mxu2  ;;  %v3140_v28 = vadd.f32 %v923_v25, %v609_v17  ;;  %v3161_v43 = vadd.f32 %v724_v41, %v610_v34  ;;  %v791_v46 = vpop.f32.mrf.mxu1 }
 0x110   : > { %v3146_v32 = vadd.f32 %v856_v24, %v609_v17  ;;  %v3167_v47 = vadd.f32 %v791_v46, %v610_v34 }
 0x111   : > { %v987_v30 = vsel %vm944_vm3, %v3140_v28, -inf  ;;  %v954_v45 = vsel %vm944_vm3, %v3161_v43, -inf }
 0x112   : > { %952 = vmax.xlane.f32.xlu1 %v951_v26  ;;  %973 = vmax.xlane.f32.xlu0 %v972_v31  ;;  %v975_v36 = vsel %vm944_vm3, %v3146_v32, -inf  ;;  %v966_v48 = vsel %vm944_vm3, %v3167_v47, -inf }
 0x113   : > { %988 = vmax.xlane.f32.xlu2 %v987_v30 }
 0x116   : > { %v925_v39 = vpop.f32.mrf.mxu3 }
 0x117   : > { %v858_v35 = vpop.f32.mrf.mxu2  ;;  %v3159_v42 = vadd.f32 %v925_v39, %v610_v34 }
 0x118   : > { %v3153_v37 = vadd.f32 %v858_v35, %v610_v34  ;;  %v3240_v35 = vld [vmem:[#allocation2 + $0x50] sm:$0xff] }
 0x119   : > { %v990_v44 = vsel %vm944_vm3, %v3159_v42, -inf }
 0x11a   : > { %v978_v40 = vsel %vm944_vm3, %v3153_v37, -inf  ;;  %976 = vmax.xlane.f32.xlu1 %v975_v36  ;;  %964 = vmax.xlane.f32.xlu0 %v963_v38  ;;  %v934_v36 = vld [vmem:[#allocation2 + $0x30] sm:$0xff]  ;;  %v3242_v38 = vld [vmem:[#allocation2 + $0x58] sm:$0xff] }
 0x11b   : > { %979 = vmax.xlane.f32.xlu2 %v978_v40 }
 0x122   : > { %955 = vmax.xlane.f32.xlu1 %v954_v45  ;;  %991 = vmax.xlane.f32.xlu0 %v990_v44 }
 0x12a   : > { %967 = vmax.xlane.f32.xlu1 %v966_v48 }
 0x16d   : > { %v947_v54 = vpop.xlane.xlu0 %946 }
 0x16e   : > { %v959_v53 = vpop.xlane.xlu2 %958  ;;  %v3179_v56 = vmax.f32 %v3173_v51, %v947_v54 }
 0x16f   : > { %v3176_v55 = vmax.f32 %v3171_v50, %v959_v53  ;;  %v3254_v53 = vld [vmem:[#allocation2 + $0x78] sm:$0xff] }
 0x170   : > { %1059 = vperm.xlu1 %2645, %v3179_v56   ;;  %1742 = vst.msk [vmem:[#allocation2] sm:$0xff] %vm532_vm0, %v3179_v56  ;;  %v1009_v48 = vsub.f32 %v3173_v51, %v3179_v56 }
 0x171   : > { %1746 = vst.msk [vmem:[#allocation2 + $0x20] sm:$0xff] %vm532_vm0, %v3176_v55 }
 0x175   : > { %v983_v63 = vpop.xlane.xlu0 %982 }
 0x176   : > { %v971_v61 = vpop.xlane.xlu2 %970  ;;  %v3194_v1 = vmax.f32 %v3188_v60, %v983_v63 }
 0x177   : > { %v3191_v0 = vmax.f32 %v3186_v59, %v971_v61  ;;  %v1025_v61 = vmul.f32 1.442695, %v1009_v48 }
 0x178   : > { %1079 = vperm.xlu1 %2645, %v3176_v55   ;;  %1119 = vperm.xlu2 %2646, %v3194_v1   ;;  %1754 = vst.msk [vmem:[#allocation2 + $0x60] sm:$0xff] %vm532_vm0, %v3194_v1 }
 0x179   : > { %1750 = vst.msk [vmem:[#allocation2 + $0x40] sm:$0xff] %vm532_vm0, %v3191_v0  ;;  %2648 = vpow2.f32 %v1025_v61 }
 0x17d   : > { %v986_v7 = vpop.xlane.xlu1 %985  ;;  %v950_v14 = vpop.xlane.xlu0 %949 }
 0x17e   : > { %v3209_v10 = vmax.f32 %v3202_v4, %v986_v7  ;;  %v962_v13 = vpop.xlane.xlu2 %961  ;;  %v3215_v17 = vmax.f32 %v3206_v6, %v950_v14 }
 0x17f   : > { %v3212_v16 = vmax.f32 %v3204_v5, %v962_v13 }
 0x180   : > { %v1022_v18 = vsub.f32 %v3202_v4, %v3209_v10  ;;  %1755 = vst.msk [vmem:[#allocation2 + $0x68] sm:$0xff] %vm532_vm0, %v3209_v10  ;;  %1099 = vperm.xlu1 %2645, %v3191_v0   ;;  %1064 = vperm.xlu2 %2646, %v3215_v17   ;;  %v1010_v48 = vsub.f32 %v3206_v6, %v3215_v17 }
 0x181   : > { %1747 = vst.msk [vmem:[#allocation2 + $0x28] sm:$0xff] %vm532_vm0, %v3212_v16  ;;  %v1014_v6 = vsub.f32 %v3204_v5, %v3212_v16 }
 0x182   : > { %1743 = vst.msk [vmem:[#allocation2 + $0x8] sm:$0xff] %vm532_vm0, %v3215_v17  ;;  %v1021_v17 = vsub.f32 %v3188_v60, %v3194_v1  ;;  %v1017_v60 = vsub.f32 %v3186_v59, %v3191_v0 }
 0x185   : > { %v953_v24 = vpop.xlane.xlu1 %952  ;;  %v974_v26 = vpop.xlane.xlu0 %973 }
 0x186   : > { %v995_v25 = vmax.f32 %v930_v19, %v953_v24  ;;  %v989_v29 = vpop.xlane.xlu2 %988  ;;  %v1002_v30 = vmax.f32 %v937_v20, %v974_v26  ;;  %v935_v24 = vld [vmem:[#allocation2 + $0x38] sm:$0xff] }
 0x187   : > { %v3230_v31 = vmax.f32 %v3227_v22, %v989_v29 }
 0x188   : > { %1744 = vst.msk [vmem:[#allocation2 + $0x10] sm:$0xff] %vm532_vm0, %v995_v25  ;;  %1124 = vperm.xlu1 %2645, %v3209_v10   ;;  %1084 = vperm.xlu2 %2646, %v3212_v16   ;;  %v1011_v14 = vsub.f32 %v930_v19, %v995_v25  ;;  %v1013_v19 = vsub.f32 %v3171_v50, %v3176_v55  ;;  %v1035_v55 = vmul.f32 1.442695, %v1014_v6 }
 0x189   : > { %1751 = vst.msk [vmem:[#allocation2 + $0x48] sm:$0xff] %vm532_vm0, %v1002_v30  ;;  %v1023_v34 = vsub.f32 %v3227_v22, %v3230_v31  ;;  %1104 = vperm.xlu0 %2647, %v1002_v30  }
 0x18a   : > { %1756 = vst.msk [vmem:[#allocation2 + $0x70] sm:$0xff] %vm532_vm0, %v3230_v31 }
 0x18d   : > { %v977_v39 = vpop.xlane.xlu1 %976  ;;  %v965_v41 = vpop.xlane.xlu0 %964 }
 0x18e   : > { %v1003_v40 = vmax.f32 %v3240_v35, %v977_v39  ;;  %v980_v44 = vpop.xlane.xlu2 %979  ;;  %v999_v45 = vmax.f32 %v934_v36, %v965_v41  ;;  %v1029_v41 = vmul.f32 1.442695, %v1011_v14 }
 0x18f   : > { %v3246_v46 = vmax.f32 %v3242_v38, %v980_v44  ;;  %v3265_v44 = vpop.eup %2648 }
 0x190   : > { %1752 = vst.msk [vmem:[#allocation2 + $0x50] sm:$0xff] %vm532_vm0, %v1003_v40  ;;  %1089 = vperm.xlu1 %2645, %v999_v45   ;;  %v1015_v56 = vsub.f32 %v934_v36, %v999_v45  ;;  %v1019_v50 = vsub.f32 %v3240_v35, %v1003_v40  ;;  %v1041_v35 = vmul.f32 1.442695, %v1017_v60 }
 0x191   : > { %1748 = vst.msk [vmem:[#allocation2 + $0x30] sm:$0xff] %vm532_vm0, %v999_v45  ;;  %1069 = vperm.xlu0 %2647, %v995_v25   ;;  %v1027_v25 = vmul.f32 1.442695, %v1010_v48  ;;  %v1033_v45 = vmul.f32 1.442695, %v1013_v19  ;;  %v1020_v59 = vsub.f32 %v3242_v38, %v3246_v46  ;;  %v2585_v19 = vld [vmem:[%s3596_s3 + $0x38] sm:$0xff] }
 0x192   : > { %1753 = vst.msk [vmem:[#allocation2 + $0x58] sm:$0xff] %vm532_vm0, %v3246_v46  ;;  %v1037_v29 = vmul.f32 1.442695, %v1015_v56  ;;  %v1045_v56 = vmul.f32 1.442695, %v1019_v50  ;;  %1577 = vmatpush.bf16.msrb.mxu1 %v2585_v19  ;;  %v2589_v50 = vld [vmem:[%s3596_s3 + $0x58] sm:$0xff] }
 0x193   : > { %v1047_v0 = vmul.f32 1.442695, %v1020_v59  ;;  %1636 = vmatpush.bf16.msrb.mxu2 %v2589_v50  ;;  %v2587_v19 = vld [vmem:[%s3596_s3 + $0x48] sm:$0xff] }
 0x194   : > { %2650 = vpow2.f32 %v1037_v29 }
 0x195   : > { %v956_v54 = vpop.xlane.xlu1 %955  ;;  %v992_v7 = vpop.xlane.xlu0 %991  ;;  %2652 = vpow2.f32 %v1029_v41 }
 0x196   : > { %v996_v63 = vmax.f32 %v931_v49, %v956_v54  ;;  %v3257_v13 = vmax.f32 %v3254_v53, %v992_v7  ;;  %v1018_v54 = vsub.f32 %v937_v20, %v1002_v30  ;;  %2654 = vpow2.f32 %v1027_v25 }
 0x197   : > { %v1049_v20 = vmul.f32 1.442695, %v1021_v17  ;;  %v2583_v17 = vld [vmem:[%s3596_s3 + $0x28] sm:$0xff] }
 0x198   : > { %1745 = vst.msk [vmem:[#allocation2 + $0x18] sm:$0xff] %vm532_vm0, %v996_v63  ;;  %1074 = vperm.xlu2 %2646, %v996_v63   ;;  %v1024_v51 = vsub.f32 %v3254_v53, %v3257_v13  ;;  %1129 = vperm.xlu1 %2645, %v3230_v31   ;;  %v1043_v36 = vmul.f32 1.442695, %v1018_v54  ;;  %v1012_v1 = vsub.f32 %v931_v49, %v996_v63  ;;  %v2579_v54 = vld [vmem:[%s3596_s3 + $0x8] sm:$0xff] }
 0x199   : > { %1757 = vst.msk [vmem:[#allocation2 + $0x78] sm:$0xff] %vm532_vm0, %v3257_v13  ;;  %1109 = vperm.xlu0 %2647, %v1003_v40  }
 0x19a   : > { %v3274_v61 = vpop.eup %2650  ;;  %2656 = vpow2.f32 %v1043_v36  ;;  %v1031_v40 = vmul.f32 1.442695, %v1012_v1  ;;  %v2578_v36 = vld [vmem:[%s3596_s3] sm:$0xff] }
 0x19b   : > { %v3277_v7 = vpop.eup %2652  ;;  %2658 = vpow2.f32 %v1033_v45  ;;  %v2584_v45 = vld [vmem:[%s3596_s3 + $0x30] sm:$0xff] }
 0x19c   : > { %v3286_v30 = vpop.eup %2654  ;;  %2660 = vpow2.f32 %v1035_v55  ;;  %1578 = vmatpush.bf16.msrb.mxu1 %v2584_v45  ;;  %v2593_v55 = vld [vmem:[%s3596_s3 + $0x78] sm:$0xff] }
 0x19d   : > { %v968_v26 = vpop.xlane.xlu1 %967  ;;  %2662 = vpow2.f32 %v1049_v20  ;;  %1695 = vmatpush.bf16.msrb.mxu3 %v2593_v55 }
 0x19e   : > { %v1000_v39 = vmax.f32 %v935_v24, %v968_v26  ;;  %2664 = vpow2.f32 %v1045_v56 }
 0x19f   : > { %2666 = vpow2.f32 %v1041_v35  ;;  %v2592_v35 = vld [vmem:[%s3596_s3 + $0x70] sm:$0xff] }
 0x1a0   : > { %1749 = vst.msk [vmem:[#allocation2 + $0x38] sm:$0xff] %vm532_vm0, %v1000_v39  ;;  %1094 = vperm.xlu2 %2646, %v1000_v39   ;;  %1332 = vperm.xlu1 %2645, %v3265_v44   ;;  %v3288_v14 = vpop.eup %2656  ;;  %v1016_v16 = vsub.f32 %v935_v24, %v1000_v39  ;;  %2668 = vpow2.f32 %v1031_v40  ;;  %v2580_v39 = vld [vmem:[%s3596_s3 + $0x10] sm:$0xff] }
 0x1a1   : > { %1134 = vperm.xlu0 %2647, %v3257_v13   ;;  %v3291_v5 = vpop.eup %2658  ;;  %1579 = vmatpush.bf16.msrb.mxu1 %v2583_v17  ;;  %v2590_v17 = vld [vmem:[%s3596_s3 + $0x60] sm:$0xff] }
 0x1a2   : > { %v3297_v26 = vpop.eup %2660  ;;  %v1039_v29 = vmul.f32 1.442695, %v1016_v16  ;;  %v2588_v16 = vld [vmem:[%s3596_s3 + $0x50] sm:$0xff]  ;;  %1696 = vmatpush.bf16.msrb.mxu3 %v2592_v35 }
 0x1a3   : > { %v3299_v41 = vpop.eup %2662  ;;  %1637 = vmatpush.bf16.msrb.mxu2 %v2588_v16 }
 0x1a4   : > { %v3302_v48 = vpop.eup %2664  ;;  %2670 = vpow2.f32 %v1039_v29 }
 0x1a5   : > { %v3308_v49 = vpop.eup %2666  ;;  %2672 = vpow2.f32 %v1047_v0 }
 0x1a6   : > { %v3310_v63 = vpop.eup %2668 }
 0x1a7   : > { %1638 = vmatpush.bf16.msrb.mxu2 %v2587_v19 }
 0x1a8   : > { %1114 = vperm.xlu2 %2646, %v3246_v46   ;;  %1362 = vperm.xlu1 %2645, %v3274_v61   ;;  %v2581_v46 = vld [vmem:[%s3596_s3 + $0x18] sm:$0xff] }
 0x1a9   : > { %1342 = vperm.xlu0 %2647, %v3277_v7   ;;  %1518 = vmatpush.bf16.msrb.mxu0 %v2581_v46 }
 0x1aa   : > { %v3313_v24 = vpop.eup %2670 }
 0x1ab   : > { %v3317_v38 = vpop.eup %2672 }
 0x1ad   : > { %1519 = vmatpush.bf16.msrb.mxu0 %v2580_v39 }
 0x1b0   : > { %1337 = vperm.xlu2 %2646, %v3286_v30   ;;  %1377 = vperm.xlu1 %2645, %v3288_v14  }
 0x1b1   : > { %1352 = vperm.xlu0 %2647, %v3291_v5   ;;  %1520 = vmatpush.bf16.msrb.mxu0 %v2579_v54 }
 0x1b5   : > { %1521 = vmatpush.bf16.msrb.mxu0 %v2578_v36 }
 0x1b8   : > { %1357 = vperm.xlu2 %2646, %v3297_v26   ;;  %1392 = vperm.xlu1 %2645, %v3299_v41  }
 0x1b9   : > { %1382 = vperm.xlu0 %2647, %v3302_v48  }
 0x1c0   : > { %1372 = vperm.xlu2 %2646, %v3308_v49   ;;  %1347 = vperm.xlu1 %2645, %v3310_v63  }
 0x1c1   : > { %1367 = vperm.xlu0 %2647, %v3313_v24  }
 0x1c8   : > { %1387 = vperm.xlu2 %2646, %v3317_v38  }
 0x1d2   : > { %v1120_v25 = vpop.permute.xlu2 %1119 }
 0x1d3   : > { %v1149_v6 = vsub.f32 %v3108_v2, %v1120_v25  ;;  %v2582_v2 = vld [vmem:[%s3596_s3 + $0x20] sm:$0xff]  ;;  %v2591_v25 = vld [vmem:[%s3596_s3 + $0x68] sm:$0xff] }
 0x1d4   : > { %1580 = vmatpush.bf16.msrb.mxu1 %v2582_v2  ;;  %1697 = vmatpush.bf16.msrb.mxu3 %v2591_v25 }
 0x1d5   : > { %v1177_v20 = vmul.f32 1.442695, %v1149_v6  ;;  %v2586_v6 = vld [vmem:[%s3596_s3 + $0x40] sm:$0xff] }
 0x1d6   : > { %1639 = vmatpush.bf16.msrb.mxu2 %v2586_v6 }
 0x1d7   : > { %2674 = vpow2.f32 %v1177_v20 }
 0x1d8   : > { %1698 = vmatpush.bf16.msrb.mxu3 %v2590_v17 }
 0x1da   : > { %v1065_v56 = vpop.permute.xlu2 %1064 }
 0x1db   : > { %v1138_v60 = vsub.f32 %v3122_v12, %v1065_v56 }
 0x1dd   : > { %v1155_v1 = vmul.f32 1.442695, %v1138_v60  ;;  %v2675_v59 = vpop.eup %2674 }
 0x1de   : > { %v3361_v54 = vmul.f32 %v2675_v59, %v3095_v52 }
 0x1df   : > { %2676 = vpow2.f32 %v1155_v1 }
 0x1e0   : > { %v1269_v45 = vsel %vm944_vm3, %v3361_v54, 0.0 }
 0x1e2   : > { %v1060_v40 = vpop.permute.xlu1 %1059  ;;  %v1085_v29 = vpop.permute.xlu2 %1084 }
 0x1e3   : > { %v1137_v0 = vsub.f32 %v3098_v57, %v1060_v40  ;;  %v1142_v12 = vsub.f32 %v3119_v11, %v1085_v29 }
 0x1e5   : > { %v1153_v46 = vmul.f32 1.442695, %v1137_v0  ;;  %v1163_v39 = vmul.f32 1.442695, %v1142_v12  ;;  %v2677_v36 = vpop.eup %2676 }
 0x1e6   : > { %v1186_v57 = vmul.f32 %v2677_v36, %v3106_v62 }
 0x1e7   : > { %2678 = vpow2.f32 %v1153_v46 }
 0x1e8   : > { %2680 = vpow2.f32 %v1163_v39  ;;  %v1427_v2 = vpack.c.bf16 %v1186_v57, %v1186_v57 }
 0x1ea   : > { %v1080_v11 = vpop.permute.xlu1 %1079  ;;  %v1479_v59 = vunpack.c.l.b16 %v1427_v2 }
 0x1eb   : > { %v1141_v50 = vsub.f32 %v3100_v58, %v1080_v11  ;;  %1270 = vadd.xlane.f32.xlu0 %v1269_v45 }
 0x1ed   : > { %v2679_v55 = vpop.eup %2678  ;;  %v1161_v20 = vmul.f32 1.442695, %v1141_v50 }
 0x1ee   : > { %v1185_v56 = vmul.f32 %v2679_v55, %v3095_v52  ;;  %v2681_v60 = vpop.eup %2680 }
 0x1ef   : > { %2682 = vpow2.f32 %v1161_v20  ;;  %v1190_v40 = vmul.f32 %v2681_v60, %v3106_v62 }
 0x1f0   : > { %v1233_v1 = vsel %vm944_vm3, %v1185_v56, 0.0  ;;  %v1426_v16 = vpack.c.bf16 %v1185_v56, %v1185_v56 }
 0x1f1   : > { %1234 = vadd.xlane.f32.xlu2 %v1233_v1  ;;  %v1431_v25 = vpack.c.bf16 %v1190_v40, %v1190_v40 }
 0x1f2   : > { %v1075_v35 = vpop.permute.xlu2 %1074  ;;  %v1478_v29 = vunpack.c.l.b16 %v1426_v16  ;;  %v1100_v58 = vpop.permute.xlu1 %1099 }
 0x1f3   : > { %v1145_v0 = vsub.f32 %v3110_v3, %v1100_v58  ;;  %v1140_v6 = vsub.f32 %v3161_v43, %v1075_v35  ;;  %v1538_v3 = vunpack.c.l.b16 %v1431_v25  ;;  %v1236_v35 = vsel %vm944_vm3, %v1186_v57, 0.0 }
 0x1f4   : > { %v1482_v12 = vpack.c.b16 %v1479_v59, %v1478_v29 }
 0x1f5   : > { %v2683_v46 = vpop.eup %2682  ;;  %v1169_v39 = vmul.f32 1.442695, %v1145_v0  ;;  %v1159_v59 = vmul.f32 1.442695, %v1140_v6 }
 0x1f6   : > { %2450 = vmatmul.msk.bf16.vlgmr.msrb.gmra.mxu0 %vm944_vm3, %v1482_v12  ;;  %v1189_v19 = vmul.f32 %v2683_v46, %v3095_v52 }
 0x1f7   : > { %2684 = vpow2.f32 %v1169_v39 }
 0x1f8   : > { %v1245_v36 = vsel %vm944_vm3, %v1189_v19, 0.0  ;;  %v1430_v11 = vpack.c.bf16 %v1189_v19, %v1189_v19 }
 0x1f9   : > { %1246 = vadd.xlane.f32.xlu1 %v1245_v36  ;;  %v1438_v36 = vpack.c.bf16 %v3361_v54, %v3361_v54 }
 0x1fa   : > { %v1095_v45 = vpop.permute.xlu2 %1094  ;;  %v1537_v50 = vunpack.c.l.b16 %v1430_v11  ;;  %v1125_v55 = vpop.permute.xlu1 %1124 }
 0x1fb   : > { %v1144_v17 = vsub.f32 %v3167_v47, %v1095_v45  ;;  %v1150_v20 = vsub.f32 %v3124_v15, %v1125_v55  ;;  %v1105_v56 = vpop.permute.xlu0 %1104 }
 0x1fc   : > { %v1541_v2 = vpack.c.b16 %v1538_v3, %v1537_v50  ;;  %v1146_v60 = vsub.f32 %v3134_v23, %v1105_v56 }
 0x1fd   : > { %v2685_v1 = vpop.eup %2684  ;;  %v1167_v16 = vmul.f32 1.442695, %v1144_v17  ;;  %v1179_v29 = vmul.f32 1.442695, %v1150_v20  ;;  %v1655_v20 = vunpack.c.l.b16 %v1438_v36 }
 0x1fe   : > { %v1171_v58 = vmul.f32 1.442695, %v1146_v60  ;;  %2468 = vmatmul.msk.bf16.vlgmr.msrb.gmra.mxu1 %vm944_vm3, %v1541_v2  ;;  %v1193_v43 = vmul.f32 %v2685_v1, %v3095_v52 }
 0x1ff   : > { %2686 = vpow2.f32 %v1179_v29 }
 0x200   : > { %2688 = vpow2.f32 %v1171_v58  ;;  %v1257_v47 = vsel %vm944_vm3, %v1193_v43, 0.0  ;;  %v1434_v17 = vpack.c.bf16 %v1193_v43, %v1193_v43 }
 0x201   : > { %2690 = vpow2.f32 %v1167_v16  ;;  %1258 = vadd.xlane.f32.xlu2 %v1257_v47  ;;  %1237 = vadd.xlane.f32.xlu1 %v1236_v35 }
 0x202   : > { %v1115_v15 = vpop.permute.xlu2 %1114  ;;  %2692 = vpow2.f32 %v1159_v59  ;;  %v1090_v0 = vpop.permute.xlu1 %1089 }
 0x203   : > { %v1148_v23 = vsub.f32 %v3153_v37, %v1115_v15  ;;  %v1143_v12 = vsub.f32 %v3149_v33, %v1090_v0  ;;  %v1070_v46 = vpop.permute.xlu0 %1069  ;;  %v1248_v33 = vsel %vm944_vm3, %v1190_v40, 0.0 }
 0x204   : > { %v1139_v39 = vsub.f32 %v3132_v21, %v1070_v46 }
 0x205   : > { %v2687_v52 = vpop.eup %2686  ;;  %v1165_v19 = vmul.f32 1.442695, %v1143_v12  ;;  %v1175_v57 = vmul.f32 1.442695, %v1148_v23 }
 0x206   : > { %v2689_v25 = vpop.eup %2688  ;;  %v1157_v11 = vmul.f32 1.442695, %v1139_v39  ;;  %v1198_v45 = vmul.f32 %v2687_v52, %v3106_v62 }
 0x207   : > { %v2691_v6 = vpop.eup %2690  ;;  %2694 = vpow2.f32 %v1165_v19  ;;  %v1194_v37 = vmul.f32 %v2689_v25, %v3106_v62  ;;  %v1596_v62 = vunpack.c.l.b16 %v1434_v17 }
 0x208   : > { %v2693_v50 = vpop.eup %2692  ;;  %2696 = vpow2.f32 %v1157_v11  ;;  %v1272_v21 = vsel %vm944_vm3, %v1198_v45, 0.0  ;;  %v1439_v3 = vpack.c.bf16 %v1198_v45, %v1198_v45  ;;  %v1192_v60 = vmul.f32 %v2691_v6, %v3138_v27 }
 0x209   : > { %1249 = vadd.xlane.f32.xlu2 %v1248_v33  ;;  %1273 = vadd.xlane.f32.xlu1 %v1272_v21  ;;  %v1260_v54 = vsel %vm944_vm3, %v1194_v37, 0.0  ;;  %v1435_v55 = vpack.c.bf16 %v1194_v37, %v1194_v37  ;;  %2698 = vpow2.f32 %v1175_v57  ;;  %v1188_v29 = vmul.f32 %v2693_v50, %v3138_v27 }
 0x20a   : > { %v1656_v56 = vunpack.c.l.b16 %v1439_v3  ;;  %1261 = vadd.xlane.f32.xlu0 %v1260_v54  ;;  %v1130_v2 = vpop.permute.xlu1 %1129  ;;  %v1433_v12 = vpack.c.bf16 %v1192_v60, %v1192_v60  ;;  %v1338_v10 = vpop.permute.xlu2 %1337 }
 0x20b   : > { %v1597_v1 = vunpack.c.l.b16 %v1435_v55  ;;  %v1151_v16 = vsub.f32 %v3140_v28, %v1130_v2  ;;  %v1110_v40 = vpop.permute.xlu0 %1109  ;;  %v1429_v46 = vpack.c.bf16 %v1188_v29, %v1188_v29 }
 0x20c   : > { %v1659_v59 = vpack.c.b16 %v1656_v56, %v1655_v20  ;;  %v1147_v58 = vsub.f32 %v3146_v32, %v1110_v40  ;;  %v1540_v36 = vunpack.c.l.b16 %v1433_v12 }
 0x20d   : > { %v2695_v43 = vpop.eup %2694  ;;  %v1600_v47 = vpack.c.b16 %v1597_v1, %v1596_v62  ;;  %v1181_v35 = vmul.f32 1.442695, %v1151_v16  ;;  %v1481_v45 = vunpack.c.l.b16 %v1429_v46  ;;  %v1053_v46 = vmul.f32 1.442695, %v1023_v34 }
 0x20e   : > { %v2697_v15 = vpop.eup %2696  ;;  %v1173_v23 = vmul.f32 1.442695, %v1147_v58  ;;  %2504 = vmatmul.msk.bf16.vlgmr.msrb.gmra.mxu3 %vm944_vm3, %v1659_v59  ;;  %v1191_v0 = vmul.f32 %v2695_v43, %v3117_v8  ;;  %v1242_v43 = vsel %vm944_vm3, %v1188_v29, 0.0 }
 0x20f   : > { %2700 = vpow2.f32 %v1181_v35  ;;  %2486 = vmatmul.msk.bf16.vlgmr.msrb.gmra.mxu2 %vm944_vm3, %v1600_v47  ;;  %v1187_v28 = vmul.f32 %v2697_v15, %v3117_v8  ;;  %v2699_v39 = vpop.eup %2698  ;;  %v1254_v47 = vsel %vm944_vm3, %v1192_v60, 0.0  ;;  %v1055_v60 = vmul.f32 1.442695, %v1024_v51 }
 0x210   : > { %2702 = vpow2.f32 %v1173_v23  ;;  %v1432_v52 = vpack.c.bf16 %v1191_v0, %v1191_v0  ;;  %v1196_v6 = vmul.f32 %v2699_v39, %v3138_v27 }
 0x211   : > { %v1239_v32 = vsel %vm944_vm3, %v1187_v28, 0.0  ;;  %v1428_v19 = vpack.c.bf16 %v1187_v28, %v1187_v28 }
 0x212   : > { %1240 = vadd.xlane.f32.xlu0 %v1239_v32  ;;  %v1539_v25 = vunpack.c.l.b16 %v1432_v52  ;;  %v1437_v20 = vpack.c.bf16 %v1196_v6, %v1196_v6  ;;  %v1266_v28 = vsel %vm944_vm3, %v1196_v6, 0.0  ;;  %v1333_v4 = vpop.permute.xlu1 %1332  ;;  %v3448_v51 = vpop.permute.xlu2 %1357  ;;  %v1201_v6 = vld [vmem:[#allocation3] sm:$0xff] }
 0x213   : > { %v1480_v57 = vunpack.c.l.b16 %v1428_v19  ;;  %v1135_v11 = vpop.permute.xlu0 %1134 }
 0x214   : > { %v1152_v17 = vsub.f32 %v3159_v42, %v1135_v11  ;;  %v1542_v37 = vpack.c.b16 %v1540_v36, %v1539_v25  ;;  %v1251_v42 = vsel %vm944_vm3, %v1191_v0, 0.0  ;;  %v1599_v16 = vunpack.c.l.b16 %v1437_v20  ;;  %v1213_v25 = vld [vmem:[#allocation3 + $0x60] sm:$0xff] }
 0x215   : > { %v2701_v50 = vpop.eup %2700  ;;  %v1483_v33 = vpack.c.b16 %v1481_v45, %v1480_v57  ;;  %v1229_v57 = vmul.f32 %v3299_v41, %v1213_v25  ;;  %v1314_v20 = vld [vmem:[#allocation4] sm:$0xff] }
 0x216   : > { %v2703_v21 = vpop.eup %2702  ;;  %v1183_v3 = vmul.f32 1.442695, %v1152_v17  ;;  %2469 = vmatmul.msk.bf16.gmra.mxu1 %vm944_vm3, %v1542_v37  ;;  %v1199_v54 = vmul.f32 %v2701_v50, %v3117_v8  ;;  %v1217_v17 = vmul.f32 %v3265_v44, %v1201_v6  ;;  %v1209_v41 = vld [vmem:[#allocation3 + $0x40] sm:$0xff]  ;;  %v1319_v6 = vld [vmem:[#allocation4 + $0x28] sm:$0xff] }
 0x217   : > { %2451 = vmatmul.msk.bf16.gmra.mxu0 %vm944_vm3, %v1483_v33  ;;  %v1195_v55 = vmul.f32 %v2703_v21, %v3117_v8  ;;  %v1205_v21 = vld [vmem:[#allocation3 + $0x20] sm:$0xff]  ;;  %v1225_v44 = vmul.f32 %v3308_v49, %v1209_v41 }
 0x218   : > { %2704 = vpow2.f32 %v1183_v3  ;;  %v1275_v56 = vsel %vm944_vm3, %v1199_v54, 0.0  ;;  %v1440_v58 = vpack.c.bf16 %v1199_v54, %v1199_v54  ;;  %v1221_v3 = vmul.f32 %v3291_v5, %v1205_v21  ;;  %v1315_v5 = vld [vmem:[#allocation4 + $0x8] sm:$0xff]  ;;  %v1211_v21 = vld [vmem:[#allocation3 + $0x50] sm:$0xff]  ;;  %v1326_v41 = vld [vmem:[#allocation4 + $0x60] sm:$0xff] }
 0x219   : > { %1276 = vadd.xlane.f32.xlu2 %v1275_v56  ;;  %v1263_v2 = vsel %vm944_vm3, %v1195_v55, 0.0  ;;  %v1436_v62 = vpack.c.bf16 %v1195_v55, %v1195_v55  ;;  %v1202_v56 = vld [vmem:[#allocation3 + $0x8] sm:$0xff] }
 0x21a   : > { %1252 = vadd.xlane.f32.xlu0 %v1251_v42  ;;  %1264 = vadd.xlane.f32.xlu1 %v1263_v2  ;;  %v1657_v23 = vunpack.c.l.b16 %v1440_v58  ;;  %v3446_v13 = vpop.permute.xlu1 %1362  ;;  %v3454_v34 = vpop.permute.xlu2 %1372  ;;  %v1410_v42 = vmul.f32 %v1333_v4, %v1314_v20 }
 0x21b   : > { %v1598_v1 = vunpack.c.l.b16 %v1436_v62  ;;  %v3438_v39 = vpop.permute.xlu0 %1342  ;;  %v1218_v62 = vmul.f32 %v3286_v30, %v1202_v56 }
 0x21d   : > { %v1601_v40 = vpack.c.b16 %v1599_v16, %v1598_v1 }
 0x21e   : > { %v2705_v59 = vpop.eup %2704 }
 0x21f   : > { %2487 = vmatmul.msk.bf16.gmra.mxu2 %vm944_vm3, %v1601_v40  ;;  %v1200_v8 = vmul.f32 %v2705_v59, %v3138_v27  ;;  %v1051_v27 = vmul.f32 1.442695, %v1022_v18 }
 0x221   : > { %1243 = vadd.xlane.f32.xlu2 %v1242_v43  ;;  %v1278_v35 = vsel %vm944_vm3, %v1200_v8, 0.0  ;;  %v1441_v15 = vpack.c.bf16 %v1200_v8, %v1200_v8  ;;  %2706 = vpow2.f32 %v1051_v27  ;;  %v1318_v8 = vld [vmem:[#allocation4 + $0x20] sm:$0xff]  ;;  %v1206_v43 = vld [vmem:[#allocation3 + $0x28] sm:$0xff] }
 0x222   : > { %1255 = vadd.xlane.f32.xlu1 %v1254_v47  ;;  %1279 = vadd.xlane.f32.xlu0 %v1278_v35  ;;  %2708 = vpow2.f32 %v1055_v60  ;;  %v3452_v31 = vpop.permute.xlu1 %1377  ;;  %v3460_v36 = vpop.permute.xlu2 %1387  ;;  %v1214_v47 = vld [vmem:[#allocation3 + $0x68] sm:$0xff] }
 0x223   : > { %v1658_v0 = vunpack.c.l.b16 %v1441_v15  ;;  %2710 = vpow2.f32 %v1053_v46  ;;  %v1353_v53 = vpop.permute.xlu0 %1352  ;;  %v1210_v35 = vld [vmem:[#allocation3 + $0x48] sm:$0xff]  ;;  %v1411_v15 = vmul.f32 %v1338_v10, %v1315_v5 }
 0x224   : > { %v1414_v49 = vmul.f32 %v1353_v53, %v1318_v8  ;;  %v1226_v4 = vmul.f32 %v3288_v14, %v1210_v35 }
 0x225   : > { %v1660_v12 = vpack.c.b16 %v1658_v0, %v1657_v23  ;;  %v1222_v0 = vmul.f32 %v3297_v26, %v1206_v43  ;;  %v1203_v26 = vld [vmem:[#allocation3 + $0x10] sm:$0xff] }
 0x226   : > { %v1219_v53 = vmul.f32 %v3277_v7, %v1203_v26 }
 0x227   : > { %2505 = vmatmul.msk.bf16.gmra.mxu3 %vm944_vm3, %v1660_v12  ;;  %v2707_v29 = vpop.eup %2706 }
 0x228   : > { %v3440_v52 = vpop.eup %2708  ;;  %v1230_v12 = vmul.f32 %v2707_v29, %v1214_v47 }
 0x229   : > { %1267 = vadd.xlane.f32.xlu2 %v1266_v28  ;;  %v3443_v18 = vpop.eup %2710 }
 0x22a   : > { %v3458_v19 = vpop.permute.xlu1 %1392 }
 0x22b   : > { %v3450_v22 = vpop.permute.xlu0 %1382 }
 0x232   : > { %v3465_v37 = vpop.permute.xlu1 %1347 }
 0x233   : > { %v3456_v32 = vpop.permute.xlu0 %1367 }
 0x236   : > { %1397 = vperm.xlu0 %2647, %v2707_v29   ;;  %v1415_v29 = vmul.f32 %v3448_v51, %v1319_v6  ;;  %v1227_v51 = vmul.f32 %v3302_v48, %v1211_v21  ;;  %v1328_v21 = vld [vmem:[#allocation4 + $0x70] sm:$0xff] }
 0x23b   : > { %1407 = vperm.xlu1 %2645, %v3440_v52  }
 0x241   : > { %1402 = vperm.xlu2 %2646, %v3443_v18  }
 0x25e   : > { %v1271_v11 = vpop.xlane.xlu0 %1270 }
 0x25f   : > { %v1293_v45 = vadd.f32 %v1271_v11, %v1229_v57 }
 0x261   : > { %1310 = vst.msk [vmem:[#allocation3 + $0x60] sm:$0xff] %vm532_vm0, %v1293_v45 }
 0x264   : > { %v1235_v50 = vpop.xlane.xlu2 %1234 }
 0x265   : > { %v1281_v33 = vadd.f32 %v1235_v50, %v1217_v17 }
 0x267   : > { %1298 = vst.msk [vmem:[#allocation3] sm:$0xff] %vm532_vm0, %v1281_v33  ;;  %v1215_v33 = vld [vmem:[#allocation3 + $0x70] sm:$0xff] }
 0x26c   : > { %v1247_v54 = vpop.xlane.xlu1 %1246 }
 0x26d   : > { %v1285_v55 = vadd.f32 %v1247_v54, %v1221_v3  ;;  %v1207_v3 = vld [vmem:[#allocation3 + $0x30] sm:$0xff]  ;;  %v1231_v54 = vmul.f32 %v3443_v18, %v1215_v33  ;;  %v1204_v18 = vld [vmem:[#allocation3 + $0x18] sm:$0xff] }
 0x26e   : > { %v1223_v20 = vmul.f32 %v3274_v61, %v1207_v3 }
 0x26f   : > { %1302 = vst.msk [vmem:[#allocation3 + $0x20] sm:$0xff] %vm532_vm0, %v1285_v55 }
 0x273   : > { %v1523_v2 = vpop.f32.mrf.mxu0 }
 0x274   : > { %v1710_v1 = vadd.f32 %v1523_v2, %v1410_v42  ;;  %v1259_v16 = vpop.xlane.xlu2 %1258  ;;  %v1238_v40 = vpop.xlane.xlu1 %1237  ;;  %v1322_v2 = vld [vmem:[#allocation4 + $0x40] sm:$0xff] }
 0x275   : > { %v1289_v59 = vadd.f32 %v1259_v16, %v1225_v44  ;;  %v1282_v58 = vadd.f32 %v1238_v40, %v1218_v62  ;;  %v1316_v16 = vld [vmem:[#allocation4 + $0x10] sm:$0xff]  ;;  %v1422_v40 = vmul.f32 %v3458_v19, %v1326_v41  ;;  %v1418_v48 = vmul.f32 %v3454_v34, %v1322_v2 }
 0x276   : > { %1726 = vst.msk [vmem:[#allocation4] sm:$0xff] %vm565_vm1, %v1710_v1  ;;  %v1320_v1 = vld [vmem:[#allocation4 + $0x30] sm:$0xff]  ;;  %v1412_v47 = vmul.f32 %v3438_v39, %v1316_v16  ;;  %v1220_v19 = vmul.f32 %v3310_v63, %v1204_v18  ;;  %v1323_v39 = vld [vmem:[#allocation4 + $0x48] sm:$0xff] }
 0x277   : > { %1306 = vst.msk [vmem:[#allocation3 + $0x40] sm:$0xff] %vm532_vm0, %v1289_v59  ;;  %v1208_v59 = vld [vmem:[#allocation3 + $0x38] sm:$0xff]  ;;  %v1416_v5 = vmul.f32 %v3446_v13, %v1320_v1 }
 0x278   : > { %1299 = vst.msk [vmem:[#allocation3 + $0x8] sm:$0xff] %vm532_vm0, %v1282_v58  ;;  %v1216_v58 = vld [vmem:[#allocation3 + $0x78] sm:$0xff] }
 0x27b   : > { %v1525_v23 = vpop.f32.mrf.mxu0  ;;  %v1582_v30 = vpop.f32.mrf.mxu1 }
 0x27c   : > { %v1711_v28 = vadd.f32 %v1525_v23, %v1411_v15  ;;  %v1714_v27 = vadd.f32 %v1582_v30, %v1414_v49  ;;  %v1250_v60 = vpop.xlane.xlu2 %1249  ;;  %v1274_v46 = vpop.xlane.xlu1 %1273  ;;  %v1224_v30 = vmul.f32 %v3313_v24, %v1208_v59  ;;  %v1212_v24 = vld [vmem:[#allocation3 + $0x58] sm:$0xff] }
 0x27d   : > { %v1286_v25 = vadd.f32 %v1250_v60, %v1222_v0  ;;  %v1294_v57 = vadd.f32 %v1274_v46, %v1230_v12  ;;  %v1262_v11 = vpop.xlane.xlu0 %1261  ;;  %v1232_v0 = vmul.f32 %v3440_v52, %v1216_v58  ;;  %v1321_v46 = vld [vmem:[#allocation4 + $0x38] sm:$0xff]  ;;  %v1419_v52 = vmul.f32 %v3452_v31, %v1323_v39 }
 0x27e   : > { %1727 = vst.msk [vmem:[#allocation4 + $0x8] sm:$0xff] %vm565_vm1, %v1711_v28  ;;  %v1290_v45 = vadd.f32 %v1262_v11, %v1226_v4  ;;  %v1317_v4 = vld [vmem:[#allocation4 + $0x18] sm:$0xff]  ;;  %v1228_v26 = vmul.f32 %v3317_v38, %v1212_v24 }
 0x27f   : > { %1730 = vst.msk [vmem:[#allocation4 + $0x20] sm:$0xff] %vm565_vm1, %v1714_v27  ;;  %v1413_v11 = vmul.f32 %v3465_v37, %v1317_v4  ;;  %v1325_v38 = vld [vmem:[#allocation4 + $0x58] sm:$0xff] }
 0x280   : > { %1303 = vst.msk [vmem:[#allocation3 + $0x28] sm:$0xff] %vm532_vm0, %v1286_v25  ;;  %v1417_v25 = vmul.f32 %v3456_v32, %v1321_v46 }
 0x281   : > { %1311 = vst.msk [vmem:[#allocation3 + $0x68] sm:$0xff] %vm532_vm0, %v1294_v57 }
 0x282   : > { %1307 = vst.msk [vmem:[#allocation3 + $0x48] sm:$0xff] %vm532_vm0, %v1290_v45 }
 0x283   : > { %v1584_v10 = vpop.f32.mrf.mxu1 }
 0x284   : > { %v1715_v14 = vadd.f32 %v1584_v10, %v1415_v29 }
 0x285   : > { %v1241_v17 = vpop.xlane.xlu0 %1240 }
 0x286   : > { %1731 = vst.msk [vmem:[#allocation4 + $0x28] sm:$0xff] %vm565_vm1, %v1715_v14  ;;  %v1283_v50 = vadd.f32 %v1241_v17, %v1219_v53  ;;  %v1324_v17 = vld [vmem:[#allocation4 + $0x50] sm:$0xff] }
 0x287   : > { %v1420_v32 = vmul.f32 %v3450_v22, %v1324_v17  ;;  %v1329_v22 = vld [vmem:[#allocation4 + $0x78] sm:$0xff] }
 0x288   : > { %1300 = vst.msk [vmem:[#allocation3 + $0x10] sm:$0xff] %vm532_vm0, %v1283_v50 }
 0x28c   : > { %v1277_v55 = vpop.xlane.xlu2 %1276 }
 0x28d   : > { %v1295_v56 = vadd.f32 %v1277_v55, %v1231_v54  ;;  %v1265_v42 = vpop.xlane.xlu1 %1264  ;;  %v1253_v7 = vpop.xlane.xlu0 %1252  ;;  %v1327_v54 = vld [vmem:[#allocation4 + $0x68] sm:$0xff] }
 0x28e   : > { %v1291_v44 = vadd.f32 %v1265_v42, %v1227_v51  ;;  %v1287_v62 = vadd.f32 %v1253_v7, %v1223_v20  ;;  %v1421_v51 = vmul.f32 %v3460_v36, %v1325_v38 }
 0x28f   : > { %1312 = vst.msk [vmem:[#allocation3 + $0x70] sm:$0xff] %vm532_vm0, %v1295_v56 }
 0x290   : > { %1308 = vst.msk [vmem:[#allocation3 + $0x50] sm:$0xff] %vm532_vm0, %v1291_v44 }
 0x291   : > { %1304 = vst.msk [vmem:[#allocation3 + $0x30] sm:$0xff] %vm532_vm0, %v1287_v62  ;;  %v1700_v61 = vpop.f32.mrf.mxu3 }
 0x292   : > { %v1641_v8 = vpop.f32.mrf.mxu2  ;;  %v1722_v43 = vadd.f32 %v1700_v61, %v1422_v40 }
 0x293   : > { %v1718_v35 = vadd.f32 %v1641_v8, %v1418_v48  ;;  %v1587_v15 = vpop.f32.mrf.mxu1 }
 0x294   : > { %1738 = vst.msk [vmem:[#allocation4 + $0x60] sm:$0xff] %vm565_vm1, %v1722_v43  ;;  %v1528_v49 = vpop.f32.mrf.mxu0  ;;  %v1716_v23 = vadd.f32 %v1587_v15, %v1416_v5  ;;  %v1244_v34 = vpop.xlane.xlu2 %1243 }
 0x295   : > { %1734 = vst.msk [vmem:[#allocation4 + $0x40] sm:$0xff] %vm565_vm1, %v1718_v35  ;;  %v1712_v13 = vadd.f32 %v1528_v49, %v1412_v47  ;;  %v1284_v12 = vadd.f32 %v1244_v34, %v1220_v19  ;;  %v1256_v28 = vpop.xlane.xlu1 %1255  ;;  %v1280_v27 = vpop.xlane.xlu0 %1279 }
 0x296   : > { %1732 = vst.msk [vmem:[#allocation4 + $0x30] sm:$0xff] %vm565_vm1, %v1716_v23  ;;  %v1288_v60 = vadd.f32 %v1256_v28, %v1224_v30  ;;  %v1296_v63 = vadd.f32 %v1280_v27, %v1232_v0 }
 0x297   : > { %1728 = vst.msk [vmem:[#allocation4 + $0x10] sm:$0xff] %vm565_vm1, %v1712_v13 }
 0x298   : > { %1301 = vst.msk [vmem:[#allocation3 + $0x18] sm:$0xff] %vm532_vm0, %v1284_v12 }
 0x299   : > { %1305 = vst.msk [vmem:[#allocation3 + $0x38] sm:$0xff] %vm532_vm0, %v1288_v60  ;;  %v1702_v37 = vpop.f32.mrf.mxu3 }
 0x29a   : > { %1313 = vst.msk [vmem:[#allocation3 + $0x78] sm:$0xff] %vm532_vm0, %v1296_v63  ;;  %v1643_v57 = vpop.f32.mrf.mxu2 }
 0x29b   : > { %v1719_v45 = vadd.f32 %v1643_v57, %v1419_v52  ;;  %v1589_v6 = vpop.f32.mrf.mxu1 }
 0x29c   : > { %v1530_v29 = vpop.f32.mrf.mxu0  ;;  %v1717_v10 = vadd.f32 %v1589_v6, %v1417_v25  ;;  %v1268_v14 = vpop.xlane.xlu2 %1267 }
 0x29d   : > { %1735 = vst.msk [vmem:[#allocation4 + $0x48] sm:$0xff] %vm565_vm1, %v1719_v45  ;;  %v1713_v53 = vadd.f32 %v1530_v29, %v1413_v11  ;;  %v1292_v31 = vadd.f32 %v1268_v14, %v1228_v26 }
 0x29e   : > { %1733 = vst.msk [vmem:[#allocation4 + $0x38] sm:$0xff] %vm565_vm1, %v1717_v10 }
 0x29f   : > { %1729 = vst.msk [vmem:[#allocation4 + $0x18] sm:$0xff] %vm565_vm1, %v1713_v53 }
 0x2a0   : > { %1309 = vst.msk [vmem:[#allocation3 + $0x58] sm:$0xff] %vm532_vm0, %v1292_v31 }
 0x2a2   : > { %v1646_v50 = vpop.f32.mrf.mxu2 }
 0x2a3   : > { %v1720_v33 = vadd.f32 %v1646_v50, %v1420_v32 }
 0x2a4   : > { %v1403_v3 = vpop.permute.xlu2 %1402 }
 0x2a5   : > { %1736 = vst.msk [vmem:[#allocation4 + $0x50] sm:$0xff] %vm565_vm1, %v1720_v33  ;;  %v1424_v20 = vmul.f32 %v1403_v3, %v1328_v21 }
 0x2a8   : > { %v1398_v55 = vpop.permute.xlu0 %1397 }
 0x2a9   : > { %v1423_v41 = vmul.f32 %v1398_v55, %v1327_v54 }
 0x2aa   : > { %v1648_v56 = vpop.f32.mrf.mxu2  ;;  %v1705_v42 = vpop.f32.mrf.mxu3 }
 0x2ab   : > { %v1723_v7 = vadd.f32 %v1702_v37, %v1423_v41  ;;  %v1721_v2 = vadd.f32 %v1648_v56, %v1421_v51  ;;  %v1724_v44 = vadd.f32 %v1705_v42, %v1424_v20 }
 0x2ad   : > { %1739 = vst.msk [vmem:[#allocation4 + $0x68] sm:$0xff] %vm565_vm1, %v1723_v7  ;;  %v1408_v62 = vpop.permute.xlu1 %1407 }
 0x2ae   : > { %1737 = vst.msk [vmem:[#allocation4 + $0x58] sm:$0xff] %vm565_vm1, %v1721_v2  ;;  %v1425_v1 = vmul.f32 %v1408_v62, %v1329_v22 }
 0x2af   : > { %1740 = vst.msk [vmem:[#allocation4 + $0x70] sm:$0xff] %vm565_vm1, %v1724_v44 }
 0x2b2   : > { %v1707_v16 = vpop.f32.mrf.mxu3 }
 0x2b3   : > { %v1725_v40 = vadd.f32 %v1707_v16, %v1425_v1 }
 0x2b5   : > { %1741 = vst.msk [vmem:[#allocation4 + $0x78] sm:$0xff] %vm565_vm1, %v1725_v40 }
 0x2b6 PF: > { %v1823_v36 = vld [vmem:[#allocation3 + $0x10] sm:$0xff]  ;;  %v1821_v18 = vld [vmem:[#allocation3] sm:$0xff]  ;;  %v2807_v61 = vmov 0   ;;  %v1824_v59 = vld [vmem:[#allocation3 + $0x18] sm:$0xff] }
 0x2b7   : > { %v1911_v48 = vld [vmem:[#allocation3 + $0x20] sm:$0xff]  ;;  %2713 = vset.pattern.permute.xlu1 %v2807_v61  ;;  %2712 = vset.pattern.permute.xlu0 %v2807_v61  ;;  %vm1827_vm7 = vcmp.eq.f32.partialorder %v1823_v36, 0.0  ;;  %vm1825_vm8 = vcmp.eq.f32.partialorder %v1821_v18, 0.0  ;;  %v1822_v58 = vld [vmem:[#allocation3 + $0x8] sm:$0xff]  ;;  %vm1828_vm10 = vcmp.eq.f32.partialorder %v1824_v59, 0.0  ;;  %v1913_v57 = vld [vmem:[#allocation3 + $0x30] sm:$0xff] }
 0x2b8   : > { %vm1915_vm9 = vcmp.eq.f32.partialorder %v1911_v48, 0.0  ;;  %v1912_v5 = vld [vmem:[#allocation3 + $0x28] sm:$0xff]  ;;  %v2526_v8 = vsel %vm1827_vm7, 1.0, %v2804_v9  ;;  %v2524_v43 = vsel %vm1825_vm8, 1.0, %v2804_v9  ;;  %2714 = vset.pattern.permute.xlu2 %v2807_v61  ;;  %v2527_v49 = vsel %vm1828_vm10, 1.0, %v2804_v9  ;;  %v2001_v30 = vld [vmem:[#allocation3 + $0x40] sm:$0xff] }
 0x2b9   : > { %v2530_v47 = vsel %vm1915_vm9, 1.0, %v2804_v9  ;;  %v1839_v35 = vadd.f32 %v2526_v8, %v1823_v36  ;;  %v1837_v15 = vadd.f32 %v2524_v43, %v1821_v18  ;;  %vm1826_vm11 = vcmp.eq.f32.partialorder %v1822_v58, 0.0  ;;  %v2002_v13 = vld [vmem:[#allocation3 + $0x48] sm:$0xff]  ;;  %v2091_v28 = vld [vmem:[#allocation3 + $0x60] sm:$0xff]  ;;  %v1914_v45 = vld [vmem:[#allocation3 + $0x38] sm:$0xff] }
 0x2ba   : > { %v1927_v19 = vadd.f32 %v2530_v47, %v1911_v48  ;;  %vm1916_vm12 = vcmp.eq.f32.partialorder %v1912_v5, 0.0  ;;  %v2525_v23 = vsel %vm1826_vm11, 1.0, %v2804_v9  ;;  %v1840_v0 = vadd.f32 %v2527_v49, %v1824_v59  ;;  %v2092_v52 = vld [vmem:[#allocation3 + $0x68] sm:$0xff]  ;;  %v2003_v17 = vld [vmem:[#allocation3 + $0x50] sm:$0xff]  ;;  %v2004_v37 = vld [vmem:[#allocation3 + $0x58] sm:$0xff] }
 0x2bb   : > { %2716 = vrcp.f32 %v1839_v35  ;;  %v2531_v34 = vsel %vm1916_vm12, 1.0, %v2804_v9  ;;  %v1838_v12 = vadd.f32 %v2525_v23, %v1822_v58  ;;  %vm2005_vm13 = vcmp.eq.f32.partialorder %v2001_v30, 0.0  ;;  %v2093_v33 = vld [vmem:[#allocation3 + $0x70] sm:$0xff]  ;;  %v2094_v41 = vld [vmem:[#allocation3 + $0x78] sm:$0xff]  ;;  %v2597_v48 = vld [vmem:[%s3599_s6 + $0x8] sm:$0xff] }
 0x2bc   : > { %2718 = vrcp.f32 %v1837_v15  ;;  %v1928_v27 = vadd.f32 %v2531_v34, %v1912_v5  ;;  %vm2006_vm14 = vcmp.eq.f32.partialorder %v2002_v13, 0.0  ;;  %vm2095_vm15 = vcmp.eq.f32.partialorder %v2091_v28, 0.0  ;;  %1808 = vmatpush.bf16.msra.mxu0 %v2597_v48  ;;  %v2594_v61 = vld [vmem:[%s2927_s24] sm:$0xff]  ;;  %v2595_v43 = vld [vmem:[%s2927_s24 + $0x8] sm:$0xff] }
 0x2bd   : > { %2720 = vrcp.f32 %v1927_v19  ;;  %v2537_v63 = vsel %vm2005_vm13, 1.0, %v2804_v9  ;;  %v2538_v4 = vsel %vm2006_vm14, 1.0, %v2804_v9  ;;  %v2544_v24 = vsel %vm2095_vm15, 1.0, %v2804_v9  ;;  %v1875_v59 = vld [vmem:[%s3601_s8] sm:$0xf] }
 0x2be   : > { %2722 = vrcp.f32 %v1840_v0  ;;  %v2017_v25 = vadd.f32 %v2537_v63, %v2001_v30  ;;  %v2018_v11 = vadd.f32 %v2538_v4, %v2002_v13  ;;  %v2107_v26 = vadd.f32 %v2544_v24, %v2091_v28  ;;  %v2534_v5 = vld [vmem:[%s3601_s8 + $0x4] sm:$0xf]  ;;  %v2541_v47 = vld [vmem:[%s3601_s8 + $0x8] sm:$0xf]  ;;  %v2548_v15 = vld [vmem:[%s3601_s8 + $0xc] sm:$0xf] }
 0x2bf   : > { %2724 = vrcp.f32 %v1838_v12  ;;  %vm2096_vm0 = vcmp.eq.f32.partialorder %v2092_v52, 0.0  ;;  %vm1917_vm2 = vcmp.eq.f32.partialorder %v1913_v57, 0.0  ;;  %vm1918_vm3 = vcmp.eq.f32.partialorder %v1914_v45, 0.0  ;;  %v1845_v30 = vld [vmem:[#allocation4] sm:$0xff]  ;;  %v1847_v0 = vld [vmem:[#allocation4 + $0x10] sm:$0xff]  ;;  %v1848_v13 = vld [vmem:[#allocation4 + $0x18] sm:$0xff] }
 0x2c0   : > { %2726 = vrcp.f32 %v1928_v27  ;;  %v2545_v14 = vsel %vm2096_vm0, 1.0, %v2804_v9  ;;  %v2532_v53 = vsel %vm1917_vm2, 1.0, %v2804_v9  ;;  %v2533_v31 = vsel %vm1918_vm3, 1.0, %v2804_v9  ;;  %v1846_v12 = vld [vmem:[#allocation4 + $0x8] sm:$0xff] }
 0x2c1   : > { %v2717_v39 = vpop.eup %2716  ;;  %2728 = vrcp.f32 %v2017_v25  ;;  %v2108_v32 = vadd.f32 %v2545_v14, %v2092_v52  ;;  %v1929_v50 = vadd.f32 %v2532_v53, %v1913_v57  ;;  %v1930_v21 = vadd.f32 %v2533_v31, %v1914_v45  ;;  %v2026_v25 = vld [vmem:[#allocation4 + $0x40] sm:$0xff]  ;;  %v2027_v57 = vld [vmem:[#allocation4 + $0x48] sm:$0xff] }
 0x2c2   : > { %v2719_v60 = vpop.eup %2718  ;;  %1861 = vperm.xlu0 %2712, %v2717_v39   ;;  %2730 = vrcp.f32 %v2018_v11  ;;  %vm2007_vm4 = vcmp.eq.f32.partialorder %v2003_v17, 0.0  ;;  %vm2008_vm5 = vcmp.eq.f32.partialorder %v2004_v37, 0.0  ;;  %vm2097_vm6 = vcmp.eq.f32.partialorder %v2093_v33, 0.0  ;;  %v1937_v14 = vld [vmem:[#allocation4 + $0x28] sm:$0xff]  ;;  %v2116_v31 = vld [vmem:[#allocation4 + $0x60] sm:$0xff] }
 0x2c3   : > { %v2721_v46 = vpop.eup %2720  ;;  %1851 = vperm.xlu1 %2713, %v2719_v60   ;;  %2732 = vrcp.f32 %v2107_v26  ;;  %v2539_v55 = vsel %vm2007_vm4, 1.0, %v2804_v9  ;;  %v2540_v51 = vsel %vm2008_vm5, 1.0, %v2804_v9  ;;  %v2546_v20 = vsel %vm2097_vm6, 1.0, %v2804_v9 }
 0x2c4   : > { %1942 = vperm.xlu2 %2714, %v2721_v46   ;;  %v2723_v6 = vpop.eup %2722  ;;  %2734 = vrcp.f32 %v2108_v32  ;;  %v2019_v56 = vadd.f32 %v2539_v55, %v2003_v17  ;;  %v2020_v42 = vadd.f32 %v2540_v51, %v2004_v37  ;;  %v2109_v2 = vadd.f32 %v2546_v20, %v2093_v33  ;;  %v2117_v17 = vld [vmem:[#allocation4 + $0x68] sm:$0xff]  ;;  %v2028_v51 = vld [vmem:[#allocation4 + $0x50] sm:$0xff]  ;;  %v2029_v20 = vld [vmem:[#allocation4 + $0x58] sm:$0xff] }
 0x2c5   : > { %v2725_v29 = vpop.eup %2724  ;;  %2736 = vrcp.f32 %v1929_v50  ;;  %vm2098_vm7 = vcmp.eq.f32.partialorder %v2094_v41, 0.0  ;;  %vm1795_vm8 = vcmask 261120   ;;  %vm1883_vm9 = vcmask 1043456  }
 0x2c6   : > { %v2727_v10 = vpop.eup %2726  ;;  %2738 = vrcp.f32 %v1930_v21  ;;  %v2547_v62 = vsel %vm2098_vm7, 1.0, %v2804_v9  ;;  %v2596_v9 = vld [vmem:[%s3599_s6] sm:$0xff]  ;;  %v1885_v58 = vsel %vm1883_vm9, %v1875_v59, 0  ;;  %v1975_v8 = vsel %vm1883_vm9, %v2534_v5, 0 }
 0x2c7   : > { %v2729_v38 = vpop.eup %2728  ;;  %2740 = vrcp.f32 %v2019_v56  ;;  %v2110_v1 = vadd.f32 %v2547_v62, %v2094_v41  ;;  %1809 = vmatpush.bf16.msra.mxu0 %v2596_v9  ;;  %1894 = vmatpush.bf16.msra.mxu1 %v1885_v58  ;;  %v2065_v35 = vsel %vm1883_vm9, %v2541_v47, 0  ;;  %v2155_v19 = vsel %vm1883_vm9, %v2548_v15, 0  ;;  %v2118_v62 = vld [vmem:[#allocation4 + $0x70] sm:$0xff]  ;;  %v2715_v47 = vld [vmem:[%s3600_s7] ss:$0 sm:$0xff] }
 0x2c8   : > { %v2731_v3 = vpop.eup %2730  ;;  %2742 = vrcp.f32 %v2020_v42  ;;  %2598 = vmatpush.bf16.msra.mxu2 %v1885_v58  ;;  %2074 = vmatpush.bf16.msra.mxu3 %v2065_v35 }
 0x2c9   : > { %v2733_v54 = vpop.eup %2732  ;;  %2744 = vrcp.f32 %v2109_v2  ;;  %v1938_v2 = vld [vmem:[#allocation4 + $0x30] sm:$0xff] }
 0x2ca   : > { %1866 = vperm.xlu0 %2712, %v2723_v6   ;;  %v2735_v7 = vpop.eup %2734  ;;  %2746 = vrcp.f32 %v2110_v1  ;;  %2522 = vmatmul.msk.bf16.vlgmr.msra.gmra.mxu0 %vm1795_vm8, %v2594_v61 }
 0x2cb   : > { %1856 = vperm.xlu1 %2713, %v2725_v29   ;;  %v2737_v44 = vpop.eup %2736  ;;  %2164 = vmatpush.bf16.msrb.mxu1 %v2155_v19 }
 0x2cc   : > { %1947 = vperm.xlu2 %2714, %v2727_v10   ;;  %v2739_v22 = vpop.eup %2738  ;;  %1984 = vmatpush.bf16.msrb.mxu2 %v1975_v8  ;;  %v1936_v10 = vld [vmem:[#allocation4 + $0x20] sm:$0xff] }
 0x2cd   : > { %v2741_v16 = vpop.eup %2740 }
 0x2ce   : > { %v2743_v40 = vpop.eup %2742 }
 0x2cf   : > { %v2745_v36 = vpop.eup %2744 }
 0x2d0   : > { %v2747_v18 = vpop.eup %2746 }
 0x2d2   : > { %2032 = vperm.xlu0 %2712, %v2729_v38  }
 0x2d3   : > { %2037 = vperm.xlu1 %2713, %v2731_v3  }
 0x2d4   : > { %2122 = vperm.xlu2 %2714, %v2733_v54  }
 0x2da   : > { %2127 = vperm.xlu0 %2712, %v2735_v7   ;;  %2523 = vmatmul.msk.bf16.gmra.mxu0 %vm1795_vm8, %v2595_v43 }
 0x2db   : > { %1952 = vperm.xlu1 %2713, %v2737_v44  }
 0x2dc   : > { %1957 = vperm.xlu2 %2714, %v2739_v22   ;;  %v1939_v22 = vld [vmem:[#allocation4 + $0x38] sm:$0xff] }
 0x2e2   : > { %2042 = vperm.xlu0 %2712, %v2741_v16   ;;  %v2119_v16 = vld [vmem:[#allocation4 + $0x78] sm:$0xff] }
 0x2e3   : > { %2047 = vperm.xlu1 %2713, %v2743_v40  }
 0x2e4   : > { %2132 = vperm.xlu2 %2714, %v2745_v36  }
 0x2ea   : > { %2137 = vperm.xlu0 %2712, %v2747_v18  }
 0x31e   : > { %v1943_v49 = vpop.permute.xlu2 %1942 }
 0x31f   : > { %v1960_v32 = vmul.f32 %v1943_v49, %v1936_v10 }
 0x326   : > { %v1948_v28 = vpop.permute.xlu2 %1947 }
 0x327   : > { %v1961_v37 = vmul.f32 %v1948_v28, %v1937_v14 }
 0x329   : > { %v1964_v3 = vpack.c.bf16 %v1961_v37, %v1960_v32 }
 0x32e   : > { %v2123_v26 = vpop.permute.xlu2 %2122 }
 0x32f   : > { %v2140_v33 = vmul.f32 %v2123_v26, %v2116_v31 }
 0x334   : > { %v1862_v23 = vpop.permute.xlu0 %1861 }
 0x335   : > { %v1852_v34 = vpop.permute.xlu1 %1851  ;;  %v1871_v60 = vmul.f32 %v1862_v23, %v1847_v0 }
 0x336   : > { %v1869_v27 = vmul.f32 %v1852_v34, %v1845_v30  ;;  %v1958_v55 = vpop.permute.xlu2 %1957 }
 0x337   : > { %v1963_v18 = vmul.f32 %v1958_v55, %v1939_v22 }
 0x33c   : > { %v1867_v39 = vpop.permute.xlu0 %1866 }
 0x33d   : > { %v1872_v63 = vmul.f32 %v1867_v39, %v1848_v13  ;;  %v1857_v46 = vpop.permute.xlu1 %1856 }
 0x33e   : > { %v1870_v4 = vmul.f32 %v1857_v46, %v1846_v12  ;;  %v2133_v1 = vpop.permute.xlu2 %2132 }
 0x33f   : > { %v1874_v24 = vpack.c.bf16 %v1872_v63, %v1871_v60  ;;  %v2142_v48 = vmul.f32 %v2133_v1, %v2118_v62 }
 0x340   : > { %v1873_v52 = vpack.c.bf16 %v1870_v4, %v1869_v27 }
 0x341   : > { %2529 = vmatmul.msk.bf16.vlgmr.msra.gmra.mxu2 %vm565_vm1, %v1874_v24 }
 0x342   : > { %2528 = vmatmul.msk.bf16.vlgmr.msra.gmra.mxu1 %vm565_vm1, %v1873_v52 }
 0x344   : > { %v2033_v11 = vpop.permute.xlu0 %2032 }
 0x345   : > { %v2050_v45 = vmul.f32 %v2033_v11, %v2026_v25  ;;  %v2038_v6 = vpop.permute.xlu1 %2037 }
 0x346   : > { %v2051_v29 = vmul.f32 %v2038_v6, %v2027_v57 }
 0x347   : > { %v1811_v8 = vpop.f32.mrf.mxu0 }
 0x348   : > { %v2054_v53 = vpack.c.bf16 %v2051_v29, %v2050_v45  ;;  %v1812_v15 = vadd.f32 %v2715_v47, %v1811_v8 }
 0x34a   : > { %2542 = vmatmul.msk.bf16.vlgmr.msra.gmra.mxu3 %vm565_vm1, %v2054_v53 }
 0x34c   : > { %v2128_v50 = vpop.permute.xlu0 %2127 }
 0x34d   : > { %v2141_v38 = vmul.f32 %v2128_v50, %v2117_v17  ;;  %v1953_v21 = vpop.permute.xlu1 %1952 }
 0x34e   : > { %v1962_v40 = vmul.f32 %v1953_v21, %v1938_v2 }
 0x34f   : > { %v2144_v54 = vpack.c.bf16 %v2141_v38, %v2140_v33  ;;  %v1813_v19 = vpop.f32.mrf.mxu0 }
 0x350   : > { %v1965_v61 = vpack.c.bf16 %v1963_v18, %v1962_v40  ;;  %v1814_v13 = vadd.f32 %v2715_v47, %v1813_v19 }
 0x351   : > { %2535 = vmatmul.msk.bf16.vlgmr.msrb.gmra.mxu2 %vm565_vm1, %v1964_v3 }
 0x352   : > { %2549 = vmatmul.msk.bf16.vlgmr.msrb.gmra.mxu1 %vm565_vm1, %v2144_v54 }
 0x354   : > { %v2043_v41 = vpop.permute.xlu0 %2042 }
 0x355   : > { %v2052_v56 = vmul.f32 %v2043_v41, %v2028_v51  ;;  %v2048_v42 = vpop.permute.xlu1 %2047 }
 0x356   : > { %v2053_v7 = vmul.f32 %v2048_v42, %v2029_v20 }
 0x357   : > { %v1816_v28 = vpop.f32.mrf.mxu0 }
 0x358   : > { %v2055_v44 = vpack.c.bf16 %v2053_v7, %v2052_v56  ;;  %v1817_v24 = vadd.f32 %v2715_v47, %v1816_v28 }
 0x35a   : > { %2543 = vmatmul.msk.bf16.gmra.mxu3 %vm565_vm1, %v2055_v44 }
 0x35c   : > { %v2138_v36 = vpop.permute.xlu0 %2137 }
 0x35d   : > { %v2143_v9 = vmul.f32 %v2138_v36, %v2119_v16 }
 0x35f   : > { %v2145_v59 = vpack.c.bf16 %v2143_v9, %v2142_v48  ;;  %v1818_v11 = vpop.f32.mrf.mxu0 }
 0x360   : > { %v1819_v10 = vadd.f32 %v2715_v47, %v1818_v11 }
 0x361   : > { %2536 = vmatmul.msk.bf16.gmra.mxu2 %vm565_vm1, %v1965_v61 }
 0x362   : > { %2550 = vmatmul.msk.bf16.gmra.mxu1 %vm565_vm1, %v2145_v59 }
 0x3bf   : > { %v1896_v58 = vpop.f32.mrf.mxu1 }
 0x3c0   : > { %v1906_v34 = vadd.f32 %v1896_v58, %v1812_v15 }
 0x3c4   : > { %v1901_v5 = vpop.f32.mrf.mxu2 }
 0x3c5   : > { %v1908_v57 = vadd.f32 %v1901_v5, %v1817_v24 }
 0x3c7   : > { %v1898_v43 = vpop.f32.mrf.mxu1 }
 0x3c8   : > { %v1907_v60 = vadd.f32 %v1898_v43, %v1814_v13 }
 0x3cc   : > { %v1903_v35 = vpop.f32.mrf.mxu2 }
 0x3cd   : > { %v2076_v49 = vpop.f32.mrf.mxu3  ;;  %v1909_v31 = vadd.f32 %v1903_v35, %v1819_v10 }
 0x3cf   : > { %v2166_v23 = vpop.f32.mrf.mxu1 }
 0x3d4   : > { %v1986_v30 = vpop.f32.mrf.mxu2 }
 0x3d5   : > { %v1996_v0 = vadd.f32 %v1986_v30, %v1906_v34  ;;  %v2078_v39 = vpop.f32.mrf.mxu3 }
 0x3d7   : > { %v2086_v12 = vadd.f32 %v2076_v49, %v1996_v0  ;;  %v2168_v63 = vpop.f32.mrf.mxu1 }
 0x3d9   : > { %v2176_v27 = vadd.f32 %v2166_v23, %v2086_v12 }
 0x3db   : > { %2180 = vst.msk [vmem:[%s2933_s15] sm:$0xff] %vm1795_vm8, %v2176_v27 }
 0x3dc   : > { %v1988_v46 = vpop.f32.mrf.mxu2 }
 0x3dd   : > { %v1997_v4 = vadd.f32 %v1988_v46, %v1907_v60  ;;  %v2081_v45 = vpop.f32.mrf.mxu3 }
 0x3df   : > { %v2087_v52 = vadd.f32 %v2078_v39, %v1997_v4  ;;  %v2171_v29 = vpop.f32.mrf.mxu1 }
 0x3e1   : > { %v2177_v25 = vadd.f32 %v2168_v63, %v2087_v52 }
 0x3e3   : > { %2181 = vst.msk [vmem:[%s2933_s15 + $0x8] sm:$0xff] %vm1795_vm8, %v2177_v25 }
 0x3e4   : > { %v1991_v6 = vpop.f32.mrf.mxu2 }
 0x3e5   : > { %v1998_v26 = vadd.f32 %v1991_v6, %v1908_v57  ;;  %v2083_v37 = vpop.f32.mrf.mxu3 }
 0x3e7   : > { %v2088_v14 = vadd.f32 %v2081_v45, %v1998_v26  ;;  %v2173_v33 = vpop.f32.mrf.mxu1 }
 0x3e9   : > { %v2178_v53 = vadd.f32 %v2171_v29, %v2088_v14 }
 0x3eb   : > { %2182 = vst.msk [vmem:[%s2933_s15 + $0x10] sm:$0xff] %vm1795_vm8, %v2178_v53 }
 0x3ec   : > { %v1993_v17 = vpop.f32.mrf.mxu2 }
 0x3ed   : > { %v1999_v32 = vadd.f32 %v1993_v17, %v1909_v31 }
 0x3ef   : > { %v2089_v50 = vadd.f32 %v2083_v37, %v1999_v32 }
 0x3f1   : > { %v2179_v38 = vadd.f32 %v2173_v33, %v2089_v50 }
 0x3f3   : > { %2183 = vst.msk [vmem:[%s2933_s15 + $0x18] sm:$0xff] %vm1795_vm8, %v2179_v38 }
 0x3f4 PF: > { %s27_s17 = sadd.s32 1, %s2800_s17   ;;  %s3603_s13 = smov %s2788_s14 }
 0x3f5   : > { %p24_p12 = scmp.ge.s32.totalorder %s27_s17, 4   ;;  %s3604_s14 = smov %s2896_s20 }
 0x3f6   : > { %s3605_s15 = smov %s2796_s16  ;;  %s3606_s16 = smov %s3608_s0 }
 0x3f7   :  { %26 = sbr.rel (!%p24_p12) target bundleno = 9 (0x9), region = 161 }

// kernel: tpu_custom_call.1
= control target key start
LH: loop header
LB: loop body
LE: loop exit
PB: predicated region body
PF: predicated region fallthrough
CT: control target
= control target key end

     0   :  { %s2802_s12 = smov [#allocation6]   ;;  %s3593_s0 = inlined_call_operand.vmem [shape: s32[2,1], index: 0, kind: input, shape index: {}]   ;;  %s3594_s1 = inlined_call_operand.vmem [shape: bf16[4,64,8], index: 1, kind: input, shape index: {}]   ;;  %s3595_s2 = inlined_call_operand.vmem [shape: bf16[4,64,8], index: 2, kind: input, shape index: {}]   ;;  %s3596_s3 = inlined_call_operand.vmem [shape: bf16[4,64,8], index: 3, kind: input, shape index: {}]   ;;  %s3597_s4 = inlined_call_operand.vmem [shape: s8[64,64], index: 4, kind: input, shape index: {}]   ;;  %s3598_s5 = inlined_call_operand.vmem [shape: bf16[64,32], index: 5, kind: input, shape index: {}]   ;;  %s3599_s6 = inlined_call_operand.vmem [shape: bf16[32,32], index: 6, kind: input, shape index: {}]   ;;  %s3600_s7 = inlined_call_operand.vmem [shape: f32[1,32], index: 7, kind: input, shape index: {}]   ;;  %s3601_s8 = inlined_call_operand.vmem [shape: bf16[4,8,32], index: 8, kind: input, shape index: {}]   ;;  %s3602_s9 = inlined_call_operand.vmem [shape: f32[64,32], index: 9, kind: output, shape index: {}]  }
   0x1   :  { %s15_s11 = sshll.u32 %s3593_s0, 4  ;;  %s16_s11 = int_to_ptr.vmem [resolvable:$true] %s15_s11 }
   0x2   :  { %18 = dma.vmem_to_smem %s16_s11, 32, %s2802_s12, [#allocation5] }
   0x3   :  { %2780 = dma.done.wait [#allocation5], 32 }
   0x4   :  { %2781 = vsyncadd [#allocation5], 4294967264 }
   0x5   :  { %21 = sfence }
   0x6   :  { %s2861_s13 = smov 0   ;;  %s2863_s14 = smov 0  }
   0x7   :  { %s2865_s15 = smov 0   ;;  %s2867_s16 = smov 0  }
   0x8   :  { %s2869_s17 = smov 0  }
   0x9 LB: > { %s39_s0 = sadd.s32 1, %s2796_s16  ;;  %p53_p1 = scmp.ne.s32.totalorder %s2788_s14, %s2784_s13  ;;  %s2800_s17 = sphi %s2869_s17, %s27_s17   ;;  %s2796_s16 = sphi %s2867_s16, %s3606_s16   ;;  %s2792_s15 = sphi %s2865_s15, %s3605_s15   ;;  %s2788_s14 = sphi %s2863_s14, %s3604_s14   ;;  %s2784_s13 = sphi %s2861_s13, %s3603_s13  }
   0xa   : > { %p41_p0 = scmp.ge.s32.totalorder %s39_s0, 2  ;;  %p54_p2 = scmp.eq.s32.totalorder %s2800_s17, 0 }
   0xb   : > { %s46_s19 = sadd.s32 1, %s2788_s14  ;;  %p2317_p5 = scmp.ge.s32.totalorder %s2800_s17, 2 }
   0xc   : > { %s3608_s0 = smov (%p41_p0, %s39_s0), 0  ;;  %p55_p3 = por %p54_p2, %p53_p1 }
   0xd   : > { %s43_s18 = ssub.s32 %s2796_s16, %s3608_s0  ;;  %301 = sbr.rel (%p2317_p5) target bundleno = 30 (0x1e), region = 36 }
   0xe   : > { %p44_p4 = scmp.eq.s32.totalorder %s43_s18, 0 }
  0x10   : > { %s2896_s20 = scalar_select %p44_p4, %s2788_s14, %s46_s19  }
  0x12   : > { %304 = sbr.rel (!%p55_p3) target bundleno = 30 (0x1e), region = 40  ;;  %s306_s21 = sand.u32 (%p55_p3), 1, %s2788_s14  }
  0x13   : > { %s2553_s22 = sshll.u32 (%p55_p3), %s2796_s16, 4  ;;  %s2318_s23 = sshll.u32 (%p55_p3), %s306_s21, 6 }
  0x14   : > { %s311_s26 = scalar_lea.vmem (%p55_p3), %s3594_s1, %s2553_s22  ;;  %s308_s27 = scalar_lea.vmem (%p55_p3), [#allocation7], %s2318_s23 }
  0x15   : > { %v328_v0 = vld [vmem:[%s311_s26] sm:$0xff] (%p55_p3)   ;;  %v332_v1 = vld [vmem:[%s311_s26 + $0x8] sm:$0xff] (%p55_p3)  }
  0x16   : > { %v336_v2 = vld [vmem:[%s311_s26 + $0x20] sm:$0xff] (%p55_p3)   ;;  %329 = vst [vmem:[%s308_s27] sm:$0xff] (%p55_p3), %v328_v0   ;;  %v340_v3 = vld [vmem:[%s311_s26 + $0x28] sm:$0xff] (%p55_p3)  }
  0x17   : > { %333 = vst [vmem:[%s308_s27 + $0x8] sm:$0xff] %v332_v1   ;;  %v344_v4 = vld [vmem:[%s311_s26 + $0x40] sm:$0xff]   ;;  %v348_v5 = vld [vmem:[%s311_s26 + $0x48] sm:$0xff]  }
  0x18   : > { %337 = vst [vmem:[%s308_s27 + $0x10] sm:$0xff] %v336_v2   ;;  %v352_v6 = vld [vmem:[%s311_s26 + $0x60] sm:$0xff]   ;;  %v356_v7 = vld [vmem:[%s311_s26 + $0x68] sm:$0xff]  }
  0x19   : > { %341 = vst [vmem:[%s308_s27 + $0x18] sm:$0xff] %v340_v3  }
  0x1a   : > { %345 = vst [vmem:[%s308_s27 + $0x20] sm:$0xff] %v344_v4  }
  0x1b   : > { %349 = vst [vmem:[%s308_s27 + $0x28] sm:$0xff] %v348_v5  }
  0x1c   : > { %353 = vst [vmem:[%s308_s27 + $0x30] sm:$0xff] %v352_v6  }
  0x1d   : > { %357 = vst [vmem:[%s308_s27 + $0x38] sm:$0xff] %v356_v7  }
  0x1e PF: > { %p2321_p6 = scmp.ge.s32.totalorder %s2800_s17, 1  ;;  %p433_p7 = scmp.lt.s32.totalorder %s2800_s17, 3 }
  0x20   : > { %p434_p8 = pnand %p2321_p6, %p433_p7 }
  0x21   : > { %s440_s28 = sand.u32 (!%p434_p8), 1, %s2784_s13   ;;  %p508_p9 = scmp.lt.s32.totalorder (!%p434_p8), %s2792_s15, 1 }
  0x22   : > { %437 = sbr.rel (%p434_p8) target bundleno = 1012 (0x3f4), region = 89  ;;  %s2908_s29 = sshll.u32 (!%p434_p8), %s440_s28, 6 }
  0x23   : > { %s2324_s30 = sshll.u32 (!%p434_p8), %s2792_s15, 2  ;;  %s2328_s12 = sshll.u32 (!%p434_p8), %s2792_s15, 7 }
  0x24   : > { %p516_p10 = scmp.lt.s32.totalorder (!%p434_p8), %s2324_s30, 7  ;;  %s2936_s28 = sld [smem:[#allocation6 + %s2328_s12]] (!%p434_p8) }
  0x27   : > { %vm532_vm0 = vcmask 7168   ;;  %v2803_v8 = vmov -1e+09   ;;  %s509_s10 = scalar_select %p508_p9, %s2792_s15, 1  ;;  %v2804_v9 = vmov 0.0   ;;  %vm565_vm1 = vcmask 64512  }
  0x28   : > { %533 = vst.msk [vmem:[#allocation2] sm:$0xff] %vm532_vm0, %v2803_v8  ;;  %s3610_s30 = smov (!%p516_p10, %s2324_s30), 7 }
  0x29   : > { %534 = vst.msk [vmem:[#allocation2 + $0x8] sm:$0xff] %vm532_vm0, %v2803_v8  ;;  %s2323_s11 = sshll.u32 %s509_s10, 3  ;;  %s2325_s21 = sshll.u32 %s3610_s30, 2 }
  0x2a   : > { %535 = vst.msk [vmem:[#allocation2 + $0x10] sm:$0xff] %vm532_vm0, %v2803_v8  ;;  %s2921_s19 = scalar_lea.vmem %s3597_s4, %s2323_s11  ;;  %s2927_s24 = scalar_lea.vmem %s3598_s5, %s2325_s21 }
  0x2b   : > { %536 = vst.msk [vmem:[#allocation2 + $0x18] sm:$0xff] %vm532_vm0, %v2803_v8  ;;  %s2327_s25 = sshll.u32 %s3610_s30, 3  ;;  %s3011_s30 = scalar_lea.vmem [#allocation7], %s2908_s29 }
  0x2c   : > { %537 = vst.msk [vmem:[#allocation2 + $0x20] sm:$0xff] %vm532_vm0, %v2803_v8  ;;  %s2933_s15 = scalar_lea.vmem %s3602_s9, %s2327_s25  ;;  %p2329_p11 = scmp.le.s32.totalorder %s2936_s28, 0 }
  0x2d   : > { %538 = vst.msk [vmem:[#allocation2 + $0x28] sm:$0xff] %vm532_vm0, %v2803_v8 }
  0x2e   : > { %539 = vst.msk [vmem:[#allocation2 + $0x30] sm:$0xff] %vm532_vm0, %v2803_v8 }
  0x2f   : > { %540 = vst.msk [vmem:[#allocation2 + $0x38] sm:$0xff] %vm532_vm0, %v2803_v8 }
  0x30   : > { %541 = vst.msk [vmem:[#allocation2 + $0x40] sm:$0xff] %vm532_vm0, %v2803_v8 }
  0x31   : > { %542 = vst.msk [vmem:[#allocation2 + $0x48] sm:$0xff] %vm532_vm0, %v2803_v8 }
  0x32   : > { %543 = vst.msk [vmem:[#allocation2 + $0x50] sm:$0xff] %vm532_vm0, %v2803_v8 }
  0x33   : > { %544 = vst.msk [vmem:[#allocation2 + $0x58] sm:$0xff] %vm532_vm0, %v2803_v8 }
  0x34   : > { %545 = vst.msk [vmem:[#allocation2 + $0x60] sm:$0xff] %vm532_vm0, %v2803_v8 }
  0x35   : > { %546 = vst.msk [vmem:[#allocation2 + $0x68] sm:$0xff] %vm532_vm0, %v2803_v8 }
  0x36   : > { %547 = vst.msk [vmem:[#allocation2 + $0x70] sm:$0xff] %vm532_vm0, %v2803_v8 }
  0x37   : > { %548 = vst.msk [vmem:[#allocation2 + $0x78] sm:$0xff] %vm532_vm0, %v2803_v8 }
  0x38   : > { %549 = vst.msk [vmem:[#allocation3] sm:$0xff] %vm532_vm0, %v2804_v9 }
  0x39   : > { %550 = vst.msk [vmem:[#allocation3 + $0x8] sm:$0xff] %vm532_vm0, %v2804_v9 }
  0x3a   : > { %551 = vst.msk [vmem:[#allocation3 + $0x10] sm:$0xff] %vm532_vm0, %v2804_v9 }
  0x3b   : > { %552 = vst.msk [vmem:[#allocation3 + $0x18] sm:$0xff] %vm532_vm0, %v2804_v9 }
  0x3c   : > { %553 = vst.msk [vmem:[#allocation3 + $0x20] sm:$0xff] %vm532_vm0, %v2804_v9 }
  0x3d   : > { %554 = vst.msk [vmem:[#allocation3 + $0x28] sm:$0xff] %vm532_vm0, %v2804_v9 }
  0x3e   : > { %555 = vst.msk [vmem:[#allocation3 + $0x30] sm:$0xff] %vm532_vm0, %v2804_v9 }
  0x3f   : > { %556 = vst.msk [vmem:[#allocation3 + $0x38] sm:$0xff] %vm532_vm0, %v2804_v9 }
  0x40   : > { %557 = vst.msk [vmem:[#allocation3 + $0x40] sm:$0xff] %vm532_vm0, %v2804_v9 }
  0x41   : > { %558 = vst.msk [vmem:[#allocation3 + $0x48] sm:$0xff] %vm532_vm0, %v2804_v9 }
  0x42   : > { %559 = vst.msk [vmem:[#allocation3 + $0x50] sm:$0xff] %vm532_vm0, %v2804_v9 }
  0x43   : > { %560 = vst.msk [vmem:[#allocation3 + $0x58] sm:$0xff] %vm532_vm0, %v2804_v9 }
  0x44   : > { %561 = vst.msk [vmem:[#allocation3 + $0x60] sm:$0xff] %vm532_vm0, %v2804_v9 }
  0x45   : > { %562 = vst.msk [vmem:[#allocation3 + $0x68] sm:$0xff] %vm532_vm0, %v2804_v9 }
  0x46   : > { %563 = vst.msk [vmem:[#allocation3 + $0x70] sm:$0xff] %vm532_vm0, %v2804_v9 }
  0x47   : > { %564 = vst.msk [vmem:[#allocation3 + $0x78] sm:$0xff] %vm532_vm0, %v2804_v9 }
  0x48   : > { %566 = vst.msk [vmem:[#allocation4] sm:$0xff] %vm565_vm1, %v2804_v9 }
  0x49   : > { %567 = vst.msk [vmem:[#allocation4 + $0x8] sm:$0xff] %vm565_vm1, %v2804_v9 }
  0x4a   : > { %568 = vst.msk [vmem:[#allocation4 + $0x10] sm:$0xff] %vm565_vm1, %v2804_v9 }
  0x4b   : > { %569 = vst.msk [vmem:[#allocation4 + $0x18] sm:$0xff] %vm565_vm1, %v2804_v9 }
  0x4c   : > { %570 = vst.msk [vmem:[#allocation4 + $0x20] sm:$0xff] %vm565_vm1, %v2804_v9 }
  0x4d   : > { %571 = vst.msk [vmem:[#allocation4 + $0x28] sm:$0xff] %vm565_vm1, %v2804_v9 }
  0x4e   : > { %572 = vst.msk [vmem:[#allocation4 + $0x30] sm:$0xff] %vm565_vm1, %v2804_v9 }
  0x4f   : > { %573 = vst.msk [vmem:[#allocation4 + $0x38] sm:$0xff] %vm565_vm1, %v2804_v9 }
  0x50   : > { %574 = vst.msk [vmem:[#allocation4 + $0x40] sm:$0xff] %vm565_vm1, %v2804_v9 }
  0x51   : > { %575 = vst.msk [vmem:[#allocation4 + $0x48] sm:$0xff] %vm565_vm1, %v2804_v9 }
  0x52   : > { %576 = vst.msk [vmem:[#allocation4 + $0x50] sm:$0xff] %vm565_vm1, %v2804_v9 }
  0x53   : > { %577 = vst.msk [vmem:[#allocation4 + $0x58] sm:$0xff] %vm565_vm1, %v2804_v9  ;;  %593 = sbr.rel (%p2329_p11) target bundleno = 694 (0x2b6), region = 101 }
  0x54   : > { %578 = vst.msk [vmem:[#allocation4 + $0x60] sm:$0xff] %vm565_vm1, %v2804_v9 }
  0x55   : > { %579 = vst.msk [vmem:[#allocation4 + $0x68] sm:$0xff] %vm565_vm1, %v2804_v9 }
  0x56   : > { %580 = vst.msk [vmem:[#allocation4 + $0x70] sm:$0xff] %vm565_vm1, %v2804_v9 }
  0x57   : > { %581 = vst.msk [vmem:[#allocation4 + $0x78] sm:$0xff] %vm565_vm1, %v2804_v9 }
  0x58   : > { %v2565_v10 = vld [vmem:[%s3595_s2 + $0x18] sm:$0xff]  ;;  %v2564_v18 = vld [vmem:[%s3595_s2 + $0x10] sm:$0xff]  ;;  %v2563_v26 = vld [vmem:[%s3595_s2 + $0x8] sm:$0xff]  ;;  %v2805_v53 = vmov -1e+09   ;;  %vm944_vm3 = vcmask 523264  }
  0x59   : > { %v2569_v11 = vld [vmem:[%s3595_s2 + $0x38] sm:$0xff]  ;;  %v706_v14 = vsel %vm565_vm1, %v2565_v10, 0  ;;  %v2568_v19 = vld [vmem:[%s3595_s2 + $0x30] sm:$0xff]  ;;  %v703_v22 = vsel %vm565_vm1, %v2564_v18, 0  ;;  %v2567_v27 = vld [vmem:[%s3595_s2 + $0x28] sm:$0xff]  ;;  %v700_v30 = vsel %vm565_vm1, %v2563_v26, 0 }
  0x5a   : > { %v2577_v12 = vld [vmem:[%s3595_s2 + $0x78] sm:$0xff]  ;;  %v773_v15 = vsel %vm565_vm1, %v2569_v11, 0  ;;  %712 = vmatpush.bf16.xpose.msra.mxu0 %v706_v14  ;;  %v2576_v20 = vld [vmem:[%s3595_s2 + $0x70] sm:$0xff]  ;;  %v770_v23 = vsel %vm565_vm1, %v2568_v19, 0  ;;  %v2575_v28 = vld [vmem:[%s3595_s2 + $0x68] sm:$0xff]  ;;  %v767_v31 = vsel %vm565_vm1, %v2567_v27, 0 }
  0x5b   : > { %v2573_v13 = vld [vmem:[%s3595_s2 + $0x58] sm:$0xff]  ;;  %v907_v16 = vsel %vm565_vm1, %v2577_v12, 0  ;;  %779 = vmatpush.bf16.xpose.msra.mxu1 %v773_v15  ;;  %v2572_v21 = vld [vmem:[%s3595_s2 + $0x50] sm:$0xff]  ;;  %v904_v24 = vsel %vm565_vm1, %v2576_v20, 0  ;;  %v2571_v29 = vld [vmem:[%s3595_s2 + $0x48] sm:$0xff]  ;;  %v901_v32 = vsel %vm565_vm1, %v2575_v28, 0 }
  0x5c   : > { %v840_v17 = vsel %vm565_vm1, %v2573_v13, 0  ;;  %913 = vmatpush.bf16.xpose.msra.mxu3 %v907_v16  ;;  %v837_v25 = vsel %vm565_vm1, %v2572_v21, 0  ;;  %v834_v33 = vsel %vm565_vm1, %v2571_v29, 0  ;;  %v2562_v34 = vld [vmem:[%s3595_s2] sm:$0xff]  ;;  %v2556_v43 = vld [vmem:[%s3011_s30 + $0x10] sm:$0xff]  ;;  %v2555_v46 = vld [vmem:[%s3011_s30 + $0x8] sm:$0xff] }
  0x5d   : > { %846 = vmatpush.bf16.xpose.msra.mxu2 %v840_v17  ;;  %v2566_v35 = vld [vmem:[%s3595_s2 + $0x20] sm:$0xff]  ;;  %v697_v38 = vsel %vm565_vm1, %v2562_v34, 0  ;;  %v2560_v44 = vld [vmem:[%s3011_s30 + $0x30] sm:$0xff]  ;;  %v2557_v47 = vld [vmem:[%s3011_s30 + $0x18] sm:$0xff] }
  0x5e   : > { %v2574_v36 = vld [vmem:[%s3595_s2 + $0x60] sm:$0xff]  ;;  %v764_v39 = vsel %vm565_vm1, %v2566_v35, 0  ;;  %v2559_v48 = vld [vmem:[%s3011_s30 + $0x28] sm:$0xff]  ;;  %v2561_v49 = vld [vmem:[%s3011_s30 + $0x38] sm:$0xff] }
  0x5f   : > { %v2570_v37 = vld [vmem:[%s3595_s2 + $0x40] sm:$0xff]  ;;  %v898_v40 = vsel %vm565_vm1, %v2574_v36, 0 }
  0x60   : > { %v831_v41 = vsel %vm565_vm1, %v2570_v37, 0  ;;  %v2554_v42 = vld [vmem:[%s3011_s30] sm:$0xff] }
  0x61   : > { %v2558_v45 = vld [vmem:[%s3011_s30 + $0x20] sm:$0xff] }
  0x62   : > { %713 = vmatpush.bf16.xpose.msra.mxu0 %v703_v22  ;;  %v594_v50 = vld [vmem:[%s2921_s19] sm:$0xff] }
  0x63   : > { %780 = vmatpush.bf16.xpose.msra.mxu1 %v770_v23  ;;  %v595_v51 = vunpack.c.0.s8 %v594_v50  ;;  %v596_v59 = vunpack.c.1.s8 %v594_v50  ;;  %v597_v63 = vunpack.c.2.s8 %v594_v50  ;;  %v598_v22 = vunpack.c.3.s8 %v594_v50  ;;  %v3171_v50 = vld [vmem:[#allocation2 + $0x20] sm:$0xff] }
  0x64   : > { %914 = vmatpush.bf16.xpose.msra.mxu3 %v904_v24 }
  0x65   : > { %847 = vmatpush.bf16.xpose.msra.mxu2 %v837_v25  ;;  %v3095_v52 = vcvt.s32.f32 %v595_v51  ;;  %v3106_v62 = vcvt.s32.f32 %v596_v59  ;;  %v3117_v8 = vcvt.s32.f32 %v597_v63  ;;  %v3138_v27 = vcvt.s32.f32 %v598_v22  ;;  %v3173_v51 = vld [vmem:[#allocation2] sm:$0xff]  ;;  %v3227_v22 = vld [vmem:[#allocation2 + $0x70] sm:$0xff] }
  0x66   : > { %v3186_v59 = vld [vmem:[#allocation2 + $0x40] sm:$0xff] }
  0x67   : > { %vm603_vm2 = vcmp.gt.f32.partialorder %v3095_v52, 0.0  ;;  %vm604_vm4 = vcmp.gt.f32.partialorder %v3106_v62, 0.0  ;;  %vm605_vm5 = vcmp.gt.f32.partialorder %v3117_v8, 0.0  ;;  %vm606_vm6 = vcmp.gt.f32.partialorder %v3138_v27, 0.0 }
  0x68   : > { %v607_v54 = vsel %vm603_vm2, 0.0, %v2805_v53  ;;  %v608_v10 = vsel %vm604_vm4, 0.0, %v2805_v53  ;;  %v609_v17 = vsel %vm605_vm5, 0.0, %v2805_v53  ;;  %v610_v34 = vsel %vm606_vm6, 0.0, %v2805_v53 }
  0x6a   : > { %714 = vmatpush.bf16.xpose.msra.mxu0 %v700_v30 }
  0x6b   : > { %781 = vmatpush.bf16.xpose.msra.mxu1 %v767_v31 }
  0x6c   : > { %915 = vmatpush.bf16.xpose.msra.mxu3 %v901_v32 }
  0x6d   : > { %848 = vmatpush.bf16.xpose.msra.mxu2 %v834_v33 }
  0x72   : > { %715 = vmatpush.bf16.xpose.msra.mxu0 %v697_v38 }
  0x73   : > { %782 = vmatpush.bf16.xpose.msra.mxu1 %v764_v39 }
  0x74   : > { %916 = vmatpush.bf16.xpose.msra.mxu3 %v898_v40 }
  0x75   : > { %849 = vmatpush.bf16.xpose.msra.mxu2 %v831_v41 }
  0x79   : > { %2354 = vmatmul.msk.bf16.vlgmr.msra.gmra.mxu0 %vm565_vm1, %v2554_v42 }
  0x7a   : > { %2380 = vmatmul.msk.bf16.vlgmr.msra.gmra.mxu1 %vm565_vm1, %v2556_v43 }
  0x7b   : > { %2432 = vmatmul.msk.bf16.vlgmr.msra.gmra.mxu3 %vm565_vm1, %v2560_v44 }
  0x7c   : > { %2406 = vmatmul.msk.bf16.vlgmr.msra.gmra.mxu2 %vm565_vm1, %v2558_v45 }
  0x89   : > { %2355 = vmatmul.msk.bf16.gmra.mxu0 %vm565_vm1, %v2555_v46 }
  0x8a   : > { %2381 = vmatmul.msk.bf16.gmra.mxu1 %vm565_vm1, %v2557_v47 }
  0x8b   : > { %2433 = vmatmul.msk.bf16.gmra.mxu3 %vm565_vm1, %v2561_v49  ;;  %v2806_v49 = vmov 0  }
  0x8c   : > { %2407 = vmatmul.msk.bf16.gmra.mxu2 %vm565_vm1, %v2559_v48  ;;  %2645 = vset.pattern.permute.xlu1 %v2806_v49 }
  0x8d   : > { %2646 = vset.pattern.permute.xlu2 %v2806_v49  ;;  %2647 = vset.pattern.permute.xlu0 %v2806_v49  ;;  %v931_v49 = vld [vmem:[#allocation2 + $0x18] sm:$0xff] }
  0xf6   : > { %v717_v55 = vpop.f32.mrf.mxu0 }
  0xf7   : > { %v784_v56 = vpop.f32.mrf.mxu1  ;;  %v3098_v57 = vadd.f32 %v717_v55, %v607_v54 }
  0xf8   : > { %v3100_v58 = vadd.f32 %v784_v56, %v607_v54 }
  0xf9   : > { %v945_v61 = vsel %vm944_vm3, %v3098_v57, -inf }
  0xfa   : > { %v957_v60 = vsel %vm944_vm3, %v3100_v58, -inf  ;;  %946 = vmax.xlane.f32.xlu0 %v945_v61 }
  0xfb   : > { %958 = vmax.xlane.f32.xlu2 %v957_v60  ;;  %v3188_v60 = vld [vmem:[#allocation2 + $0x60] sm:$0xff] }
  0xfe   : > { %v918_v0 = vpop.f32.mrf.mxu3  ;;  %v719_v4 = vpop.f32.mrf.mxu0 }
  0xff   : > { %v851_v1 = vpop.f32.mrf.mxu2  ;;  %v3108_v2 = vadd.f32 %v918_v0, %v607_v54  ;;  %v786_v7 = vpop.f32.mrf.mxu1  ;;  %v3122_v12 = vadd.f32 %v719_v4, %v608_v10  ;;  %v3202_v4 = vld [vmem:[#allocation2 + $0x68] sm:$0xff] }
 0x100   : > { %v3110_v3 = vadd.f32 %v851_v1, %v607_v54  ;;  %v3119_v11 = vadd.f32 %v786_v7, %v608_v10 }
 0x101   : > { %v981_v6 = vsel %vm944_vm3, %v3108_v2, -inf  ;;  %v948_v20 = vsel %vm944_vm3, %v3122_v12, -inf }
 0x102   : > { %v969_v5 = vsel %vm944_vm3, %v3110_v3, -inf  ;;  %982 = vmax.xlane.f32.xlu0 %v981_v6  ;;  %v960_v16 = vsel %vm944_vm3, %v3119_v11, -inf  ;;  %v3206_v6 = vld [vmem:[#allocation2 + $0x8] sm:$0xff] }
 0x103   : > { %970 = vmax.xlane.f32.xlu2 %v969_v5  ;;  %v3204_v5 = vld [vmem:[#allocation2 + $0x28] sm:$0xff] }
 0x106   : > { %v920_v13 = vpop.f32.mrf.mxu3  ;;  %v722_v18 = vpop.f32.mrf.mxu0 }
 0x107   : > { %v853_v14 = vpop.f32.mrf.mxu2  ;;  %v3124_v15 = vadd.f32 %v920_v13, %v608_v10  ;;  %v3132_v21 = vadd.f32 %v722_v18, %v609_v17  ;;  %v789_v29 = vpop.f32.mrf.mxu1 }
 0x108   : > { %v3134_v23 = vadd.f32 %v853_v14, %v608_v10  ;;  %v3149_v33 = vadd.f32 %v789_v29, %v609_v17 }
 0x109   : > { %v984_v19 = vsel %vm944_vm3, %v3124_v15, -inf  ;;  %v951_v26 = vsel %vm944_vm3, %v3132_v21, -inf }
 0x10a   : > { %985 = vmax.xlane.f32.xlu1 %v984_v19  ;;  %949 = vmax.xlane.f32.xlu0 %v948_v20  ;;  %v972_v31 = vsel %vm944_vm3, %v3134_v23, -inf  ;;  %v963_v38 = vsel %vm944_vm3, %v3149_v33, -inf  ;;  %v930_v19 = vld [vmem:[#allocation2 + $0x10] sm:$0xff]  ;;  %v937_v20 = vld [vmem:[#allocation2 + $0x48] sm:$0xff] }
 0x10b   : > { %961 = vmax.xlane.f32.xlu2 %v960_v16 }
 0x10e   : > { %v923_v25 = vpop.f32.mrf.mxu3  ;;  %v724_v41 = vpop.f32.mrf.mxu0 }
 0x10f   : > { %v856_v24 = vpop.f32.mrf.mxu2  ;;  %v3140_v28 = vadd.f32 %v923_v25, %v609_v17  ;;  %v3161_v43 = vadd.f32 %v724_v41, %v610_v34  ;;  %v791_v46 = vpop.f32.mrf.mxu1 }
 0x110   : > { %v3146_v32 = vadd.f32 %v856_v24, %v609_v17  ;;  %v3167_v47 = vadd.f32 %v791_v46, %v610_v34 }
 0x111   : > { %v987_v30 = vsel %vm944_vm3, %v3140_v28, -inf  ;;  %v954_v45 = vsel %vm944_vm3, %v3161_v43, -inf }
 0x112   : > { %952 = vmax.xlane.f32.xlu1 %v951_v26  ;;  %973 = vmax.xlane.f32.xlu0 %v972_v31  ;;  %v975_v36 = vsel %vm944_vm3, %v3146_v32, -inf  ;;  %v966_v48 = vsel %vm944_vm3, %v3167_v47, -inf }
 0x113   : > { %988 = vmax.xlane.f32.xlu2 %v987_v30 }
 0x116   : > { %v925_v39 = vpop.f32.mrf.mxu3 }
 0x117   : > { %v858_v35 = vpop.f32.mrf.mxu2  ;;  %v3159_v42 = vadd.f32 %v925_v39, %v610_v34 }
 0x118   : > { %v3153_v37 = vadd.f32 %v858_v35, %v610_v34  ;;  %v3240_v35 = vld [vmem:[#allocation2 + $0x50] sm:$0xff] }
 0x119   : > { %v990_v44 = vsel %vm944_vm3, %v3159_v42, -inf }
 0x11a   : > { %v978_v40 = vsel %vm944_vm3, %v3153_v37, -inf  ;;  %976 = vmax.xlane.f32.xlu1 %v975_v36  ;;  %964 = vmax.xlane.f32.xlu0 %v963_v38  ;;  %v934_v36 = vld [vmem:[#allocation2 + $0x30] sm:$0xff]  ;;  %v3242_v38 = vld [vmem:[#allocation2 + $0x58] sm:$0xff] }
 0x11b   : > { %979 = vmax.xlane.f32.xlu2 %v978_v40 }
 0x122   : > { %955 = vmax.xlane.f32.xlu1 %v954_v45  ;;  %991 = vmax.xlane.f32.xlu0 %v990_v44 }
 0x12a   : > { %967 = vmax.xlane.f32.xlu1 %v966_v48 }
 0x16d   : > { %v947_v54 = vpop.xlane.xlu0 %946 }
 0x16e   : > { %v959_v53 = vpop.xlane.xlu2 %958  ;;  %v3179_v56 = vmax.f32 %v3173_v51, %v947_v54 }
 0x16f   : > { %v3176_v55 = vmax.f32 %v3171_v50, %v959_v53  ;;  %v3254_v53 = vld [vmem:[#allocation2 + $0x78] sm:$0xff] }
 0x170   : > { %1059 = vperm.xlu1 %2645, %v3179_v56   ;;  %1742 = vst.msk [vmem:[#allocation2] sm:$0xff] %vm532_vm0, %v3179_v56  ;;  %v1009_v48 = vsub.f32 %v3173_v51, %v3179_v56 }
 0x171   : > { %1746 = vst.msk [vmem:[#allocation2 + $0x20] sm:$0xff] %vm532_vm0, %v3176_v55 }
 0x175   : > { %v983_v63 = vpop.xlane.xlu0 %982 }
 0x176   : > { %v971_v61 = vpop.xlane.xlu2 %970  ;;  %v3194_v1 = vmax.f32 %v3188_v60, %v983_v63 }
 0x177   : > { %v3191_v0 = vmax.f32 %v3186_v59, %v971_v61  ;;  %v1025_v61 = vmul.f32 1.442695, %v1009_v48 }
 0x178   : > { %1079 = vperm.xlu1 %2645, %v3176_v55   ;;  %1119 = vperm.xlu2 %2646, %v3194_v1   ;;  %1754 = vst.msk [vmem:[#allocation2 + $0x60] sm:$0xff] %vm532_vm0, %v3194_v1 }
 0x179   : > { %1750 = vst.msk [vmem:[#allocation2 + $0x40] sm:$0xff] %vm532_vm0, %v3191_v0  ;;  %2648 = vpow2.f32 %v1025_v61 }
 0x17d   : > { %v986_v7 = vpop.xlane.xlu1 %985  ;;  %v950_v14 = vpop.xlane.xlu0 %949 }
 0x17e   : > { %v3209_v10 = vmax.f32 %v3202_v4, %v986_v7  ;;  %v962_v13 = vpop.xlane.xlu2 %961  ;;  %v3215_v17 = vmax.f32 %v3206_v6, %v950_v14 }
 0x17f   : > { %v3212_v16 = vmax.f32 %v3204_v5, %v962_v13 }
 0x180   : > { %v1022_v18 = vsub.f32 %v3202_v4, %v3209_v10  ;;  %1755 = vst.msk [vmem:[#allocation2 + $0x68] sm:$0xff] %vm532_vm0, %v3209_v10  ;;  %1099 = vperm.xlu1 %2645, %v3191_v0   ;;  %1064 = vperm.xlu2 %2646, %v3215_v17   ;;  %v1010_v48 = vsub.f32 %v3206_v6, %v3215_v17 }
 0x181   : > { %1747 = vst.msk [vmem:[#allocation2 + $0x28] sm:$0xff] %vm532_vm0, %v3212_v16  ;;  %v1014_v6 = vsub.f32 %v3204_v5, %v3212_v16 }
 0x182   : > { %1743 = vst.msk [vmem:[#allocation2 + $0x8] sm:$0xff] %vm532_vm0, %v3215_v17  ;;  %v1021_v17 = vsub.f32 %v3188_v60, %v3194_v1  ;;  %v1017_v60 = vsub.f32 %v3186_v59, %v3191_v0 }
 0x185   : > { %v953_v24 = vpop.xlane.xlu1 %952  ;;  %v974_v26 = vpop.xlane.xlu0 %973 }
 0x186   : > { %v995_v25 = vmax.f32 %v930_v19, %v953_v24  ;;  %v989_v29 = vpop.xlane.xlu2 %988  ;;  %v1002_v30 = vmax.f32 %v937_v20, %v974_v26  ;;  %v935_v24 = vld [vmem:[#allocation2 + $0x38] sm:$0xff] }
 0x187   : > { %v3230_v31 = vmax.f32 %v3227_v22, %v989_v29 }
 0x188   : > { %1744 = vst.msk [vmem:[#allocation2 + $0x10] sm:$0xff] %vm532_vm0, %v995_v25  ;;  %1124 = vperm.xlu1 %2645, %v3209_v10   ;;  %1084 = vperm.xlu2 %2646, %v3212_v16   ;;  %v1011_v14 = vsub.f32 %v930_v19, %v995_v25  ;;  %v1013_v19 = vsub.f32 %v3171_v50, %v3176_v55  ;;  %v1035_v55 = vmul.f32 1.442695, %v1014_v6 }
 0x189   : > { %1751 = vst.msk [vmem:[#allocation2 + $0x48] sm:$0xff] %vm532_vm0, %v1002_v30  ;;  %v1023_v34 = vsub.f32 %v3227_v22, %v3230_v31  ;;  %1104 = vperm.xlu0 %2647, %v1002_v30  }
 0x18a   : > { %1756 = vst.msk [vmem:[#allocation2 + $0x70] sm:$0xff] %vm532_vm0, %v3230_v31 }
 0x18d   : > { %v977_v39 = vpop.xlane.xlu1 %976  ;;  %v965_v41 = vpop.xlane.xlu0 %964 }
 0x18e   : > { %v1003_v40 = vmax.f32 %v3240_v35, %v977_v39  ;;  %v980_v44 = vpop.xlane.xlu2 %979  ;;  %v999_v45 = vmax.f32 %v934_v36, %v965_v41  ;;  %v1029_v41 = vmul.f32 1.442695, %v1011_v14 }
 0x18f   : > { %v3246_v46 = vmax.f32 %v3242_v38, %v980_v44  ;;  %v3265_v44 = vpop.eup %2648 }
 0x190   : > { %1752 = vst.msk [vmem:[#allocation2 + $0x50] sm:$0xff] %vm532_vm0, %v1003_v40  ;;  %1089 = vperm.xlu1 %2645, %v999_v45   ;;  %v1015_v56 = vsub.f32 %v934_v36, %v999_v45  ;;  %v1019_v50 = vsub.f32 %v3240_v35, %v1003_v40  ;;  %v1041_v35 = vmul.f32 1.442695, %v1017_v60 }
 0x191   : > { %1748 = vst.msk [vmem:[#allocation2 + $0x30] sm:$0xff] %vm532_vm0, %v999_v45  ;;  %1069 = vperm.xlu0 %2647, %v995_v25   ;;  %v1027_v25 = vmul.f32 1.442695, %v1010_v48  ;;  %v1033_v45 = vmul.f32 1.442695, %v1013_v19  ;;  %v1020_v59 = vsub.f32 %v3242_v38, %v3246_v46  ;;  %v2585_v19 = vld [vmem:[%s3596_s3 + $0x38] sm:$0xff] }
 0x192   : > { %1753 = vst.msk [vmem:[#allocation2 + $0x58] sm:$0xff] %vm532_vm0, %v3246_v46  ;;  %v1037_v29 = vmul.f32 1.442695, %v1015_v56  ;;  %v1045_v56 = vmul.f32 1.442695, %v1019_v50  ;;  %1577 = vmatpush.bf16.msrb.mxu1 %v2585_v19  ;;  %v2589_v50 = vld [vmem:[%s3596_s3 + $0x58] sm:$0xff] }
 0x193   : > { %v1047_v0 = vmul.f32 1.442695, %v1020_v59  ;;  %1636 = vmatpush.bf16.msrb.mxu2 %v2589_v50  ;;  %v2587_v19 = vld [vmem:[%s3596_s3 + $0x48] sm:$0xff] }
 0x194   : > { %2650 = vpow2.f32 %v1037_v29 }
 0x195   : > { %v956_v54 = vpop.xlane.xlu1 %955  ;;  %v992_v7 = vpop.xlane.xlu0 %991  ;;  %2652 = vpow2.f32 %v1029_v41 }
 0x196   : > { %v996_v63 = vmax.f32 %v931_v49, %v956_v54  ;;  %v3257_v13 = vmax.f32 %v3254_v53, %v992_v7  ;;  %v1018_v54 = vsub.f32 %v937_v20, %v1002_v30  ;;  %2654 = vpow2.f32 %v1027_v25 }
 0x197   : > { %v1049_v20 = vmul.f32 1.442695, %v1021_v17  ;;  %v2583_v17 = vld [vmem:[%s3596_s3 + $0x28] sm:$0xff] }
 0x198   : > { %1745 = vst.msk [vmem:[#allocation2 + $0x18] sm:$0xff] %vm532_vm0, %v996_v63  ;;  %1074 = vperm.xlu2 %2646, %v996_v63   ;;  %v1024_v51 = vsub.f32 %v3254_v53, %v3257_v13  ;;  %1129 = vperm.xlu1 %2645, %v3230_v31   ;;  %v1043_v36 = vmul.f32 1.442695, %v1018_v54  ;;  %v1012_v1 = vsub.f32 %v931_v49, %v996_v63  ;;  %v2579_v54 = vld [vmem:[%s3596_s3 + $0x8] sm:$0xff] }
 0x199   : > { %1757 = vst.msk [vmem:[#allocation2 + $0x78] sm:$0xff] %vm532_vm0, %v3257_v13  ;;  %1109 = vperm.xlu0 %2647, %v1003_v40  }
 0x19a   : > { %v3274_v61 = vpop.eup %2650  ;;  %2656 = vpow2.f32 %v1043_v36  ;;  %v1031_v40 = vmul.f32 1.442695, %v1012_v1  ;;  %v2578_v36 = vld [vmem:[%s3596_s3] sm:$0xff] }
 0x19b   : > { %v3277_v7 = vpop.eup %2652  ;;  %2658 = vpow2.f32 %v1033_v45  ;;  %v2584_v45 = vld [vmem:[%s3596_s3 + $0x30] sm:$0xff] }
 0x19c   : > { %v3286_v30 = vpop.eup %2654  ;;  %2660 = vpow2.f32 %v1035_v55  ;;  %1578 = vmatpush.bf16.msrb.mxu1 %v2584_v45  ;;  %v2593_v55 = vld [vmem:[%s3596_s3 + $0x78] sm:$0xff] }
 0x19d   : > { %v968_v26 = vpop.xlane.xlu1 %967  ;;  %2662 = vpow2.f32 %v1049_v20  ;;  %1695 = vmatpush.bf16.msrb.mxu3 %v2593_v55 }
 0x19e   : > { %v1000_v39 = vmax.f32 %v935_v24, %v968_v26  ;;  %2664 = vpow2.f32 %v1045_v56 }
 0x19f   : > { %2666 = vpow2.f32 %v1041_v35  ;;  %v2592_v35 = vld [vmem:[%s3596_s3 + $0x70] sm:$0xff] }
 0x1a0   : > { %1749 = vst.msk [vmem:[#allocation2 + $0x38] sm:$0xff] %vm532_vm0, %v1000_v39  ;;  %1094 = vperm.xlu2 %2646, %v1000_v39   ;;  %1332 = vperm.xlu1 %2645, %v3265_v44   ;;  %v3288_v14 = vpop.eup %2656  ;;  %v1016_v16 = vsub.f32 %v935_v24, %v1000_v39  ;;  %2668 = vpow2.f32 %v1031_v40  ;;  %v2580_v39 = vld [vmem:[%s3596_s3 + $0x10] sm:$0xff] }
 0x1a1   : > { %1134 = vperm.xlu0 %2647, %v3257_v13   ;;  %v3291_v5 = vpop.eup %2658  ;;  %1579 = vmatpush.bf16.msrb.mxu1 %v2583_v17  ;;  %v2590_v17 = vld [vmem:[%s3596_s3 + $0x60] sm:$0xff] }
 0x1a2   : > { %v3297_v26 = vpop.eup %2660  ;;  %v1039_v29 = vmul.f32 1.442695, %v1016_v16  ;;  %v2588_v16 = vld [vmem:[%s3596_s3 + $0x50] sm:$0xff]  ;;  %1696 = vmatpush.bf16.msrb.mxu3 %v2592_v35 }
 0x1a3   : > { %v3299_v41 = vpop.eup %2662  ;;  %1637 = vmatpush.bf16.msrb.mxu2 %v2588_v16 }
 0x1a4   : > { %v3302_v48 = vpop.eup %2664  ;;  %2670 = vpow2.f32 %v1039_v29 }
 0x1a5   : > { %v3308_v49 = vpop.eup %2666  ;;  %2672 = vpow2.f32 %v1047_v0 }
 0x1a6   : > { %v3310_v63 = vpop.eup %2668 }
 0x1a7   : > { %1638 = vmatpush.bf16.msrb.mxu2 %v2587_v19 }
 0x1a8   : > { %1114 = vperm.xlu2 %2646, %v3246_v46   ;;  %1362 = vperm.xlu1 %2645, %v3274_v61   ;;  %v2581_v46 = vld [vmem:[%s3596_s3 + $0x18] sm:$0xff] }
 0x1a9   : > { %1342 = vperm.xlu0 %2647, %v3277_v7   ;;  %1518 = vmatpush.bf16.msrb.mxu0 %v2581_v46 }
 0x1aa   : > { %v3313_v24 = vpop.eup %2670 }
 0x1ab   : > { %v3317_v38 = vpop.eup %2672 }
 0x1ad   : > { %1519 = vmatpush.bf16.msrb.mxu0 %v2580_v39 }
 0x1b0   : > { %1337 = vperm.xlu2 %2646, %v3286_v30   ;;  %1377 = vperm.xlu1 %2645, %v3288_v14  }
 0x1b1   : > { %1352 = vperm.xlu0 %2647, %v3291_v5   ;;  %1520 = vmatpush.bf16.msrb.mxu0 %v2579_v54 }
 0x1b5   : > { %1521 = vmatpush.bf16.msrb.mxu0 %v2578_v36 }
 0x1b8   : > { %1357 = vperm.xlu2 %2646, %v3297_v26   ;;  %1392 = vperm.xlu1 %2645, %v3299_v41  }
 0x1b9   : > { %1382 = vperm.xlu0 %2647, %v3302_v48  }
 0x1c0   : > { %1372 = vperm.xlu2 %2646, %v3308_v49   ;;  %1347 = vperm.xlu1 %2645, %v3310_v63  }
 0x1c1   : > { %1367 = vperm.xlu0 %2647, %v3313_v24  }
 0x1c8   : > { %1387 = vperm.xlu2 %2646, %v3317_v38  }
 0x1d2   : > { %v1120_v25 = vpop.permute.xlu2 %1119 }
 0x1d3   : > { %v1149_v6 = vsub.f32 %v3108_v2, %v1120_v25  ;;  %v2582_v2 = vld [vmem:[%s3596_s3 + $0x20] sm:$0xff]  ;;  %v2591_v25 = vld [vmem:[%s3596_s3 + $0x68] sm:$0xff] }
 0x1d4   : > { %1580 = vmatpush.bf16.msrb.mxu1 %v2582_v2  ;;  %1697 = vmatpush.bf16.msrb.mxu3 %v2591_v25 }
 0x1d5   : > { %v1177_v20 = vmul.f32 1.442695, %v1149_v6  ;;  %v2586_v6 = vld [vmem:[%s3596_s3 + $0x40] sm:$0xff] }
 0x1d6   : > { %1639 = vmatpush.bf16.msrb.mxu2 %v2586_v6 }
 0x1d7   : > { %2674 = vpow2.f32 %v1177_v20 }
 0x1d8   : > { %1698 = vmatpush.bf16.msrb.mxu3 %v2590_v17 }
 0x1da   : > { %v1065_v56 = vpop.permute.xlu2 %1064 }
 0x1db   : > { %v1138_v60 = vsub.f32 %v3122_v12, %v1065_v56 }
 0x1dd   : > { %v1155_v1 = vmul.f32 1.442695, %v1138_v60  ;;  %v2675_v59 = vpop.eup %2674 }
 0x1de   : > { %v3361_v54 = vmul.f32 %v2675_v59, %v3095_v52 }
 0x1df   : > { %2676 = vpow2.f32 %v1155_v1 }
 0x1e0   : > { %v1269_v45 = vsel %vm944_vm3, %v3361_v54, 0.0 }
 0x1e2   : > { %v1060_v40 = vpop.permute.xlu1 %1059  ;;  %v1085_v29 = vpop.permute.xlu2 %1084 }
 0x1e3   : > { %v1137_v0 = vsub.f32 %v3098_v57, %v1060_v40  ;;  %v1142_v12 = vsub.f32 %v3119_v11, %v1085_v29 }
 0x1e5   : > { %v1153_v46 = vmul.f32 1.442695, %v1137_v0  ;;  %v1163_v39 = vmul.f32 1.442695, %v1142_v12  ;;  %v2677_v36 = vpop.eup %2676 }
 0x1e6   : > { %v1186_v57 = vmul.f32 %v2677_v36, %v3106_v62 }
 0x1e7   : > { %2678 = vpow2.f32 %v1153_v46 }
 0x1e8   : > { %2680 = vpow2.f32 %v1163_v39  ;;  %v1427_v2 = vpack.c.bf16 %v1186_v57, %v1186_v57 }
 0x1ea   : > { %v1080_v11 = vpop.permute.xlu1 %1079  ;;  %v1479_v59 = vunpack.c.l.b16 %v1427_v2 }
 0x1eb   : > { %v1141_v50 = vsub.f32 %v3100_v58, %v1080_v11  ;;  %1270 = vadd.xlane.f32.xlu0 %v1269_v45 }
 0x1ed   : > { %v2679_v55 = vpop.eup %2678  ;;  %v1161_v20 = vmul.f32 1.442695, %v1141_v50 }
 0x1ee   : > { %v1185_v56 = vmul.f32 %v2679_v55, %v3095_v52  ;;  %v2681_v60 = vpop.eup %2680 }
 0x1ef   : > { %2682 = vpow2.f32 %v1161_v20  ;;  %v1190_v40 = vmul.f32 %v2681_v60, %v3106_v62 }
 0x1f0   : > { %v1233_v1 = vsel %vm944_vm3, %v1185_v56, 0.0  ;;  %v1426_v16 = vpack.c.bf16 %v1185_v56, %v1185_v56 }
 0x1f1   : > { %1234 = vadd.xlane.f32.xlu2 %v1233_v1  ;;  %v1431_v25 = vpack.c.bf16 %v1190_v40, %v1190_v40 }
 0x1f2   : > { %v1075_v35 = vpop.permute.xlu2 %1074  ;;  %v1478_v29 = vunpack.c.l.b16 %v1426_v16  ;;  %v1100_v58 = vpop.permute.xlu1 %1099 }
 0x1f3   : > { %v1145_v0 = vsub.f32 %v3110_v3, %v1100_v58  ;;  %v1140_v6 = vsub.f32 %v3161_v43, %v1075_v35  ;;  %v1538_v3 = vunpack.c.l.b16 %v1431_v25  ;;  %v1236_v35 = vsel %vm944_vm3, %v1186_v57, 0.0 }
 0x1f4   : > { %v1482_v12 = vpack.c.b16 %v1479_v59, %v1478_v29 }
 0x1f5   : > { %v2683_v46 = vpop.eup %2682  ;;  %v1169_v39 = vmul.f32 1.442695, %v1145_v0  ;;  %v1159_v59 = vmul.f32 1.442695, %v1140_v6 }
 0x1f6   : > { %2450 = vmatmul.msk.bf16.vlgmr.msrb.gmra.mxu0 %vm944_vm3, %v1482_v12  ;;  %v1189_v19 = vmul.f32 %v2683_v46, %v3095_v52 }
 0x1f7   : > { %2684 = vpow2.f32 %v1169_v39 }
 0x1f8   : > { %v1245_v36 = vsel %vm944_vm3, %v1189_v19, 0.0  ;;  %v1430_v11 = vpack.c.bf16 %v1189_v19, %v1189_v19 }
 0x1f9   : > { %1246 = vadd.xlane.f32.xlu1 %v1245_v36  ;;  %v1438_v36 = vpack.c.bf16 %v3361_v54, %v3361_v54 }
 0x1fa   : > { %v1095_v45 = vpop.permute.xlu2 %1094  ;;  %v1537_v50 = vunpack.c.l.b16 %v1430_v11  ;;  %v1125_v55 = vpop.permute.xlu1 %1124 }
 0x1fb   : > { %v1144_v17 = vsub.f32 %v3167_v47, %v1095_v45  ;;  %v1150_v20 = vsub.f32 %v3124_v15, %v1125_v55  ;;  %v1105_v56 = vpop.permute.xlu0 %1104 }
 0x1fc   : > { %v1541_v2 = vpack.c.b16 %v1538_v3, %v1537_v50  ;;  %v1146_v60 = vsub.f32 %v3134_v23, %v1105_v56 }
 0x1fd   : > { %v2685_v1 = vpop.eup %2684  ;;  %v1167_v16 = vmul.f32 1.442695, %v1144_v17  ;;  %v1179_v29 = vmul.f32 1.442695, %v1150_v20  ;;  %v1655_v20 = vunpack.c.l.b16 %v1438_v36 }
 0x1fe   : > { %v1171_v58 = vmul.f32 1.442695, %v1146_v60  ;;  %2468 = vmatmul.msk.bf16.vlgmr.msrb.gmra.mxu1 %vm944_vm3, %v1541_v2  ;;  %v1193_v43 = vmul.f32 %v2685_v1, %v3095_v52 }
 0x1ff   : > { %2686 = vpow2.f32 %v1179_v29 }
 0x200   : > { %2688 = vpow2.f32 %v1171_v58  ;;  %v1257_v47 = vsel %vm944_vm3, %v1193_v43, 0.0  ;;  %v1434_v17 = vpack.c.bf16 %v1193_v43, %v1193_v43 }
 0x201   : > { %2690 = vpow2.f32 %v1167_v16  ;;  %1258 = vadd.xlane.f32.xlu2 %v1257_v47  ;;  %1237 = vadd.xlane.f32.xlu1 %v1236_v35 }
 0x202   : > { %v1115_v15 = vpop.permute.xlu2 %1114  ;;  %2692 = vpow2.f32 %v1159_v59  ;;  %v1090_v0 = vpop.permute.xlu1 %1089 }
 0x203   : > { %v1148_v23 = vsub.f32 %v3153_v37, %v1115_v15  ;;  %v1143_v12 = vsub.f32 %v3149_v33, %v1090_v0  ;;  %v1070_v46 = vpop.permute.xlu0 %1069  ;;  %v1248_v33 = vsel %vm944_vm3, %v1190_v40, 0.0 }
 0x204   : > { %v1139_v39 = vsub.f32 %v3132_v21, %v1070_v46 }
 0x205   : > { %v2687_v52 = vpop.eup %2686  ;;  %v1165_v19 = vmul.f32 1.442695, %v1143_v12  ;;  %v1175_v57 = vmul.f32 1.442695, %v1148_v23 }
 0x206   : > { %v2689_v25 = vpop.eup %2688  ;;  %v1157_v11 = vmul.f32 1.442695, %v1139_v39  ;;  %v1198_v45 = vmul.f32 %v2687_v52, %v3106_v62 }
 0x207   : > { %v2691_v6 = vpop.eup %2690  ;;  %2694 = vpow2.f32 %v1165_v19  ;;  %v1194_v37 = vmul.f32 %v2689_v25, %v3106_v62  ;;  %v1596_v62 = vunpack.c.l.b16 %v1434_v17 }
 0x208   : > { %v2693_v50 = vpop.eup %2692  ;;  %2696 = vpow2.f32 %v1157_v11  ;;  %v1272_v21 = vsel %vm944_vm3, %v1198_v45, 0.0  ;;  %v1439_v3 = vpack.c.bf16 %v1198_v45, %v1198_v45  ;;  %v1192_v60 = vmul.f32 %v2691_v6, %v3138_v27 }
 0x209   : > { %1249 = vadd.xlane.f32.xlu2 %v1248_v33  ;;  %1273 = vadd.xlane.f32.xlu1 %v1272_v21  ;;  %v1260_v54 = vsel %vm944_vm3, %v1194_v37, 0.0  ;;  %v1435_v55 = vpack.c.bf16 %v1194_v37, %v1194_v37  ;;  %2698 = vpow2.f32 %v1175_v57  ;;  %v1188_v29 = vmul.f32 %v2693_v50, %v3138_v27 }
 0x20a   : > { %v1656_v56 = vunpack.c.l.b16 %v1439_v3  ;;  %1261 = vadd.xlane.f32.xlu0 %v1260_v54  ;;  %v1130_v2 = vpop.permute.xlu1 %1129  ;;  %v1433_v12 = vpack.c.bf16 %v1192_v60, %v1192_v60  ;;  %v1338_v10 = vpop.permute.xlu2 %1337 }
 0x20b   : > { %v1597_v1 = vunpack.c.l.b16 %v1435_v55  ;;  %v1151_v16 = vsub.f32 %v3140_v28, %v1130_v2  ;;  %v1110_v40 = vpop.permute.xlu0 %1109  ;;  %v1429_v46 = vpack.c.bf16 %v1188_v29, %v1188_v29 }
 0x20c   : > { %v1659_v59 = vpack.c.b16 %v1656_v56, %v1655_v20  ;;  %v1147_v58 = vsub.f32 %v3146_v32, %v1110_v40  ;;  %v1540_v36 = vunpack.c.l.b16 %v1433_v12 }
 0x20d   : > { %v2695_v43 = vpop.eup %2694  ;;  %v1600_v47 = vpack.c.b16 %v1597_v1, %v1596_v62  ;;  %v1181_v35 = vmul.f32 1.442695, %v1151_v16  ;;  %v1481_v45 = vunpack.c.l.b16 %v1429_v46  ;;  %v1053_v46 = vmul.f32 1.442695, %v1023_v34 }
 0x20e   : > { %v2697_v15 = vpop.eup %2696  ;;  %v1173_v23 = vmul.f32 1.442695, %v1147_v58  ;;  %2504 = vmatmul.msk.bf16.vlgmr.msrb.gmra.mxu3 %vm944_vm3, %v1659_v59  ;;  %v1191_v0 = vmul.f32 %v2695_v43, %v3117_v8  ;;  %v1242_v43 = vsel %vm944_vm3, %v1188_v29, 0.0 }
 0x20f   : > { %2700 = vpow2.f32 %v1181_v35  ;;  %2486 = vmatmul.msk.bf16.vlgmr.msrb.gmra.mxu2 %vm944_vm3, %v1600_v47  ;;  %v1187_v28 = vmul.f32 %v2697_v15, %v3117_v8  ;;  %v2699_v39 = vpop.eup %2698  ;;  %v1254_v47 = vsel %vm944_vm3, %v1192_v60, 0.0  ;;  %v1055_v60 = vmul.f32 1.442695, %v1024_v51 }
 0x210   : > { %2702 = vpow2.f32 %v1173_v23  ;;  %v1432_v52 = vpack.c.bf16 %v1191_v0, %v1191_v0  ;;  %v1196_v6 = vmul.f32 %v2699_v39, %v3138_v27 }
 0x211   : > { %v1239_v32 = vsel %vm944_vm3, %v1187_v28, 0.0  ;;  %v1428_v19 = vpack.c.bf16 %v1187_v28, %v1187_v28 }
 0x212   : > { %1240 = vadd.xlane.f32.xlu0 %v1239_v32  ;;  %v1539_v25 = vunpack.c.l.b16 %v1432_v52  ;;  %v1437_v20 = vpack.c.bf16 %v1196_v6, %v1196_v6  ;;  %v1266_v28 = vsel %vm944_vm3, %v1196_v6, 0.0  ;;  %v1333_v4 = vpop.permute.xlu1 %1332  ;;  %v3448_v51 = vpop.permute.xlu2 %1357  ;;  %v1201_v6 = vld [vmem:[#allocation3] sm:$0xff] }
 0x213   : > { %v1480_v57 = vunpack.c.l.b16 %v1428_v19  ;;  %v1135_v11 = vpop.permute.xlu0 %1134 }
 0x214   : > { %v1152_v17 = vsub.f32 %v3159_v42, %v1135_v11  ;;  %v1542_v37 = vpack.c.b16 %v1540_v36, %v1539_v25  ;;  %v1251_v42 = vsel %vm944_vm3, %v1191_v0, 0.0  ;;  %v1599_v16 = vunpack.c.l.b16 %v1437_v20  ;;  %v1213_v25 = vld [vmem:[#allocation3 + $0x60] sm:$0xff] }
 0x215   : > { %v2701_v50 = vpop.eup %2700  ;;  %v1483_v33 = vpack.c.b16 %v1481_v45, %v1480_v57  ;;  %v1229_v57 = vmul.f32 %v3299_v41, %v1213_v25  ;;  %v1314_v20 = vld [vmem:[#allocation4] sm:$0xff] }
 0x216   : > { %v2703_v21 = vpop.eup %2702  ;;  %v1183_v3 = vmul.f32 1.442695, %v1152_v17  ;;  %2469 = vmatmul.msk.bf16.gmra.mxu1 %vm944_vm3, %v1542_v37  ;;  %v1199_v54 = vmul.f32 %v2701_v50, %v3117_v8  ;;  %v1217_v17 = vmul.f32 %v3265_v44, %v1201_v6  ;;  %v1209_v41 = vld [vmem:[#allocation3 + $0x40] sm:$0xff]  ;;  %v1319_v6 = vld [vmem:[#allocation4 + $0x28] sm:$0xff] }
 0x217   : > { %2451 = vmatmul.msk.bf16.gmra.mxu0 %vm944_vm3, %v1483_v33  ;;  %v1195_v55 = vmul.f32 %v2703_v21, %v3117_v8  ;;  %v1205_v21 = vld [vmem:[#allocation3 + $0x20] sm:$0xff]  ;;  %v1225_v44 = vmul.f32 %v3308_v49, %v1209_v41 }
 0x218   : > { %2704 = vpow2.f32 %v1183_v3  ;;  %v1275_v56 = vsel %vm944_vm3, %v1199_v54, 0.0  ;;  %v1440_v58 = vpack.c.bf16 %v1199_v54, %v1199_v54  ;;  %v1221_v3 = vmul.f32 %v3291_v5, %v1205_v21  ;;  %v1315_v5 = vld [vmem:[#allocation4 + $0x8] sm:$0xff]  ;;  %v1211_v21 = vld [vmem:[#allocation3 + $0x50] sm:$0xff]  ;;  %v1326_v41 = vld [vmem:[#allocation4 + $0x60] sm:$0xff] }
 0x219   : > { %1276 = vadd.xlane.f32.xlu2 %v1275_v56  ;;  %v1263_v2 = vsel %vm944_vm3, %v1195_v55, 0.0  ;;  %v1436_v62 = vpack.c.bf16 %v1195_v55, %v1195_v55  ;;  %v1202_v56 = vld [vmem:[#allocation3 + $0x8] sm:$0xff] }
 0x21a   : > { %1252 = vadd.xlane.f32.xlu0 %v1251_v42  ;;  %1264 = vadd.xlane.f32.xlu1 %v1263_v2  ;;  %v1657_v23 = vunpack.c.l.b16 %v1440_v58  ;;  %v3446_v13 = vpop.permute.xlu1 %1362  ;;  %v3454_v34 = vpop.permute.xlu2 %1372  ;;  %v1410_v42 = vmul.f32 %v1333_v4, %v1314_v20 }
 0x21b   : > { %v1598_v1 = vunpack.c.l.b16 %v1436_v62  ;;  %v3438_v39 = vpop.permute.xlu0 %1342  ;;  %v1218_v62 = vmul.f32 %v3286_v30, %v1202_v56 }
 0x21d   : > { %v1601_v40 = vpack.c.b16 %v1599_v16, %v1598_v1 }
 0x21e   : > { %v2705_v59 = vpop.eup %2704 }
 0x21f   : > { %2487 = vmatmul.msk.bf16.gmra.mxu2 %vm944_vm3, %v1601_v40  ;;  %v1200_v8 = vmul.f32 %v2705_v59, %v3138_v27  ;;  %v1051_v27 = vmul.f32 1.442695, %v1022_v18 }
 0x221   : > { %1243 = vadd.xlane.f32.xlu2 %v1242_v43  ;;  %v1278_v35 = vsel %vm944_vm3, %v1200_v8, 0.0  ;;  %v1441_v15 = vpack.c.bf16 %v1200_v8, %v1200_v8  ;;  %2706 = vpow2.f32 %v1051_v27  ;;  %v1318_v8 = vld [vmem:[#allocation4 + $0x20] sm:$0xff]  ;;  %v1206_v43 = vld [vmem:[#allocation3 + $0x28] sm:$0xff] }
 0x222   : > { %1255 = vadd.xlane.f32.xlu1 %v1254_v47  ;;  %1279 = vadd.xlane.f32.xlu0 %v1278_v35  ;;  %2708 = vpow2.f32 %v1055_v60  ;;  %v3452_v31 = vpop.permute.xlu1 %1377  ;;  %v3460_v36 = vpop.permute.xlu2 %1387  ;;  %v1214_v47 = vld [vmem:[#allocation3 + $0x68] sm:$0xff] }
 0x223   : > { %v1658_v0 = vunpack.c.l.b16 %v1441_v15  ;;  %2710 = vpow2.f32 %v1053_v46  ;;  %v1353_v53 = vpop.permute.xlu0 %1352  ;;  %v1210_v35 = vld [vmem:[#allocation3 + $0x48] sm:$0xff]  ;;  %v1411_v15 = vmul.f32 %v1338_v10, %v1315_v5 }
 0x224   : > { %v1414_v49 = vmul.f32 %v1353_v53, %v1318_v8  ;;  %v1226_v4 = vmul.f32 %v3288_v14, %v1210_v35 }
 0x225   : > { %v1660_v12 = vpack.c.b16 %v1658_v0, %v1657_v23  ;;  %v1222_v0 = vmul.f32 %v3297_v26, %v1206_v43  ;;  %v1203_v26 = vld [vmem:[#allocation3 + $0x10] sm:$0xff] }
 0x226   : > { %v1219_v53 = vmul.f32 %v3277_v7, %v1203_v26 }
 0x227   : > { %2505 = vmatmul.msk.bf16.gmra.mxu3 %vm944_vm3, %v1660_v12  ;;  %v2707_v29 = vpop.eup %2706 }
 0x228   : > { %v3440_v52 = vpop.eup %2708  ;;  %v1230_v12 = vmul.f32 %v2707_v29, %v1214_v47 }
 0x229   : > { %1267 = vadd.xlane.f32.xlu2 %v1266_v28  ;;  %v3443_v18 = vpop.eup %2710 }
 0x22a   : > { %v3458_v19 = vpop.permute.xlu1 %1392 }
 0x22b   : > { %v3450_v22 = vpop.permute.xlu0 %1382 }
 0x232   : > { %v3465_v37 = vpop.permute.xlu1 %1347 }
 0x233   : > { %v3456_v32 = vpop.permute.xlu0 %1367 }
 0x236   : > { %1397 = vperm.xlu0 %2647, %v2707_v29   ;;  %v1415_v29 = vmul.f32 %v3448_v51, %v1319_v6  ;;  %v1227_v51 = vmul.f32 %v3302_v48, %v1211_v21  ;;  %v1328_v21 = vld [vmem:[#allocation4 + $0x70] sm:$0xff] }
 0x23b   : > { %1407 = vperm.xlu1 %2645, %v3440_v52  }
 0x241   : > { %1402 = vperm.xlu2 %2646, %v3443_v18  }
 0x25e   : > { %v1271_v11 = vpop.xlane.xlu0 %1270 }
 0x25f   : > { %v1293_v45 = vadd.f32 %v1271_v11, %v1229_v57 }
 0x261   : > { %1310 = vst.msk [vmem:[#allocation3 + $0x60] sm:$0xff] %vm532_vm0, %v1293_v45 }
 0x264   : > { %v1235_v50 = vpop.xlane.xlu2 %1234 }
 0x265   : > { %v1281_v33 = vadd.f32 %v1235_v50, %v1217_v17 }
 0x267   : > { %1298 = vst.msk [vmem:[#allocation3] sm:$0xff] %vm532_vm0, %v1281_v33  ;;  %v1215_v33 = vld [vmem:[#allocation3 + $0x70] sm:$0xff] }
 0x26c   : > { %v1247_v54 = vpop.xlane.xlu1 %1246 }
 0x26d   : > { %v1285_v55 = vadd.f32 %v1247_v54, %v1221_v3  ;;  %v1207_v3 = vld [vmem:[#allocation3 + $0x30] sm:$0xff]  ;;  %v1231_v54 = vmul.f32 %v3443_v18, %v1215_v33  ;;  %v1204_v18 = vld [vmem:[#allocation3 + $0x18] sm:$0xff] }
 0x26e   : > { %v1223_v20 = vmul.f32 %v3274_v61, %v1207_v3 }
 0x26f   : > { %1302 = vst.msk [vmem:[#allocation3 + $0x20] sm:$0xff] %vm532_vm0, %v1285_v55 }
 0x273   : > { %v1523_v2 = vpop.f32.mrf.mxu0 }
 0x274   : > { %v1710_v1 = vadd.f32 %v1523_v2, %v1410_v42  ;;  %v1259_v16 = vpop.xlane.xlu2 %1258  ;;  %v1238_v40 = vpop.xlane.xlu1 %1237  ;;  %v1322_v2 = vld [vmem:[#allocation4 + $0x40] sm:$0xff] }
 0x275   : > { %v1289_v59 = vadd.f32 %v1259_v16, %v1225_v44  ;;  %v1282_v58 = vadd.f32 %v1238_v40, %v1218_v62  ;;  %v1316_v16 = vld [vmem:[#allocation4 + $0x10] sm:$0xff]  ;;  %v1422_v40 = vmul.f32 %v3458_v19, %v1326_v41  ;;  %v1418_v48 = vmul.f32 %v3454_v34, %v1322_v2 }
 0x276   : > { %1726 = vst.msk [vmem:[#allocation4] sm:$0xff] %vm565_vm1, %v1710_v1  ;;  %v1320_v1 = vld [vmem:[#allocation4 + $0x30] sm:$0xff]  ;;  %v1412_v47 = vmul.f32 %v3438_v39, %v1316_v16  ;;  %v1220_v19 = vmul.f32 %v3310_v63, %v1204_v18  ;;  %v1323_v39 = vld [vmem:[#allocation4 + $0x48] sm:$0xff] }
 0x277   : > { %1306 = vst.msk [vmem:[#allocation3 + $0x40] sm:$0xff] %vm532_vm0, %v1289_v59  ;;  %v1208_v59 = vld [vmem:[#allocation3 + $0x38] sm:$0xff]  ;;  %v1416_v5 = vmul.f32 %v3446_v13, %v1320_v1 }
 0x278   : > { %1299 = vst.msk [vmem:[#allocation3 + $0x8] sm:$0xff] %vm532_vm0, %v1282_v58  ;;  %v1216_v58 = vld [vmem:[#allocation3 + $0x78] sm:$0xff] }
 0x27b   : > { %v1525_v23 = vpop.f32.mrf.mxu0  ;;  %v1582_v30 = vpop.f32.mrf.mxu1 }
 0x27c   : > { %v1711_v28 = vadd.f32 %v1525_v23, %v1411_v15  ;;  %v1714_v27 = vadd.f32 %v1582_v30, %v1414_v49  ;;  %v1250_v60 = vpop.xlane.xlu2 %1249  ;;  %v1274_v46 = vpop.xlane.xlu1 %1273  ;;  %v1224_v30 = vmul.f32 %v3313_v24, %v1208_v59  ;;  %v1212_v24 = vld [vmem:[#allocation3 + $0x58] sm:$0xff] }
 0x27d   : > { %v1286_v25 = vadd.f32 %v1250_v60, %v1222_v0  ;;  %v1294_v57 = vadd.f32 %v1274_v46, %v1230_v12  ;;  %v1262_v11 = vpop.xlane.xlu0 %1261  ;;  %v1232_v0 = vmul.f32 %v3440_v52, %v1216_v58  ;;  %v1321_v46 = vld [vmem:[#allocation4 + $0x38] sm:$0xff]  ;;  %v1419_v52 = vmul.f32 %v3452_v31, %v1323_v39 }
 0x27e   : > { %1727 = vst.msk [vmem:[#allocation4 + $0x8] sm:$0xff] %vm565_vm1, %v1711_v28  ;;  %v1290_v45 = vadd.f32 %v1262_v11, %v1226_v4  ;;  %v1317_v4 = vld [vmem:[#allocation4 + $0x18] sm:$0xff]  ;;  %v1228_v26 = vmul.f32 %v3317_v38, %v1212_v24 }
 0x27f   : > { %1730 = vst.msk [vmem:[#allocation4 + $0x20] sm:$0xff] %vm565_vm1, %v1714_v27  ;;  %v1413_v11 = vmul.f32 %v3465_v37, %v1317_v4  ;;  %v1325_v38 = vld [vmem:[#allocation4 + $0x58] sm:$0xff] }
 0x280   : > { %1303 = vst.msk [vmem:[#allocation3 + $0x28] sm:$0xff] %vm532_vm0, %v1286_v25  ;;  %v1417_v25 = vmul.f32 %v3456_v32, %v1321_v46 }
 0x281   : > { %1311 = vst.msk [vmem:[#allocation3 + $0x68] sm:$0xff] %vm532_vm0, %v1294_v57 }
 0x282   : > { %1307 = vst.msk [vmem:[#allocation3 + $0x48] sm:$0xff] %vm532_vm0, %v1290_v45 }
 0x283   : > { %v1584_v10 = vpop.f32.mrf.mxu1 }
 0x284   : > { %v1715_v14 = vadd.f32 %v1584_v10, %v1415_v29 }
 0x285   : > { %v1241_v17 = vpop.xlane.xlu0 %1240 }
 0x286   : > { %1731 = vst.msk [vmem:[#allocation4 + $0x28] sm:$0xff] %vm565_vm1, %v1715_v14  ;;  %v1283_v50 = vadd.f32 %v1241_v17, %v1219_v53  ;;  %v1324_v17 = vld [vmem:[#allocation4 + $0x50] sm:$0xff] }
 0x287   : > { %v1420_v32 = vmul.f32 %v3450_v22, %v1324_v17  ;;  %v1329_v22 = vld [vmem:[#allocation4 + $0x78] sm:$0xff] }
 0x288   : > { %1300 = vst.msk [vmem:[#allocation3 + $0x10] sm:$0xff] %vm532_vm0, %v1283_v50 }
 0x28c   : > { %v1277_v55 = vpop.xlane.xlu2 %1276 }
 0x28d   : > { %v1295_v56 = vadd.f32 %v1277_v55, %v1231_v54  ;;  %v1265_v42 = vpop.xlane.xlu1 %1264  ;;  %v1253_v7 = vpop.xlane.xlu0 %1252  ;;  %v1327_v54 = vld [vmem:[#allocation4 + $0x68] sm:$0xff] }
 0x28e   : > { %v1291_v44 = vadd.f32 %v1265_v42, %v1227_v51  ;;  %v1287_v62 = vadd.f32 %v1253_v7, %v1223_v20  ;;  %v1421_v51 = vmul.f32 %v3460_v36, %v1325_v38 }
 0x28f   : > { %1312 = vst.msk [vmem:[#allocation3 + $0x70] sm:$0xff] %vm532_vm0, %v1295_v56 }
 0x290   : > { %1308 = vst.msk [vmem:[#allocation3 + $0x50] sm:$0xff] %vm532_vm0, %v1291_v44 }
 0x291   : > { %1304 = vst.msk [vmem:[#allocation3 + $0x30] sm:$0xff] %vm532_vm0, %v1287_v62  ;;  %v1700_v61 = vpop.f32.mrf.mxu3 }
 0x292   : > { %v1641_v8 = vpop.f32.mrf.mxu2  ;;  %v1722_v43 = vadd.f32 %v1700_v61, %v1422_v40 }
 0x293   : > { %v1718_v35 = vadd.f32 %v1641_v8, %v1418_v48  ;;  %v1587_v15 = vpop.f32.mrf.mxu1 }
 0x294   : > { %1738 = vst.msk [vmem:[#allocation4 + $0x60] sm:$0xff] %vm565_vm1, %v1722_v43  ;;  %v1528_v49 = vpop.f32.mrf.mxu0  ;;  %v1716_v23 = vadd.f32 %v1587_v15, %v1416_v5  ;;  %v1244_v34 = vpop.xlane.xlu2 %1243 }
 0x295   : > { %1734 = vst.msk [vmem:[#allocation4 + $0x40] sm:$0xff] %vm565_vm1, %v1718_v35  ;;  %v1712_v13 = vadd.f32 %v1528_v49, %v1412_v47  ;;  %v1284_v12 = vadd.f32 %v1244_v34, %v1220_v19  ;;  %v1256_v28 = vpop.xlane.xlu1 %1255  ;;  %v1280_v27 = vpop.xlane.xlu0 %1279 }
 0x296   : > { %1732 = vst.msk [vmem:[#allocation4 + $0x30] sm:$0xff] %vm565_vm1, %v1716_v23  ;;  %v1288_v60 = vadd.f32 %v1256_v28, %v1224_v30  ;;  %v1296_v63 = vadd.f32 %v1280_v27, %v1232_v0 }
 0x297   : > { %1728 = vst.msk [vmem:[#allocation4 + $0x10] sm:$0xff] %vm565_vm1, %v1712_v13 }
 0x298   : > { %1301 = vst.msk [vmem:[#allocation3 + $0x18] sm:$0xff] %vm532_vm0, %v1284_v12 }
 0x299   : > { %1305 = vst.msk [vmem:[#allocation3 + $0x38] sm:$0xff] %vm532_vm0, %v1288_v60  ;;  %v1702_v37 = vpop.f32.mrf.mxu3 }
 0x29a   : > { %1313 = vst.msk [vmem:[#allocation3 + $0x78] sm:$0xff] %vm532_vm0, %v1296_v63  ;;  %v1643_v57 = vpop.f32.mrf.mxu2 }
 0x29b   : > { %v1719_v45 = vadd.f32 %v1643_v57, %v1419_v52  ;;  %v1589_v6 = vpop.f32.mrf.mxu1 }
 0x29c   : > { %v1530_v29 = vpop.f32.mrf.mxu0  ;;  %v1717_v10 = vadd.f32 %v1589_v6, %v1417_v25  ;;  %v1268_v14 = vpop.xlane.xlu2 %1267 }
 0x29d   : > { %1735 = vst.msk [vmem:[#allocation4 + $0x48] sm:$0xff] %vm565_vm1, %v1719_v45  ;;  %v1713_v53 = vadd.f32 %v1530_v29, %v1413_v11  ;;  %v1292_v31 = vadd.f32 %v1268_v14, %v1228_v26 }
 0x29e   : > { %1733 = vst.msk [vmem:[#allocation4 + $0x38] sm:$0xff] %vm565_vm1, %v1717_v10 }
 0x29f   : > { %1729 = vst.msk [vmem:[#allocation4 + $0x18] sm:$0xff] %vm565_vm1, %v1713_v53 }
 0x2a0   : > { %1309 = vst.msk [vmem:[#allocation3 + $0x58] sm:$0xff] %vm532_vm0, %v1292_v31 }
 0x2a2   : > { %v1646_v50 = vpop.f32.mrf.mxu2 }
 0x2a3   : > { %v1720_v33 = vadd.f32 %v1646_v50, %v1420_v32 }
 0x2a4   : > { %v1403_v3 = vpop.permute.xlu2 %1402 }
 0x2a5   : > { %1736 = vst.msk [vmem:[#allocation4 + $0x50] sm:$0xff] %vm565_vm1, %v1720_v33  ;;  %v1424_v20 = vmul.f32 %v1403_v3, %v1328_v21 }
 0x2a8   : > { %v1398_v55 = vpop.permute.xlu0 %1397 }
 0x2a9   : > { %v1423_v41 = vmul.f32 %v1398_v55, %v1327_v54 }
 0x2aa   : > { %v1648_v56 = vpop.f32.mrf.mxu2  ;;  %v1705_v42 = vpop.f32.mrf.mxu3 }
 0x2ab   : > { %v1723_v7 = vadd.f32 %v1702_v37, %v1423_v41  ;;  %v1721_v2 = vadd.f32 %v1648_v56, %v1421_v51  ;;  %v1724_v44 = vadd.f32 %v1705_v42, %v1424_v20 }
 0x2ad   : > { %1739 = vst.msk [vmem:[#allocation4 + $0x68] sm:$0xff] %vm565_vm1, %v1723_v7  ;;  %v1408_v62 = vpop.permute.xlu1 %1407 }
 0x2ae   : > { %1737 = vst.msk [vmem:[#allocation4 + $0x58] sm:$0xff] %vm565_vm1, %v1721_v2  ;;  %v1425_v1 = vmul.f32 %v1408_v62, %v1329_v22 }
 0x2af   : > { %1740 = vst.msk [vmem:[#allocation4 + $0x70] sm:$0xff] %vm565_vm1, %v1724_v44 }
 0x2b2   : > { %v1707_v16 = vpop.f32.mrf.mxu3 }
 0x2b3   : > { %v1725_v40 = vadd.f32 %v1707_v16, %v1425_v1 }
 0x2b5   : > { %1741 = vst.msk [vmem:[#allocation4 + $0x78] sm:$0xff] %vm565_vm1, %v1725_v40 }
 0x2b6 PF: > { %v1823_v36 = vld [vmem:[#allocation3 + $0x10] sm:$0xff]  ;;  %v1821_v18 = vld [vmem:[#allocation3] sm:$0xff]  ;;  %v2807_v61 = vmov 0   ;;  %v1824_v59 = vld [vmem:[#allocation3 + $0x18] sm:$0xff] }
 0x2b7   : > { %v1911_v48 = vld [vmem:[#allocation3 + $0x20] sm:$0xff]  ;;  %2713 = vset.pattern.permute.xlu1 %v2807_v61  ;;  %2712 = vset.pattern.permute.xlu0 %v2807_v61  ;;  %vm1827_vm7 = vcmp.eq.f32.partialorder %v1823_v36, 0.0  ;;  %vm1825_vm8 = vcmp.eq.f32.partialorder %v1821_v18, 0.0  ;;  %v1822_v58 = vld [vmem:[#allocation3 + $0x8] sm:$0xff]  ;;  %vm1828_vm10 = vcmp.eq.f32.partialorder %v1824_v59, 0.0  ;;  %v1913_v57 = vld [vmem:[#allocation3 + $0x30] sm:$0xff] }
 0x2b8   : > { %vm1915_vm9 = vcmp.eq.f32.partialorder %v1911_v48, 0.0  ;;  %v1912_v5 = vld [vmem:[#allocation3 + $0x28] sm:$0xff]  ;;  %v2526_v8 = vsel %vm1827_vm7, 1.0, %v2804_v9  ;;  %v2524_v43 = vsel %vm1825_vm8, 1.0, %v2804_v9  ;;  %2714 = vset.pattern.permute.xlu2 %v2807_v61  ;;  %v2527_v49 = vsel %vm1828_vm10, 1.0, %v2804_v9  ;;  %v2001_v30 = vld [vmem:[#allocation3 + $0x40] sm:$0xff] }
 0x2b9   : > { %v2530_v47 = vsel %vm1915_vm9, 1.0, %v2804_v9  ;;  %v1839_v35 = vadd.f32 %v2526_v8, %v1823_v36  ;;  %v1837_v15 = vadd.f32 %v2524_v43, %v1821_v18  ;;  %vm1826_vm11 = vcmp.eq.f32.partialorder %v1822_v58, 0.0  ;;  %v2002_v13 = vld [vmem:[#allocation3 + $0x48] sm:$0xff]  ;;  %v2091_v28 = vld [vmem:[#allocation3 + $0x60] sm:$0xff]  ;;  %v1914_v45 = vld [vmem:[#allocation3 + $0x38] sm:$0xff] }
 0x2ba   : > { %v1927_v19 = vadd.f32 %v2530_v47, %v1911_v48  ;;  %vm1916_vm12 = vcmp.eq.f32.partialorder %v1912_v5, 0.0  ;;  %v2525_v23 = vsel %vm1826_vm11, 1.0, %v2804_v9  ;;  %v1840_v0 = vadd.f32 %v2527_v49, %v1824_v59  ;;  %v2092_v52 = vld [vmem:[#allocation3 + $0x68] sm:$0xff]  ;;  %v2003_v17 = vld [vmem:[#allocation3 + $0x50] sm:$0xff]  ;;  %v2004_v37 = vld [vmem:[#allocation3 + $0x58] sm:$0xff] }
 0x2bb   : > { %2716 = vrcp.f32 %v1839_v35  ;;  %v2531_v34 = vsel %vm1916_vm12, 1.0, %v2804_v9  ;;  %v1838_v12 = vadd.f32 %v2525_v23, %v1822_v58  ;;  %vm2005_vm13 = vcmp.eq.f32.partialorder %v2001_v30, 0.0  ;;  %v2093_v33 = vld [vmem:[#allocation3 + $0x70] sm:$0xff]  ;;  %v2094_v41 = vld [vmem:[#allocation3 + $0x78] sm:$0xff]  ;;  %v2597_v48 = vld [vmem:[%s3599_s6 + $0x8] sm:$0xff] }
 0x2bc   : > { %2718 = vrcp.f32 %v1837_v15  ;;  %v1928_v27 = vadd.f32 %v2531_v34, %v1912_v5  ;;  %vm2006_vm14 = vcmp.eq.f32.partialorder %v2002_v13, 0.0  ;;  %vm2095_vm15 = vcmp.eq.f32.partialorder %v2091_v28, 0.0  ;;  %1808 = vmatpush.bf16.msra.mxu0 %v2597_v48  ;;  %v2594_v61 = vld [vmem:[%s2927_s24] sm:$0xff]  ;;  %v2595_v43 = vld [vmem:[%s2927_s24 + $0x8] sm:$0xff] }
 0x2bd   : > { %2720 = vrcp.f32 %v1927_v19  ;;  %v2537_v63 = vsel %vm2005_vm13, 1.0, %v2804_v9  ;;  %v2538_v4 = vsel %vm2006_vm14, 1.0, %v2804_v9  ;;  %v2544_v24 = vsel %vm2095_vm15, 1.0, %v2804_v9  ;;  %v1875_v59 = vld [vmem:[%s3601_s8] sm:$0xf] }
 0x2be   : > { %2722 = vrcp.f32 %v1840_v0  ;;  %v2017_v25 = vadd.f32 %v2537_v63, %v2001_v30  ;;  %v2018_v11 = vadd.f32 %v2538_v4, %v2002_v13  ;;  %v2107_v26 = vadd.f32 %v2544_v24, %v2091_v28  ;;  %v2534_v5 = vld [vmem:[%s3601_s8 + $0x4] sm:$0xf]  ;;  %v2541_v47 = vld [vmem:[%s3601_s8 + $0x8] sm:$0xf]  ;;  %v2548_v15 = vld [vmem:[%s3601_s8 + $0xc] sm:$0xf] }
 0x2bf   : > { %2724 = vrcp.f32 %v1838_v12  ;;  %vm2096_vm0 = vcmp.eq.f32.partialorder %v2092_v52, 0.0  ;;  %vm1917_vm2 = vcmp.eq.f32.partialorder %v1913_v57, 0.0  ;;  %vm1918_vm3 = vcmp.eq.f32.partialorder %v1914_v45, 0.0  ;;  %v1845_v30 = vld [vmem:[#allocation4] sm:$0xff]  ;;  %v1847_v0 = vld [vmem:[#allocation4 + $0x10] sm:$0xff]  ;;  %v1848_v13 = vld [vmem:[#allocation4 + $0x18] sm:$0xff] }
 0x2c0   : > { %2726 = vrcp.f32 %v1928_v27  ;;  %v2545_v14 = vsel %vm2096_vm0, 1.0, %v2804_v9  ;;  %v2532_v53 = vsel %vm1917_vm2, 1.0, %v2804_v9  ;;  %v2533_v31 = vsel %vm1918_vm3, 1.0, %v2804_v9  ;;  %v1846_v12 = vld [vmem:[#allocation4 + $0x8] sm:$0xff] }
 0x2c1   : > { %v2717_v39 = vpop.eup %2716  ;;  %2728 = vrcp.f32 %v2017_v25  ;;  %v2108_v32 = vadd.f32 %v2545_v14, %v2092_v52  ;;  %v1929_v50 = vadd.f32 %v2532_v53, %v1913_v57  ;;  %v1930_v21 = vadd.f32 %v2533_v31, %v1914_v45  ;;  %v2026_v25 = vld [vmem:[#allocation4 + $0x40] sm:$0xff]  ;;  %v2027_v57 = vld [vmem:[#allocation4 + $0x48] sm:$0xff] }
 0x2c2   : > { %v2719_v60 = vpop.eup %2718  ;;  %1861 = vperm.xlu0 %2712, %v2717_v39   ;;  %2730 = vrcp.f32 %v2018_v11  ;;  %vm2007_vm4 = vcmp.eq.f32.partialorder %v2003_v17, 0.0  ;;  %vm2008_vm5 = vcmp.eq.f32.partialorder %v2004_v37, 0.0  ;;  %vm2097_vm6 = vcmp.eq.f32.partialorder %v2093_v33, 0.0  ;;  %v1937_v14 = vld [vmem:[#allocation4 + $0x28] sm:$0xff]  ;;  %v2116_v31 = vld [vmem:[#allocation4 + $0x60] sm:$0xff] }
 0x2c3   : > { %v2721_v46 = vpop.eup %2720  ;;  %1851 = vperm.xlu1 %2713, %v2719_v60   ;;  %2732 = vrcp.f32 %v2107_v26  ;;  %v2539_v55 = vsel %vm2007_vm4, 1.0, %v2804_v9  ;;  %v2540_v51 = vsel %vm2008_vm5, 1.0, %v2804_v9  ;;  %v2546_v20 = vsel %vm2097_vm6, 1.0, %v2804_v9 }
 0x2c4   : > { %1942 = vperm.xlu2 %2714, %v2721_v46   ;;  %v2723_v6 = vpop.eup %2722  ;;  %2734 = vrcp.f32 %v2108_v32  ;;  %v2019_v56 = vadd.f32 %v2539_v55, %v2003_v17  ;;  %v2020_v42 = vadd.f32 %v2540_v51, %v2004_v37  ;;  %v2109_v2 = vadd.f32 %v2546_v20, %v2093_v33  ;;  %v2117_v17 = vld [vmem:[#allocation4 + $0x68] sm:$0xff]  ;;  %v2028_v51 = vld [vmem:[#allocation4 + $0x50] sm:$0xff]  ;;  %v2029_v20 = vld [vmem:[#allocation4 + $0x58] sm:$0xff] }
 0x2c5   : > { %v2725_v29 = vpop.eup %2724  ;;  %2736 = vrcp.f32 %v1929_v50  ;;  %vm2098_vm7 = vcmp.eq.f32.partialorder %v2094_v41, 0.0  ;;  %vm1795_vm8 = vcmask 261120   ;;  %vm1883_vm9 = vcmask 1043456  }
 0x2c6   : > { %v2727_v10 = vpop.eup %2726  ;;  %2738 = vrcp.f32 %v1930_v21  ;;  %v2547_v62 = vsel %vm2098_vm7, 1.0, %v2804_v9  ;;  %v2596_v9 = vld [vmem:[%s3599_s6] sm:$0xff]  ;;  %v1885_v58 = vsel %vm1883_vm9, %v1875_v59, 0  ;;  %v1975_v8 = vsel %vm1883_vm9, %v2534_v5, 0 }
 0x2c7   : > { %v2729_v38 = vpop.eup %2728  ;;  %2740 = vrcp.f32 %v2019_v56  ;;  %v2110_v1 = vadd.f32 %v2547_v62, %v2094_v41  ;;  %1809 = vmatpush.bf16.msra.mxu0 %v2596_v9  ;;  %1894 = vmatpush.bf16.msra.mxu1 %v1885_v58  ;;  %v2065_v35 = vsel %vm1883_vm9, %v2541_v47, 0  ;;  %v2155_v19 = vsel %vm1883_vm9, %v2548_v15, 0  ;;  %v2118_v62 = vld [vmem:[#allocation4 + $0x70] sm:$0xff]  ;;  %v2715_v47 = vld [vmem:[%s3600_s7] ss:$0 sm:$0xff] }
 0x2c8   : > { %v2731_v3 = vpop.eup %2730  ;;  %2742 = vrcp.f32 %v2020_v42  ;;  %2598 = vmatpush.bf16.msra.mxu2 %v1885_v58  ;;  %2074 = vmatpush.bf16.msra.mxu3 %v2065_v35 }
 0x2c9   : > { %v2733_v54 = vpop.eup %2732  ;;  %2744 = vrcp.f32 %v2109_v2  ;;  %v1938_v2 = vld [vmem:[#allocation4 + $0x30] sm:$0xff] }
 0x2ca   : > { %1866 = vperm.xlu0 %2712, %v2723_v6   ;;  %v2735_v7 = vpop.eup %2734  ;;  %2746 = vrcp.f32 %v2110_v1  ;;  %2522 = vmatmul.msk.bf16.vlgmr.msra.gmra.mxu0 %vm1795_vm8, %v2594_v61 }
 0x2cb   : > { %1856 = vperm.xlu1 %2713, %v2725_v29   ;;  %v2737_v44 = vpop.eup %2736  ;;  %2164 = vmatpush.bf16.msrb.mxu1 %v2155_v19 }
 0x2cc   : > { %1947 = vperm.xlu2 %2714, %v2727_v10   ;;  %v2739_v22 = vpop.eup %2738  ;;  %1984 = vmatpush.bf16.msrb.mxu2 %v1975_v8  ;;  %v1936_v10 = vld [vmem:[#allocation4 + $0x20] sm:$0xff] }
 0x2cd   : > { %v2741_v16 = vpop.eup %2740 }
 0x2ce   : > { %v2743_v40 = vpop.eup %2742 }
 0x2cf   : > { %v2745_v36 = vpop.eup %2744 }
 0x2d0   : > { %v2747_v18 = vpop.eup %2746 }
 0x2d2   : > { %2032 = vperm.xlu0 %2712, %v2729_v38  }
 0x2d3   : > { %2037 = vperm.xlu1 %2713, %v2731_v3  }
 0x2d4   : > { %2122 = vperm.xlu2 %2714, %v2733_v54  }
 0x2da   : > { %2127 = vperm.xlu0 %2712, %v2735_v7   ;;  %2523 = vmatmul.msk.bf16.gmra.mxu0 %vm1795_vm8, %v2595_v43 }
 0x2db   : > { %1952 = vperm.xlu1 %2713, %v2737_v44  }
 0x2dc   : > { %1957 = vperm.xlu2 %2714, %v2739_v22   ;;  %v1939_v22 = vld [vmem:[#allocation4 + $0x38] sm:$0xff] }
 0x2e2   : > { %2042 = vperm.xlu0 %2712, %v2741_v16   ;;  %v2119_v16 = vld [vmem:[#allocation4 + $0x78] sm:$0xff] }
 0x2e3   : > { %2047 = vperm.xlu1 %2713, %v2743_v40  }
 0x2e4   : > { %2132 = vperm.xlu2 %2714, %v2745_v36  }
 0x2ea   : > { %2137 = vperm.xlu0 %2712, %v2747_v18  }
 0x31e   : > { %v1943_v49 = vpop.permute.xlu2 %1942 }
 0x31f   : > { %v1960_v32 = vmul.f32 %v1943_v49, %v1936_v10 }
 0x326   : > { %v1948_v28 = vpop.permute.xlu2 %1947 }
 0x327   : > { %v1961_v37 = vmul.f32 %v1948_v28, %v1937_v14 }
 0x329   : > { %v1964_v3 = vpack.c.bf16 %v1961_v37, %v1960_v32 }
 0x32e   : > { %v2123_v26 = vpop.permute.xlu2 %2122 }
 0x32f   : > { %v2140_v33 = vmul.f32 %v2123_v26, %v2116_v31 }
 0x334   : > { %v1862_v23 = vpop.permute.xlu0 %1861 }
 0x335   : > { %v1852_v34 = vpop.permute.xlu1 %1851  ;;  %v1871_v60 = vmul.f32 %v1862_v23, %v1847_v0 }
 0x336   : > { %v1869_v27 = vmul.f32 %v1852_v34, %v1845_v30  ;;  %v1958_v55 = vpop.permute.xlu2 %1957 }
 0x337   : > { %v1963_v18 = vmul.f32 %v1958_v55, %v1939_v22 }
 0x33c   : > { %v1867_v39 = vpop.permute.xlu0 %1866 }
 0x33d   : > { %v1872_v63 = vmul.f32 %v1867_v39, %v1848_v13  ;;  %v1857_v46 = vpop.permute.xlu1 %1856 }
 0x33e   : > { %v1870_v4 = vmul.f32 %v1857_v46, %v1846_v12  ;;  %v2133_v1 = vpop.permute.xlu2 %2132 }
 0x33f   : > { %v1874_v24 = vpack.c.bf16 %v1872_v63, %v1871_v60  ;;  %v2142_v48 = vmul.f32 %v2133_v1, %v2118_v62 }
 0x340   : > { %v1873_v52 = vpack.c.bf16 %v1870_v4, %v1869_v27 }
 0x341   : > { %2529 = vmatmul.msk.bf16.vlgmr.msra.gmra.mxu2 %vm565_vm1, %v1874_v24 }
 0x342   : > { %2528 = vmatmul.msk.bf16.vlgmr.msra.gmra.mxu1 %vm565_vm1, %v1873_v52 }
 0x344   : > { %v2033_v11 = vpop.permute.xlu0 %2032 }
 0x345   : > { %v2050_v45 = vmul.f32 %v2033_v11, %v2026_v25  ;;  %v2038_v6 = vpop.permute.xlu1 %2037 }
 0x346   : > { %v2051_v29 = vmul.f32 %v2038_v6, %v2027_v57 }
 0x347   : > { %v1811_v8 = vpop.f32.mrf.mxu0 }
 0x348   : > { %v2054_v53 = vpack.c.bf16 %v2051_v29, %v2050_v45  ;;  %v1812_v15 = vadd.f32 %v2715_v47, %v1811_v8 }
 0x34a   : > { %2542 = vmatmul.msk.bf16.vlgmr.msra.gmra.mxu3 %vm565_vm1, %v2054_v53 }
 0x34c   : > { %v2128_v50 = vpop.permute.xlu0 %2127 }
 0x34d   : > { %v2141_v38 = vmul.f32 %v2128_v50, %v2117_v17  ;;  %v1953_v21 = vpop.permute.xlu1 %1952 }
 0x34e   : > { %v1962_v40 = vmul.f32 %v1953_v21, %v1938_v2 }
 0x34f   : > { %v2144_v54 = vpack.c.bf16 %v2141_v38, %v2140_v33  ;;  %v1813_v19 = vpop.f32.mrf.mxu0 }
 0x350   : > { %v1965_v61 = vpack.c.bf16 %v1963_v18, %v1962_v40  ;;  %v1814_v13 = vadd.f32 %v2715_v47, %v1813_v19 }
 0x351   : > { %2535 = vmatmul.msk.bf16.vlgmr.msrb.gmra.mxu2 %vm565_vm1, %v1964_v3 }
 0x352   : > { %2549 = vmatmul.msk.bf16.vlgmr.msrb.gmra.mxu1 %vm565_vm1, %v2144_v54 }
 0x354   : > { %v2043_v41 = vpop.permute.xlu0 %2042 }
 0x355   : > { %v2052_v56 = vmul.f32 %v2043_v41, %v2028_v51  ;;  %v2048_v42 = vpop.permute.xlu1 %2047 }
 0x356   : > { %v2053_v7 = vmul.f32 %v2048_v42, %v2029_v20 }
 0x357   : > { %v1816_v28 = vpop.f32.mrf.mxu0 }
 0x358   : > { %v2055_v44 = vpack.c.bf16 %v2053_v7, %v2052_v56  ;;  %v1817_v24 = vadd.f32 %v2715_v47, %v1816_v28 }
 0x35a   : > { %2543 = vmatmul.msk.bf16.gmra.mxu3 %vm565_vm1, %v2055_v44 }
 0x35c   : > { %v2138_v36 = vpop.permute.xlu0 %2137 }
 0x35d   : > { %v2143_v9 = vmul.f32 %v2138_v36, %v2119_v16 }
 0x35f   : > { %v2145_v59 = vpack.c.bf16 %v2143_v9, %v2142_v48  ;;  %v1818_v11 = vpop.f32.mrf.mxu0 }
 0x360   : > { %v1819_v10 = vadd.f32 %v2715_v47, %v1818_v11 }
 0x361   : > { %2536 = vmatmul.msk.bf16.gmra.mxu2 %vm565_vm1, %v1965_v61 }
 0x362   : > { %2550 = vmatmul.msk.bf16.gmra.mxu1 %vm565_vm1, %v2145_v59 }
 0x3bf   : > { %v1896_v58 = vpop.f32.mrf.mxu1 }
 0x3c0   : > { %v1906_v34 = vadd.f32 %v1896_v58, %v1812_v15 }
 0x3c4   : > { %v1901_v5 = vpop.f32.mrf.mxu2 }
 0x3c5   : > { %v1908_v57 = vadd.f32 %v1901_v5, %v1817_v24 }
 0x3c7   : > { %v1898_v43 = vpop.f32.mrf.mxu1 }
 0x3c8   : > { %v1907_v60 = vadd.f32 %v1898_v43, %v1814_v13 }
 0x3cc   : > { %v1903_v35 = vpop.f32.mrf.mxu2 }
 0x3cd   : > { %v2076_v49 = vpop.f32.mrf.mxu3  ;;  %v1909_v31 = vadd.f32 %v1903_v35, %v1819_v10 }
 0x3cf   : > { %v2166_v23 = vpop.f32.mrf.mxu1 }
 0x3d4   : > { %v1986_v30 = vpop.f32.mrf.mxu2 }
 0x3d5   : > { %v1996_v0 = vadd.f32 %v1986_v30, %v1906_v34  ;;  %v2078_v39 = vpop.f32.mrf.mxu3 }
 0x3d7   : > { %v2086_v12 = vadd.f32 %v2076_v49, %v1996_v0  ;;  %v2168_v63 = vpop.f32.mrf.mxu1 }
 0x3d9   : > { %v2176_v27 = vadd.f32 %v2166_v23, %v2086_v12 }
 0x3db   : > { %2180 = vst.msk [vmem:[%s2933_s15] sm:$0xff] %vm1795_vm8, %v2176_v27 }
 0x3dc   : > { %v1988_v46 = vpop.f32.mrf.mxu2 }
 0x3dd   : > { %v1997_v4 = vadd.f32 %v1988_v46, %v1907_v60  ;;  %v2081_v45 = vpop.f32.mrf.mxu3 }
 0x3df   : > { %v2087_v52 = vadd.f32 %v2078_v39, %v1997_v4  ;;  %v2171_v29 = vpop.f32.mrf.mxu1 }
 0x3e1   : > { %v2177_v25 = vadd.f32 %v2168_v63, %v2087_v52 }
 0x3e3   : > { %2181 = vst.msk [vmem:[%s2933_s15 + $0x8] sm:$0xff] %vm1795_vm8, %v2177_v25 }
 0x3e4   : > { %v1991_v6 = vpop.f32.mrf.mxu2 }
 0x3e5   : > { %v1998_v26 = vadd.f32 %v1991_v6, %v1908_v57  ;;  %v2083_v37 = vpop.f32.mrf.mxu3 }
 0x3e7   : > { %v2088_v14 = vadd.f32 %v2081_v45, %v1998_v26  ;;  %v2173_v33 = vpop.f32.mrf.mxu1 }
 0x3e9   : > { %v2178_v53 = vadd.f32 %v2171_v29, %v2088_v14 }
 0x3eb   : > { %2182 = vst.msk [vmem:[%s2933_s15 + $0x10] sm:$0xff] %vm1795_vm8, %v2178_v53 }
 0x3ec   : > { %v1993_v17 = vpop.f32.mrf.mxu2 }
 0x3ed   : > { %v1999_v32 = vadd.f32 %v1993_v17, %v1909_v31 }
 0x3ef   : > { %v2089_v50 = vadd.f32 %v2083_v37, %v1999_v32 }
 0x3f1   : > { %v2179_v38 = vadd.f32 %v2173_v33, %v2089_v50 }
 0x3f3   : > { %2183 = vst.msk [vmem:[%s2933_s15 + $0x18] sm:$0xff] %vm1795_vm8, %v2179_v38 }
 0x3f4 PF: > { %s27_s17 = sadd.s32 1, %s2800_s17   ;;  %s3603_s13 = smov %s2788_s14 }
 0x3f5   : > { %p24_p12 = scmp.ge.s32.totalorder %s27_s17, 4   ;;  %s3604_s14 = smov %s2896_s20 }
 0x3f6   : > { %s3605_s15 = smov %s2796_s16  ;;  %s3606_s16 = smov %s3608_s0 }
 0x3f7   :  { %26 = sbr.rel (!%p24_p12) target bundleno = 9 (0x9), region = 161 }

</bundles_post_ra>
